<compile_context>
chip_gen: v6e
topology: v6e:2x2x1
jax: 0.10.0
libtpu: 0.0.40
codegen_flags: <defaults>
</compile_context>

<pallas_src>
import functools

import jax
import jax.numpy as jnp
from jax import lax
from jax.experimental import pallas as pl
from jax.experimental.pallas import tpu as pltpu

EVENT_MODULE_DILATIONS = (1, 2, 5, 1, 2, 5, 1, 2, 5, 1, 1, 1)


def _dgc_stack_kernel(lens_ref, seq_ref, w_ref, bg_ref, bi_ref, out_ref, xpad_ref,
                      *, dim, seq_len, dilations, batch_tile, halo, fuse_n, blend_dtype):
    D = dim
    L = seq_len
    bt = batch_tile
    H = halo
    M = bt * L
    nl = len(dilations)

    # Stage the seq block once into the zero-haloed scratch; it stays resident in VMEM
    # across all layers.  Halo strips (2*H rows) are re-zeroed every step: cheap, and safe
    # under megacore ("parallel") grids where program_id may never be 0 on a given core.
    zeros_halo = jnp.zeros((bt, H, D), dtype=xpad_ref.dtype)
    xpad_ref[:, :H, :] = zeros_halo
    xpad_ref[:, L + H:, :] = zeros_halo
    xpad_ref[:, H:L + H, :] = seq_ref[...]

    # Prefix mask rebuilt in-kernel from scalar-prefetched valid lengths (replaces the
    # lane-sparse (B, L, 1) HBM mask stream).  Built once, reused by all layers.
    base = pl.program_id(0) * bt
    pos = lax.broadcasted_iota(jnp.int32, (bt, L, 1), 1)
    row = lax.broadcasted_iota(jnp.int32, (bt, L, 1), 0)
    lens_blk = jnp.zeros((bt, L, 1), jnp.int32)
    for j in range(bt):
        lens_blk = jnp.where(row == j, lens_ref[base + j], lens_blk)
    mask3 = (pos < lens_blk).astype(blend_dtype)                     # (bt, L, 1)

    for l in range(nl):
        d = dilations[l]

        def tap(k, _d=d):
            lo = H + (k - 1) * _d                                    # static offset
            return xpad_ref[:, lo:lo + L, :].reshape(M, D)

        # Dilated size-3 conv as 3 shifted matmuls; MXU runs in the input dtype with
        # f32 accumulation.
        if fuse_n:
            # D % 128 == 0: gate+inner fused along N = 2D; split below is lane-aligned.
            acc = jnp.dot(tap(1), w_ref[l, 1], preferred_element_type=jnp.float32)
            for k in (0, 2):
                acc = acc + jnp.dot(tap(k), w_ref[l, k],
                                    preferred_element_type=jnp.float32)
            acc_g = acc[:, :D] + bg_ref[l]
            acc_i = acc[:, D:] + bi_ref[l]
        else:
            # D not a 128-multiple: gate / inner as separate matmuls so the conv output
            # is never lane-sliced.  Weight layout: [l, k] = gate tap k, [l, 3+k] = inner.
            xc = tap(1)
            acc_g = jnp.dot(xc, w_ref[l, 1], preferred_element_type=jnp.float32)
            acc_i = jnp.dot(xc, w_ref[l, 4], preferred_element_type=jnp.float32)
            for k in (0, 2):
                xk = tap(k)
                acc_g = acc_g + jnp.dot(xk, w_ref[l, k],
                                        preferred_element_type=jnp.float32)
                acc_i = acc_i + jnp.dot(xk, w_ref[l, 3 + k],
                                        preferred_element_type=jnp.float32)
            acc_g = acc_g + bg_ref[l]
            acc_i = acc_i + bi_ref[l]

        # Gate: out = sigmoid(h_gate) * seq + (1 - sigmoid(h_gate)) * h_inner, then mask.
        # 's' is re-read from the scratch (not kept live across the matmuls).
        # TODO(synk): dropout_dgc (p=0.1) is a no-op in eval mode; training dropout not modeled.
        g = jax.nn.sigmoid(acc_g).astype(blend_dtype)                # EUP sigmoid
        s = xpad_ref[:, H:L + H, :].reshape(M, D).astype(blend_dtype)
        hi = acc_i.astype(blend_dtype)
        gated = (g * s + (1.0 - g) * hi).reshape(bt, L, D) * mask3

        if l == nl - 1:
            out_ref[...] = gated.astype(out_ref.dtype)               # only HBM write of seq
        else:
            xpad_ref[:, H:L + H, :] = gated.astype(xpad_ref.dtype)   # feed the next layer


def _vmem_cap_bytes():
    try:
        kind = jax.devices()[0].device_kind.lower()
    except Exception:
        kind = ""
    # v5e/v6e: 128 MiB physical VMEM -> allow big blocks.  Conservative elsewhere (v7x: 64 MiB/TC).
    if ("v5" in kind) or ("v6" in kind):
        return 100 << 20
    return 40 << 20


def _auto_batch_tile(B, L, D, itemsize, sublane):
    """Largest batch tile that keeps M = bt*L sublane-foldable, blocks modest, and does not
    collapse the grid below 2 steps once M already fills the MXU (>= 512 rows)."""
    best = 1
    for bt in range(1, B + 1):
        if B % bt != 0:
            continue
        if bt > 1 and L % sublane != 0:
            continue
        if bt * L * D * itemsize > (4 << 20):
            continue
        if B // bt < 2 and bt * L > 512:
            continue
        best = bt
    return best


def dilated_gated_conv1d_stack(seq, lengths, weights, biases, dilations, *, batch_tile=None):
    """Fused DGCNN stack (eval-mode forward of NL chained DilatedGatedConv1d layers).

    seq:       (B, L, D) channels-last activations (f32 or bf16).
    lengths:   (B,) int valid lengths; mask[b, t] = (t < lengths[b]) — the prefix mask that
               EventModule builds from (t1 > 0) with right-padded token ids.
    weights:   list of NL torch-layout Conv1d weights, each (2D, D, 3).
    biases:    list of NL biases, each (2D,).
    dilations: tuple of NL ints (EventModule: (1,2,5,1,2,5,1,2,5,1,1,1)).
    """
    B, L, D = seq.shape
    nl = len(dilations)
    assert len(weights) == nl and len(biases) == nl
    H = int(max(dilations))
    isz = jnp.dtype(seq.dtype).itemsize
    sub = 8 * (4 // isz)                       # sublane rows per tile for this dtype
    if batch_tile is None:
        batch_tile = _auto_batch_tile(B, L, D, isz, sub)
    bt = int(batch_tile)
    assert B % bt == 0, "batch must be divisible by batch_tile"
    assert bt == 1 or L % sub == 0, "folding batch into the matmul M needs sublane-aligned L"

    lengths = jnp.asarray(lengths, jnp.int32).reshape(B)

    # Weight glue: torch (2D, D, 3) -> per-tap (D, 2D) with gate cols [:D], inner cols [D:].
    # Operands stay in seq.dtype (bf16-friendly MXU); biases are f32.
    ws = jnp.stack([jnp.transpose(w, (2, 1, 0)) for w in weights], 0)     # (NL, 3, D, 2D)
    fuse_n = (D % 128 == 0)
    if fuse_n:
        w_stack = ws.astype(seq.dtype)                                    # (NL, 3, D, 2D)
    else:
        w_stack = jnp.concatenate([ws[..., :D], ws[..., D:]], 1)          # (NL, 6, D, D)
        w_stack = w_stack.astype(seq.dtype)
    bg = jnp.stack([b[:D] for b in biases], 0).astype(jnp.float32).reshape(nl, 1, D)
    bi = jnp.stack([b[D:] for b in biases], 0).astype(jnp.float32).reshape(nl, 1, D)

    # bf16 elementwise gating on chips with a bf16 VPU/EUP (v6e/v7x); stay f32 on v5e / f32 in.
    try:
        kind = jax.devices()[0].device_kind.lower()
    except Exception:
        kind = ""
    blend_dtype = jnp.float32
    if seq.dtype == jnp.bfloat16 and "v5" not in kind:
        blend_dtype = jnp.bfloat16

    # VMEM budget: double-buffered seq in/out blocks + weight stacks + padded scratch, headroom.
    block_b = bt * L * D * isz
    w_b = int(w_stack.size) * isz + int(bg.size + bi.size) * 4
    scratch_b = bt * (L + 2 * H) * D * isz
    need = 2 * 2 * block_b + 2 * w_b + scratch_b
    vmem_bytes = int(min(max(2 * need, 8 << 20), _vmem_cap_bytes()))

    cost = pl.CostEstimate(
        flops=int(nl) * 2 * B * L * 3 * D * (2 * D),
        transcendentals=int(nl) * B * L * D,
        bytes_accessed=2 * B * L * D * isz + w_b + B * 4,
    )

    kernel = functools.partial(
        _dgc_stack_kernel, dim=D, seq_len=L, dilations=tuple(int(d) for d in dilations),
        batch_tile=bt, halo=H, fuse_n=fuse_n, blend_dtype=blend_dtype)

    w_ndim = w_stack.ndim
    return pl.pallas_call(
        kernel,
        out_shape=jax.ShapeDtypeStruct((B, L, D), seq.dtype),
        grid_spec=pltpu.PrefetchScalarGridSpec(
            num_scalar_prefetch=1,                                  # valid lengths -> SMEM
            grid=(B // bt,),
            in_specs=[
                pl.BlockSpec((bt, L, D), lambda i, lens: (i, 0, 0)),          # seq (read once)
                pl.BlockSpec(w_stack.shape, lambda i, lens: (0,) * w_ndim),   # grid-invariant
                pl.BlockSpec((nl, 1, D), lambda i, lens: (0, 0, 0)),          # gate bias (f32)
                pl.BlockSpec((nl, 1, D), lambda i, lens: (0, 0, 0)),          # inner bias (f32)
            ],
            out_specs=pl.BlockSpec((bt, L, D), lambda i, lens: (i, 0, 0)),
            scratch_shapes=[pltpu.VMEM((bt, L + 2 * H, D), seq.dtype)],       # haloed seq
        ),
        compiler_params=pltpu.CompilerParams(
            dimension_semantics=("parallel",),
            vmem_limit_bytes=vmem_bytes,
        ),
        cost_estimate=cost,
    )(lengths, seq, w_stack, bg, bi)


# ----------------------------- pure-JAX reference -----------------------------

def _reference_layer(seq, mask, weight, bias, dilation):
    """Mirror of DilatedGatedConv1d.forward (eval mode)."""
    D = seq.shape[-1]
    x = jnp.transpose(seq, (0, 2, 1))                                # permute(0, 2, 1)
    h = lax.conv_general_dilated(
        x, weight, window_strides=(1,), padding=[(dilation, dilation)],
        rhs_dilation=(dilation,), dimension_numbers=("NCH", "OIH", "NCH"))
    h = h + bias[None, :, None]
    h = jnp.transpose(h, (0, 2, 1))
    g = jax.nn.sigmoid(h[:, :, :D])
    return (g * seq + (1.0 - g) * h[:, :, D:]) * mask


def reference_stack(seq, lengths, weights, biases, dilations):
    L = seq.shape[1]
    mask = (jnp.arange(L)[None, :] < lengths[:, None]).astype(jnp.float32)[..., None]
    x = seq
    for w, b, d in zip(weights, biases, dilations):
        x = _reference_layer(x, mask, w, b, d)
    return x


if __name__ == "__main__":
    key = jax.random.PRNGKey(0)

    def make_params(k, nl, D):
        ws, bs = [], []
        for _ in range(nl):
            k, kw, kb = jax.random.split(k, 3)
            ws.append(0.1 * jax.random.normal(kw, (2 * D, D, 3), jnp.float32))
            bs.append(0.1 * jax.random.normal(kb, (2 * D,), jnp.float32))
        return ws, bs

    # Case 1: full EventModule stack (12 layers, dilations 1,2,5,...,1,1,1), f32,
    # batch rows folded into the matmul M (bt=2 -> even "parallel" grid of length 2).
    B, L, D = 4, 16, 32
    dils = EVENT_MODULE_DILATIONS
    k1, k2, k3 = jax.random.split(key, 3)
    seq = jax.random.normal(k1, (B, L, D), jnp.float32)
    lengths = jnp.array([L, L - 3, L - 7, L], jnp.int32)
    ws, bs = make_params(k2, len(dils), D)
    out = jax.block_until_ready(
        dilated_gated_conv1d_stack(seq, lengths, ws, bs, dils, batch_tile=2))
    ref = reference_stack(seq, lengths, ws, bs, dils)
    assert out.shape == (B, L, D)
    assert jnp.allclose(out, ref, atol=1e-4, rtol=1e-4), float(jnp.max(jnp.abs(out - ref)))

    # Case 2: bt=1 path + D multiple of 128 (exercises the fused N=2D matmul and the
    # lane-aligned accumulator split), short 3-layer stack, f32, strict check.
    B2, L2, D2 = 2, 16, 128
    dils2 = (1, 2, 5)
    seq2 = jax.random.normal(k3, (B2, L2, D2), jnp.float32)
    lengths2 = jnp.array([L2, L2 - 5], jnp.int32)
    ws2, bs2 = make_params(jax.random.PRNGKey(7), len(dils2), D2)
    out2 = jax.block_until_ready(
        dilated_gated_conv1d_stack(seq2, lengths2, ws2, bs2, dils2, batch_tile=1))
    ref2 = reference_stack(seq2, lengths2, ws2, bs2, dils2)
    assert jnp.allclose(out2, ref2, atol=1e-4, rtol=1e-4), float(jnp.max(jnp.abs(out2 - ref2)))

    # Case 3: bf16 activations/weights into the MXU (f32 accumulation; bf16 blend on
    # v6e/v7x), 3-layer stack, loose check vs the f32 reference.
    dils3 = (1, 2, 5)
    ws3, bs3 = ws[:3], bs[:3]
    out3 = jax.block_until_ready(
        dilated_gated_conv1d_stack(seq.astype(jnp.bfloat16), lengths, ws3, bs3, dils3,
                                   batch_tile=2))
    ref3 = reference_stack(seq, lengths, ws3, bs3, dils3)
    assert out3.dtype == jnp.bfloat16
    err3 = float(jnp.max(jnp.abs(out3.astype(jnp.float32) - ref3)))
    assert err3 < 2e-1, err3

    print("KERNEL_OK")
</pallas_src>

<mosaic_0001>
module attributes {stable_mosaic.version = 11 : i64} {
  func.func @_dgc_stack_kernel(%arg0: i32, %arg1: memref<4xi32, #tpu.memory_space<smem>>, %arg2: memref<2x16x32xf32, #tpu.memory_space<vmem>>, %arg3: memref<12x6x32x32xf32, #tpu.memory_space<vmem>>, %arg4: memref<12x1x32xf32, #tpu.memory_space<vmem>>, %arg5: memref<12x1x32xf32, #tpu.memory_space<vmem>>, %arg6: memref<2x16x32xf32, #tpu.memory_space<vmem>>, %arg7: memref<2x26x32xf32, #tpu.memory_space<vmem>>) attributes {dimension_semantics = [#tpu.dimension_semantics<parallel>], iteration_bounds = array<i64: 2>, scalar_prefetch = 1 : i64, scratch_operands = 1 : i64, tpu.core_type = #tpu.core_type<tc>, window_params = [{transform_indices = @transform_0, window_bounds = array<i64: 2, 16, 32>}, {pipeline_mode = #tpu.pipeline_mode<synchronous>, transform_indices = @transform_1, window_bounds = array<i64: 12, 6, 32, 32>}, {pipeline_mode = #tpu.pipeline_mode<synchronous>, transform_indices = @transform_2, window_bounds = array<i64: 12, 1, 32>}, {pipeline_mode = #tpu.pipeline_mode<synchronous>, transform_indices = @transform_3, window_bounds = array<i64: 12, 1, 32>}, {transform_indices = @transform_4, window_bounds = array<i64: 2, 16, 32>}]} {
    %cst = arith.constant 0.000000e+00 : f32
    %0 = vector.broadcast %cst : f32 to vector<2x5x32xf32>
    %c0 = arith.constant 0 : index
    %c0_0 = arith.constant 0 : index
    %c0_1 = arith.constant 0 : index
    %1 = vector.load %arg7[%c0, %c0_0, %c0_1] : memref<2x26x32xf32, #tpu.memory_space<vmem>>, vector<2x5x32xf32>
    tpu.vector_store %arg7[%c0, %c0_0, %c0_1], %0 {strides = array<i32>} : memref<2x26x32xf32, #tpu.memory_space<vmem>>, vector<2x5x32xf32>,
    %c0_2 = arith.constant 0 : index
    %c21 = arith.constant 21 : index
    %c0_3 = arith.constant 0 : index
    %2 = vector.load %arg7[%c0_2, %c21, %c0_3] : memref<2x26x32xf32, #tpu.memory_space<vmem>>, vector<2x5x32xf32>
    tpu.vector_store %arg7[%c0_2, %c21, %c0_3], %0 {strides = array<i32>} : memref<2x26x32xf32, #tpu.memory_space<vmem>>, vector<2x5x32xf32>,
    %c0_4 = arith.constant 0 : index
    %c0_5 = arith.constant 0 : index
    %c0_6 = arith.constant 0 : index
    %3 = vector.load %arg2[%c0_4, %c0_5, %c0_6] : memref<2x16x32xf32, #tpu.memory_space<vmem>>, vector<2x16x32xf32>
    %c0_7 = arith.constant 0 : index
    %c5 = arith.constant 5 : index
    %c0_8 = arith.constant 0 : index
    %4 = vector.load %arg7[%c0_7, %c5, %c0_8] : memref<2x26x32xf32, #tpu.memory_space<vmem>>, vector<2x16x32xf32>
    tpu.vector_store %arg7[%c0_7, %c5, %c0_8], %3 {strides = array<i32>} : memref<2x26x32xf32, #tpu.memory_space<vmem>>, vector<2x16x32xf32>,
    %c2_i32 = arith.constant 2 : i32
    %5 = arith.muli %arg0, %c2_i32 : i32
    %6 = tpu.iota {dimensions = array<i32: 1>} : vector<2x16x1xi32>
    %7 = tpu.iota {dimensions = array<i32: 0>} : vector<2x16x1xi32>
    %c0_i32 = arith.constant 0 : i32
    %8 = vector.broadcast %c0_i32 : i32 to vector<2x16x1xi32>
    %c0_i32_9 = arith.constant 0 : i32
    %9 = vector.broadcast %c0_i32_9 : i32 to vector<2x16x1xi32>
    %10 = arith.cmpi eq, %7, %9 : vector<2x16x1xi32>
    %c0_i32_10 = arith.constant 0 : i32
    %11 = arith.addi %5, %c0_i32_10 : i32
    %12 = arith.index_cast %11 : i32 to index
    %13 = memref.load %arg1[%12] : memref<4xi32, #tpu.memory_space<smem>>
    %14 = vector.broadcast %13 : i32 to vector<2x16x1xi32>
    %15 = arith.select %10, %14, %8 : vector<2x16x1xi1>, vector<2x16x1xi32>
    %c1_i32 = arith.constant 1 : i32
    %16 = vector.broadcast %c1_i32 : i32 to vector<2x16x1xi32>
    %17 = arith.cmpi eq, %7, %16 : vector<2x16x1xi32>
    %c1_i32_11 = arith.constant 1 : i32
    %18 = arith.addi %5, %c1_i32_11 : i32
    %19 = arith.index_cast %18 : i32 to index
    %20 = memref.load %arg1[%19] : memref<4xi32, #tpu.memory_space<smem>>
    %21 = vector.broadcast %20 : i32 to vector<2x16x1xi32>
    %22 = arith.select %17, %21, %15 : vector<2x16x1xi1>, vector<2x16x1xi32>
    %23 = arith.cmpi slt, %6, %22 : vector<2x16x1xi32>
    %24 = arith.extui %23 : vector<2x16x1xi1> to vector<2x16x1xi32>
    %25 = arith.sitofp %24 : vector<2x16x1xi32> to vector<2x16x1xf32>
    %c0_12 = arith.constant 0 : index
    %c5_13 = arith.constant 5 : index
    %c0_14 = arith.constant 0 : index
    %26 = vector.load %arg7[%c0_12, %c5_13, %c0_14] : memref<2x26x32xf32, #tpu.memory_space<vmem>>, vector<2x16x32xf32>
    %27 = vector.shape_cast %26 : vector<2x16x32xf32> to vector<32x32xf32>
    %c0_15 = arith.constant 0 : index
    %c1 = arith.constant 1 : index
    %c0_16 = arith.constant 0 : index
    %c0_17 = arith.constant 0 : index
    %28 = vector.load %arg3[%c0_15, %c1, %c0_16, %c0_17] : memref<12x6x32x32xf32, #tpu.memory_space<vmem>>, vector<1x1x32x32xf32>
    %29 = vector.shape_cast %28 : vector<1x1x32x32xf32> to vector<32x32xf32>
    %cst_18 = arith.constant dense<0.000000e+00> : vector<32x32xf32>
    %30 = tpu.matmul %27, %29, %cst_18 {dimension_numbers = #tpu.dot_dimension_numbers<[1], [0], [0], [1], [0, 0, 1, 1], [], []>} : vector<32x32xf32>, vector<32x32xf32>, vector<32x32xf32> -> vector<32x32xf32>
    %c0_19 = arith.constant 0 : index
    %c4 = arith.constant 4 : index
    %c0_20 = arith.constant 0 : index
    %c0_21 = arith.constant 0 : index
    %31 = vector.load %arg3[%c0_19, %c4, %c0_20, %c0_21] : memref<12x6x32x32xf32, #tpu.memory_space<vmem>>, vector<1x1x32x32xf32>
    %32 = vector.shape_cast %31 : vector<1x1x32x32xf32> to vector<32x32xf32>
    %cst_22 = arith.constant dense<0.000000e+00> : vector<32x32xf32>
    %33 = tpu.matmul %27, %32, %cst_22 {dimension_numbers = #tpu.dot_dimension_numbers<[1], [0], [0], [1], [0, 0, 1, 1], [], []>} : vector<32x32xf32>, vector<32x32xf32>, vector<32x32xf32> -> vector<32x32xf32>
    %c0_23 = arith.constant 0 : index
    %c4_24 = arith.constant 4 : index
    %c0_25 = arith.constant 0 : index
    %34 = vector.load %arg7[%c0_23, %c4_24, %c0_25] : memref<2x26x32xf32, #tpu.memory_space<vmem>>, vector<2x16x32xf32>
    %35 = vector.shape_cast %34 : vector<2x16x32xf32> to vector<32x32xf32>
    %c0_26 = arith.constant 0 : index
    %c0_27 = arith.constant 0 : index
    %c0_28 = arith.constant 0 : index
    %c0_29 = arith.constant 0 : index
    %36 = vector.load %arg3[%c0_26, %c0_27, %c0_28, %c0_29] : memref<12x6x32x32xf32, #tpu.memory_space<vmem>>, vector<1x1x32x32xf32>
    %37 = vector.shape_cast %36 : vector<1x1x32x32xf32> to vector<32x32xf32>
    %cst_30 = arith.constant dense<0.000000e+00> : vector<32x32xf32>
    %38 = tpu.matmul %35, %37, %cst_30 {dimension_numbers = #tpu.dot_dimension_numbers<[1], [0], [0], [1], [0, 0, 1, 1], [], []>} : vector<32x32xf32>, vector<32x32xf32>, vector<32x32xf32> -> vector<32x32xf32>
    %39 = arith.addf %30, %38 : vector<32x32xf32>
    %c0_31 = arith.constant 0 : index
    %c3 = arith.constant 3 : index
    %c0_32 = arith.constant 0 : index
    %c0_33 = arith.constant 0 : index
    %40 = vector.load %arg3[%c0_31, %c3, %c0_32, %c0_33] : memref<12x6x32x32xf32, #tpu.memory_space<vmem>>, vector<1x1x32x32xf32>
    %41 = vector.shape_cast %40 : vector<1x1x32x32xf32> to vector<32x32xf32>
    %cst_34 = arith.constant dense<0.000000e+00> : vector<32x32xf32>
    %42 = tpu.matmul %35, %41, %cst_34 {dimension_numbers = #tpu.dot_dimension_numbers<[1], [0], [0], [1], [0, 0, 1, 1], [], []>} : vector<32x32xf32>, vector<32x32xf32>, vector<32x32xf32> -> vector<32x32xf32>
    %43 = arith.addf %33, %42 : vector<32x32xf32>
    %c0_35 = arith.constant 0 : index
    %c6 = arith.constant 6 : index
    %c0_36 = arith.constant 0 : index
    %44 = vector.load %arg7[%c0_35, %c6, %c0_36] : memref<2x26x32xf32, #tpu.memory_space<vmem>>, vector<2x16x32xf32>
    %45 = vector.shape_cast %44 : vector<2x16x32xf32> to vector<32x32xf32>
    %c0_37 = arith.constant 0 : index
    %c2 = arith.constant 2 : index
    %c0_38 = arith.constant 0 : index
    %c0_39 = arith.constant 0 : index
    %46 = vector.load %arg3[%c0_37, %c2, %c0_38, %c0_39] : memref<12x6x32x32xf32, #tpu.memory_space<vmem>>, vector<1x1x32x32xf32>
    %47 = vector.shape_cast %46 : vector<1x1x32x32xf32> to vector<32x32xf32>
    %cst_40 = arith.constant dense<0.000000e+00> : vector<32x32xf32>
    %48 = tpu.matmul %45, %47, %cst_40 {dimension_numbers = #tpu.dot_dimension_numbers<[1], [0], [0], [1], [0, 0, 1, 1], [], []>} : vector<32x32xf32>, vector<32x32xf32>, vector<32x32xf32> -> vector<32x32xf32>
    %49 = arith.addf %39, %48 : vector<32x32xf32>
    %c0_41 = arith.constant 0 : index
    %c5_42 = arith.constant 5 : index
    %c0_43 = arith.constant 0 : index
    %c0_44 = arith.constant 0 : index
    %50 = vector.load %arg3[%c0_41, %c5_42, %c0_43, %c0_44] : memref<12x6x32x32xf32, #tpu.memory_space<vmem>>, vector<1x1x32x32xf32>
    %51 = vector.shape_cast %50 : vector<1x1x32x32xf32> to vector<32x32xf32>
    %cst_45 = arith.constant dense<0.000000e+00> : vector<32x32xf32>
    %52 = tpu.matmul %45, %51, %cst_45 {dimension_numbers = #tpu.dot_dimension_numbers<[1], [0], [0], [1], [0, 0, 1, 1], [], []>} : vector<32x32xf32>, vector<32x32xf32>, vector<32x32xf32> -> vector<32x32xf32>
    %53 = arith.addf %43, %52 : vector<32x32xf32>
    %c0_46 = arith.constant 0 : index
    %c0_47 = arith.constant 0 : index
    %c0_48 = arith.constant 0 : index
    %54 = vector.load %arg4[%c0_46, %c0_47, %c0_48] : memref<12x1x32xf32, #tpu.memory_space<vmem>>, vector<1x1x32xf32>
    %55 = vector.shape_cast %54 : vector<1x1x32xf32> to vector<1x32xf32>
    %56 = vector.broadcast %55 : vector<1x32xf32> to vector<32x32xf32>
    %57 = arith.addf %49, %56 : vector<32x32xf32>
    %c0_49 = arith.constant 0 : index
    %c0_50 = arith.constant 0 : index
    %c0_51 = arith.constant 0 : index
    %58 = vector.load %arg5[%c0_49, %c0_50, %c0_51] : memref<12x1x32xf32, #tpu.memory_space<vmem>>, vector<1x1x32xf32>
    %59 = vector.shape_cast %58 : vector<1x1x32xf32> to vector<1x32xf32>
    %60 = vector.broadcast %59 : vector<1x32xf32> to vector<32x32xf32>
    %61 = arith.addf %53, %60 : vector<32x32xf32>
    %62 = arith.negf %57 : vector<32x32xf32>
    %63 = math.exp %62 : vector<32x32xf32>
    %cst_52 = arith.constant 1.000000e+00 : f32
    %64 = vector.broadcast %cst_52 : f32 to vector<32x32xf32>
    %65 = arith.addf %64, %63 : vector<32x32xf32>
    %66 = arith.divf %64, %65 : vector<32x32xf32>
    %c0_53 = arith.constant 0 : index
    %c5_54 = arith.constant 5 : index
    %c0_55 = arith.constant 0 : index
    %67 = vector.load %arg7[%c0_53, %c5_54, %c0_55] : memref<2x26x32xf32, #tpu.memory_space<vmem>>, vector<2x16x32xf32>
    %68 = vector.shape_cast %67 : vector<2x16x32xf32> to vector<32x32xf32>
    %69 = arith.mulf %66, %68 : vector<32x32xf32>
    %cst_56 = arith.constant 1.000000e+00 : f32
    %70 = vector.broadcast %cst_56 : f32 to vector<32x32xf32>
    %71 = arith.subf %70, %66 : vector<32x32xf32>
    %72 = arith.mulf %71, %61 : vector<32x32xf32>
    %73 = arith.addf %69, %72 : vector<32x32xf32>
    %74 = vector.shape_cast %73 : vector<32x32xf32> to vector<2x16x32xf32>
    %75 = vector.broadcast %25 : vector<2x16x1xf32> to vector<2x16x32xf32>
    %76 = arith.mulf %74, %75 : vector<2x16x32xf32>
    %c0_57 = arith.constant 0 : index
    %c5_58 = arith.constant 5 : index
    %c0_59 = arith.constant 0 : index
    %77 = vector.load %arg7[%c0_57, %c5_58, %c0_59] : memref<2x26x32xf32, #tpu.memory_space<vmem>>, vector<2x16x32xf32>
    tpu.vector_store %arg7[%c0_57, %c5_58, %c0_59], %76 {strides = array<i32>} : memref<2x26x32xf32, #tpu.memory_space<vmem>>, vector<2x16x32xf32>,
    %c0_60 = arith.constant 0 : index
    %c5_61 = arith.constant 5 : index
    %c0_62 = arith.constant 0 : index
    %78 = vector.load %arg7[%c0_60, %c5_61, %c0_62] : memref<2x26x32xf32, #tpu.memory_space<vmem>>, vector<2x16x32xf32>
    %79 = vector.shape_cast %78 : vector<2x16x32xf32> to vector<32x32xf32>
    %c1_63 = arith.constant 1 : index
    %c1_64 = arith.constant 1 : index
    %c0_65 = arith.constant 0 : index
    %c0_66 = arith.constant 0 : index
    %80 = vector.load %arg3[%c1_63, %c1_64, %c0_65, %c0_66] : memref<12x6x32x32xf32, #tpu.memory_space<vmem>>, vector<1x1x32x32xf32>
    %81 = vector.shape_cast %80 : vector<1x1x32x32xf32> to vector<32x32xf32>
    %cst_67 = arith.constant dense<0.000000e+00> : vector<32x32xf32>
    %82 = tpu.matmul %79, %81, %cst_67 {dimension_numbers = #tpu.dot_dimension_numbers<[1], [0], [0], [1], [0, 0, 1, 1], [], []>} : vector<32x32xf32>, vector<32x32xf32>, vector<32x32xf32> -> vector<32x32xf32>
    %c1_68 = arith.constant 1 : index
    %c4_69 = arith.constant 4 : index
    %c0_70 = arith.constant 0 : index
    %c0_71 = arith.constant 0 : index
    %83 = vector.load %arg3[%c1_68, %c4_69, %c0_70, %c0_71] : memref<12x6x32x32xf32, #tpu.memory_space<vmem>>, vector<1x1x32x32xf32>
    %84 = vector.shape_cast %83 : vector<1x1x32x32xf32> to vector<32x32xf32>
    %cst_72 = arith.constant dense<0.000000e+00> : vector<32x32xf32>
    %85 = tpu.matmul %79, %84, %cst_72 {dimension_numbers = #tpu.dot_dimension_numbers<[1], [0], [0], [1], [0, 0, 1, 1], [], []>} : vector<32x32xf32>, vector<32x32xf32>, vector<32x32xf32> -> vector<32x32xf32>
    %c0_73 = arith.constant 0 : index
    %c3_74 = arith.constant 3 : index
    %c0_75 = arith.constant 0 : index
    %86 = vector.load %arg7[%c0_73, %c3_74, %c0_75] : memref<2x26x32xf32, #tpu.memory_space<vmem>>, vector<2x16x32xf32>
    %87 = vector.shape_cast %86 : vector<2x16x32xf32> to vector<32x32xf32>
    %c1_76 = arith.constant 1 : index
    %c0_77 = arith.constant 0 : index
    %c0_78 = arith.constant 0 : index
    %c0_79 = arith.constant 0 : index
    %88 = vector.load %arg3[%c1_76, %c0_77, %c0_78, %c0_79] : memref<12x6x32x32xf32, #tpu.memory_space<vmem>>, vector<1x1x32x32xf32>
    %89 = vector.shape_cast %88 : vector<1x1x32x32xf32> to vector<32x32xf32>
    %cst_80 = arith.constant dense<0.000000e+00> : vector<32x32xf32>
    %90 = tpu.matmul %87, %89, %cst_80 {dimension_numbers = #tpu.dot_dimension_numbers<[1], [0], [0], [1], [0, 0, 1, 1], [], []>} : vector<32x32xf32>, vector<32x32xf32>, vector<32x32xf32> -> vector<32x32xf32>
    %91 = arith.addf %82, %90 : vector<32x32xf32>
    %c1_81 = arith.constant 1 : index
    %c3_82 = arith.constant 3 : index
    %c0_83 = arith.constant 0 : index
    %c0_84 = arith.constant 0 : index
    %92 = vector.load %arg3[%c1_81, %c3_82, %c0_83, %c0_84] : memref<12x6x32x32xf32, #tpu.memory_space<vmem>>, vector<1x1x32x32xf32>
    %93 = vector.shape_cast %92 : vector<1x1x32x32xf32> to vector<32x32xf32>
    %cst_85 = arith.constant dense<0.000000e+00> : vector<32x32xf32>
    %94 = tpu.matmul %87, %93, %cst_85 {dimension_numbers = #tpu.dot_dimension_numbers<[1], [0], [0], [1], [0, 0, 1, 1], [], []>} : vector<32x32xf32>, vector<32x32xf32>, vector<32x32xf32> -> vector<32x32xf32>
    %95 = arith.addf %85, %94 : vector<32x32xf32>
    %c0_86 = arith.constant 0 : index
    %c7 = arith.constant 7 : index
    %c0_87 = arith.constant 0 : index
    %96 = vector.load %arg7[%c0_86, %c7, %c0_87] : memref<2x26x32xf32, #tpu.memory_space<vmem>>, vector<2x16x32xf32>
    %97 = vector.shape_cast %96 : vector<2x16x32xf32> to vector<32x32xf32>
    %c1_88 = arith.constant 1 : index
    %c2_89 = arith.constant 2 : index
    %c0_90 = arith.constant 0 : index
    %c0_91 = arith.constant 0 : index
    %98 = vector.load %arg3[%c1_88, %c2_89, %c0_90, %c0_91] : memref<12x6x32x32xf32, #tpu.memory_space<vmem>>, vector<1x1x32x32xf32>
    %99 = vector.shape_cast %98 : vector<1x1x32x32xf32> to vector<32x32xf32>
    %cst_92 = arith.constant dense<0.000000e+00> : vector<32x32xf32>
    %100 = tpu.matmul %97, %99, %cst_92 {dimension_numbers = #tpu.dot_dimension_numbers<[1], [0], [0], [1], [0, 0, 1, 1], [], []>} : vector<32x32xf32>, vector<32x32xf32>, vector<32x32xf32> -> vector<32x32xf32>
    %101 = arith.addf %91, %100 : vector<32x32xf32>
    %c1_93 = arith.constant 1 : index
    %c5_94 = arith.constant 5 : index
    %c0_95 = arith.constant 0 : index
    %c0_96 = arith.constant 0 : index
    %102 = vector.load %arg3[%c1_93, %c5_94, %c0_95, %c0_96] : memref<12x6x32x32xf32, #tpu.memory_space<vmem>>, vector<1x1x32x32xf32>
    %103 = vector.shape_cast %102 : vector<1x1x32x32xf32> to vector<32x32xf32>
    %cst_97 = arith.constant dense<0.000000e+00> : vector<32x32xf32>
    %104 = tpu.matmul %97, %103, %cst_97 {dimension_numbers = #tpu.dot_dimension_numbers<[1], [0], [0], [1], [0, 0, 1, 1], [], []>} : vector<32x32xf32>, vector<32x32xf32>, vector<32x32xf32> -> vector<32x32xf32>
    %105 = arith.addf %95, %104 : vector<32x32xf32>
    %c1_98 = arith.constant 1 : index
    %c0_99 = arith.constant 0 : index
    %c0_100 = arith.constant 0 : index
    %106 = vector.load %arg4[%c1_98, %c0_99, %c0_100] : memref<12x1x32xf32, #tpu.memory_space<vmem>>, vector<1x1x32xf32>
    %107 = vector.shape_cast %106 : vector<1x1x32xf32> to vector<1x32xf32>
    %108 = vector.broadcast %107 : vector<1x32xf32> to vector<32x32xf32>
    %109 = arith.addf %101, %108 : vector<32x32xf32>
    %c1_101 = arith.constant 1 : index
    %c0_102 = arith.constant 0 : index
    %c0_103 = arith.constant 0 : index
    %110 = vector.load %arg5[%c1_101, %c0_102, %c0_103] : memref<12x1x32xf32, #tpu.memory_space<vmem>>, vector<1x1x32xf32>
    %111 = vector.shape_cast %110 : vector<1x1x32xf32> to vector<1x32xf32>
    %112 = vector.broadcast %111 : vector<1x32xf32> to vector<32x32xf32>
    %113 = arith.addf %105, %112 : vector<32x32xf32>
    %114 = arith.negf %109 : vector<32x32xf32>
    %115 = math.exp %114 : vector<32x32xf32>
    %cst_104 = arith.constant 1.000000e+00 : f32
    %116 = vector.broadcast %cst_104 : f32 to vector<32x32xf32>
    %117 = arith.addf %116, %115 : vector<32x32xf32>
    %118 = arith.divf %116, %117 : vector<32x32xf32>
    %c0_105 = arith.constant 0 : index
    %c5_106 = arith.constant 5 : index
    %c0_107 = arith.constant 0 : index
    %119 = vector.load %arg7[%c0_105, %c5_106, %c0_107] : memref<2x26x32xf32, #tpu.memory_space<vmem>>, vector<2x16x32xf32>
    %120 = vector.shape_cast %119 : vector<2x16x32xf32> to vector<32x32xf32>
    %121 = arith.mulf %118, %120 : vector<32x32xf32>
    %cst_108 = arith.constant 1.000000e+00 : f32
    %122 = vector.broadcast %cst_108 : f32 to vector<32x32xf32>
    %123 = arith.subf %122, %118 : vector<32x32xf32>
    %124 = arith.mulf %123, %113 : vector<32x32xf32>
    %125 = arith.addf %121, %124 : vector<32x32xf32>
    %126 = vector.shape_cast %125 : vector<32x32xf32> to vector<2x16x32xf32>
    %127 = vector.broadcast %25 : vector<2x16x1xf32> to vector<2x16x32xf32>
    %128 = arith.mulf %126, %127 : vector<2x16x32xf32>
    %c0_109 = arith.constant 0 : index
    %c5_110 = arith.constant 5 : index
    %c0_111 = arith.constant 0 : index
    %129 = vector.load %arg7[%c0_109, %c5_110, %c0_111] : memref<2x26x32xf32, #tpu.memory_space<vmem>>, vector<2x16x32xf32>
    tpu.vector_store %arg7[%c0_109, %c5_110, %c0_111], %128 {strides = array<i32>} : memref<2x26x32xf32, #tpu.memory_space<vmem>>, vector<2x16x32xf32>,
    %c0_112 = arith.constant 0 : index
    %c5_113 = arith.constant 5 : index
    %c0_114 = arith.constant 0 : index
    %130 = vector.load %arg7[%c0_112, %c5_113, %c0_114] : memref<2x26x32xf32, #tpu.memory_space<vmem>>, vector<2x16x32xf32>
    %131 = vector.shape_cast %130 : vector<2x16x32xf32> to vector<32x32xf32>
    %c2_115 = arith.constant 2 : index
    %c1_116 = arith.constant 1 : index
    %c0_117 = arith.constant 0 : index
    %c0_118 = arith.constant 0 : index
    %132 = vector.load %arg3[%c2_115, %c1_116, %c0_117, %c0_118] : memref<12x6x32x32xf32, #tpu.memory_space<vmem>>, vector<1x1x32x32xf32>
    %133 = vector.shape_cast %132 : vector<1x1x32x32xf32> to vector<32x32xf32>
    %cst_119 = arith.constant dense<0.000000e+00> : vector<32x32xf32>
    %134 = tpu.matmul %131, %133, %cst_119 {dimension_numbers = #tpu.dot_dimension_numbers<[1], [0], [0], [1], [0, 0, 1, 1], [], []>} : vector<32x32xf32>, vector<32x32xf32>, vector<32x32xf32> -> vector<32x32xf32>
    %c2_120 = arith.constant 2 : index
    %c4_121 = arith.constant 4 : index
    %c0_122 = arith.constant 0 : index
    %c0_123 = arith.constant 0 : index
    %135 = vector.load %arg3[%c2_120, %c4_121, %c0_122, %c0_123] : memref<12x6x32x32xf32, #tpu.memory_space<vmem>>, vector<1x1x32x32xf32>
    %136 = vector.shape_cast %135 : vector<1x1x32x32xf32> to vector<32x32xf32>
    %cst_124 = arith.constant dense<0.000000e+00> : vector<32x32xf32>
    %137 = tpu.matmul %131, %136, %cst_124 {dimension_numbers = #tpu.dot_dimension_numbers<[1], [0], [0], [1], [0, 0, 1, 1], [], []>} : vector<32x32xf32>, vector<32x32xf32>, vector<32x32xf32> -> vector<32x32xf32>
    %c0_125 = arith.constant 0 : index
    %c0_126 = arith.constant 0 : index
    %c0_127 = arith.constant 0 : index
    %138 = vector.load %arg7[%c0_125, %c0_126, %c0_127] : memref<2x26x32xf32, #tpu.memory_space<vmem>>, vector<2x16x32xf32>
    %139 = vector.shape_cast %138 : vector<2x16x32xf32> to vector<32x32xf32>
    %c2_128 = arith.constant 2 : index
    %c0_129 = arith.constant 0 : index
    %c0_130 = arith.constant 0 : index
    %c0_131 = arith.constant 0 : index
    %140 = vector.load %arg3[%c2_128, %c0_129, %c0_130, %c0_131] : memref<12x6x32x32xf32, #tpu.memory_space<vmem>>, vector<1x1x32x32xf32>
    %141 = vector.shape_cast %140 : vector<1x1x32x32xf32> to vector<32x32xf32>
    %cst_132 = arith.constant dense<0.000000e+00> : vector<32x32xf32>
    %142 = tpu.matmul %139, %141, %cst_132 {dimension_numbers = #tpu.dot_dimension_numbers<[1], [0], [0], [1], [0, 0, 1, 1], [], []>} : vector<32x32xf32>, vector<32x32xf32>, vector<32x32xf32> -> vector<32x32xf32>
    %143 = arith.addf %134, %142 : vector<32x32xf32>
    %c2_133 = arith.constant 2 : index
    %c3_134 = arith.constant 3 : index
    %c0_135 = arith.constant 0 : index
    %c0_136 = arith.constant 0 : index
    %144 = vector.load %arg3[%c2_133, %c3_134, %c0_135, %c0_136] : memref<12x6x32x32xf32, #tpu.memory_space<vmem>>, vector<1x1x32x32xf32>
    %145 = vector.shape_cast %144 : vector<1x1x32x32xf32> to vector<32x32xf32>
    %cst_137 = arith.constant dense<0.000000e+00> : vector<32x32xf32>
    %146 = tpu.matmul %139, %145, %cst_137 {dimension_numbers = #tpu.dot_dimension_numbers<[1], [0], [0], [1], [0, 0, 1, 1], [], []>} : vector<32x32xf32>, vector<32x32xf32>, vector<32x32xf32> -> vector<32x32xf32>
    %147 = arith.addf %137, %146 : vector<32x32xf32>
    %c0_138 = arith.constant 0 : index
    %c10 = arith.constant 10 : index
    %c0_139 = arith.constant 0 : index
    %148 = vector.load %arg7[%c0_138, %c10, %c0_139] : memref<2x26x32xf32, #tpu.memory_space<vmem>>, vector<2x16x32xf32>
    %149 = vector.shape_cast %148 : vector<2x16x32xf32> to vector<32x32xf32>
    %c2_140 = arith.constant 2 : index
    %c2_141 = arith.constant 2 : index
    %c0_142 = arith.constant 0 : index
    %c0_143 = arith.constant 0 : index
    %150 = vector.load %arg3[%c2_140, %c2_141, %c0_142, %c0_143] : memref<12x6x32x32xf32, #tpu.memory_space<vmem>>, vector<1x1x32x32xf32>
    %151 = vector.shape_cast %150 : vector<1x1x32x32xf32> to vector<32x32xf32>
    %cst_144 = arith.constant dense<0.000000e+00> : vector<32x32xf32>
    %152 = tpu.matmul %149, %151, %cst_144 {dimension_numbers = #tpu.dot_dimension_numbers<[1], [0], [0], [1], [0, 0, 1, 1], [], []>} : vector<32x32xf32>, vector<32x32xf32>, vector<32x32xf32> -> vector<32x32xf32>
    %153 = arith.addf %143, %152 : vector<32x32xf32>
    %c2_145 = arith.constant 2 : index
    %c5_146 = arith.constant 5 : index
    %c0_147 = arith.constant 0 : index
    %c0_148 = arith.constant 0 : index
    %154 = vector.load %arg3[%c2_145, %c5_146, %c0_147, %c0_148] : memref<12x6x32x32xf32, #tpu.memory_space<vmem>>, vector<1x1x32x32xf32>
    %155 = vector.shape_cast %154 : vector<1x1x32x32xf32> to vector<32x32xf32>
    %cst_149 = arith.constant dense<0.000000e+00> : vector<32x32xf32>
    %156 = tpu.matmul %149, %155, %cst_149 {dimension_numbers = #tpu.dot_dimension_numbers<[1], [0], [0], [1], [0, 0, 1, 1], [], []>} : vector<32x32xf32>, vector<32x32xf32>, vector<32x32xf32> -> vector<32x32xf32>
    %157 = arith.addf %147, %156 : vector<32x32xf32>
    %c2_150 = arith.constant 2 : index
    %c0_151 = arith.constant 0 : index
    %c0_152 = arith.constant 0 : index
    %158 = vector.load %arg4[%c2_150, %c0_151, %c0_152] : memref<12x1x32xf32, #tpu.memory_space<vmem>>, vector<1x1x32xf32>
    %159 = vector.shape_cast %158 : vector<1x1x32xf32> to vector<1x32xf32>
    %160 = vector.broadcast %159 : vector<1x32xf32> to vector<32x32xf32>
    %161 = arith.addf %153, %160 : vector<32x32xf32>
    %c2_153 = arith.constant 2 : index
    %c0_154 = arith.constant 0 : index
    %c0_155 = arith.constant 0 : index
    %162 = vector.load %arg5[%c2_153, %c0_154, %c0_155] : memref<12x1x32xf32, #tpu.memory_space<vmem>>, vector<1x1x32xf32>
    %163 = vector.shape_cast %162 : vector<1x1x32xf32> to vector<1x32xf32>
    %164 = vector.broadcast %163 : vector<1x32xf32> to vector<32x32xf32>
    %165 = arith.addf %157, %164 : vector<32x32xf32>
    %166 = arith.negf %161 : vector<32x32xf32>
    %167 = math.exp %166 : vector<32x32xf32>
    %cst_156 = arith.constant 1.000000e+00 : f32
    %168 = vector.broadcast %cst_156 : f32 to vector<32x32xf32>
    %169 = arith.addf %168, %167 : vector<32x32xf32>
    %170 = arith.divf %168, %169 : vector<32x32xf32>
    %c0_157 = arith.constant 0 : index
    %c5_158 = arith.constant 5 : index
    %c0_159 = arith.constant 0 : index
    %171 = vector.load %arg7[%c0_157, %c5_158, %c0_159] : memref<2x26x32xf32, #tpu.memory_space<vmem>>, vector<2x16x32xf32>
    %172 = vector.shape_cast %171 : vector<2x16x32xf32> to vector<32x32xf32>
    %173 = arith.mulf %170, %172 : vector<32x32xf32>
    %cst_160 = arith.constant 1.000000e+00 : f32
    %174 = vector.broadcast %cst_160 : f32 to vector<32x32xf32>
    %175 = arith.subf %174, %170 : vector<32x32xf32>
    %176 = arith.mulf %175, %165 : vector<32x32xf32>
    %177 = arith.addf %173, %176 : vector<32x32xf32>
    %178 = vector.shape_cast %177 : vector<32x32xf32> to vector<2x16x32xf32>
    %179 = vector.broadcast %25 : vector<2x16x1xf32> to vector<2x16x32xf32>
    %180 = arith.mulf %178, %179 : vector<2x16x32xf32>
    %c0_161 = arith.constant 0 : index
    %c5_162 = arith.constant 5 : index
    %c0_163 = arith.constant 0 : index
    %181 = vector.load %arg7[%c0_161, %c5_162, %c0_163] : memref<2x26x32xf32, #tpu.memory_space<vmem>>, vector<2x16x32xf32>
    tpu.vector_store %arg7[%c0_161, %c5_162, %c0_163], %180 {strides = array<i32>} : memref<2x26x32xf32, #tpu.memory_space<vmem>>, vector<2x16x32xf32>,
    %c0_164 = arith.constant 0 : index
    %c5_165 = arith.constant 5 : index
    %c0_166 = arith.constant 0 : index
    %182 = vector.load %arg7[%c0_164, %c5_165, %c0_166] : memref<2x26x32xf32, #tpu.memory_space<vmem>>, vector<2x16x32xf32>
    %183 = vector.shape_cast %182 : vector<2x16x32xf32> to vector<32x32xf32>
    %c3_167 = arith.constant 3 : index
    %c1_168 = arith.constant 1 : index
    %c0_169 = arith.constant 0 : index
    %c0_170 = arith.constant 0 : index
    %184 = vector.load %arg3[%c3_167, %c1_168, %c0_169, %c0_170] : memref<12x6x32x32xf32, #tpu.memory_space<vmem>>, vector<1x1x32x32xf32>
    %185 = vector.shape_cast %184 : vector<1x1x32x32xf32> to vector<32x32xf32>
    %cst_171 = arith.constant dense<0.000000e+00> : vector<32x32xf32>
    %186 = tpu.matmul %183, %185, %cst_171 {dimension_numbers = #tpu.dot_dimension_numbers<[1], [0], [0], [1], [0, 0, 1, 1], [], []>} : vector<32x32xf32>, vector<32x32xf32>, vector<32x32xf32> -> vector<32x32xf32>
    %c3_172 = arith.constant 3 : index
    %c4_173 = arith.constant 4 : index
    %c0_174 = arith.constant 0 : index
    %c0_175 = arith.constant 0 : index
    %187 = vector.load %arg3[%c3_172, %c4_173, %c0_174, %c0_175] : memref<12x6x32x32xf32, #tpu.memory_space<vmem>>, vector<1x1x32x32xf32>
    %188 = vector.shape_cast %187 : vector<1x1x32x32xf32> to vector<32x32xf32>
    %cst_176 = arith.constant dense<0.000000e+00> : vector<32x32xf32>
    %189 = tpu.matmul %183, %188, %cst_176 {dimension_numbers = #tpu.dot_dimension_numbers<[1], [0], [0], [1], [0, 0, 1, 1], [], []>} : vector<32x32xf32>, vector<32x32xf32>, vector<32x32xf32> -> vector<32x32xf32>
    %c0_177 = arith.constant 0 : index
    %c4_178 = arith.constant 4 : index
    %c0_179 = arith.constant 0 : index
    %190 = vector.load %arg7[%c0_177, %c4_178, %c0_179] : memref<2x26x32xf32, #tpu.memory_space<vmem>>, vector<2x16x32xf32>
    %191 = vector.shape_cast %190 : vector<2x16x32xf32> to vector<32x32xf32>
    %c3_180 = arith.constant 3 : index
    %c0_181 = arith.constant 0 : index
    %c0_182 = arith.constant 0 : index
    %c0_183 = arith.constant 0 : index
    %192 = vector.load %arg3[%c3_180, %c0_181, %c0_182, %c0_183] : memref<12x6x32x32xf32, #tpu.memory_space<vmem>>, vector<1x1x32x32xf32>
    %193 = vector.shape_cast %192 : vector<1x1x32x32xf32> to vector<32x32xf32>
    %cst_184 = arith.constant dense<0.000000e+00> : vector<32x32xf32>
    %194 = tpu.matmul %191, %193, %cst_184 {dimension_numbers = #tpu.dot_dimension_numbers<[1], [0], [0], [1], [0, 0, 1, 1], [], []>} : vector<32x32xf32>, vector<32x32xf32>, vector<32x32xf32> -> vector<32x32xf32>
    %195 = arith.addf %186, %194 : vector<32x32xf32>
    %c3_185 = arith.constant 3 : index
    %c3_186 = arith.constant 3 : index
    %c0_187 = arith.constant 0 : index
    %c0_188 = arith.constant 0 : index
    %196 = vector.load %arg3[%c3_185, %c3_186, %c0_187, %c0_188] : memref<12x6x32x32xf32, #tpu.memory_space<vmem>>, vector<1x1x32x32xf32>
    %197 = vector.shape_cast %196 : vector<1x1x32x32xf32> to vector<32x32xf32>
    %cst_189 = arith.constant dense<0.000000e+00> : vector<32x32xf32>
    %198 = tpu.matmul %191, %197, %cst_189 {dimension_numbers = #tpu.dot_dimension_numbers<[1], [0], [0], [1], [0, 0, 1, 1], [], []>} : vector<32x32xf32>, vector<32x32xf32>, vector<32x32xf32> -> vector<32x32xf32>
    %199 = arith.addf %189, %198 : vector<32x32xf32>
    %c0_190 = arith.constant 0 : index
    %c6_191 = arith.constant 6 : index
    %c0_192 = arith.constant 0 : index
    %200 = vector.load %arg7[%c0_190, %c6_191, %c0_192] : memref<2x26x32xf32, #tpu.memory_space<vmem>>, vector<2x16x32xf32>
    %201 = vector.shape_cast %200 : vector<2x16x32xf32> to vector<32x32xf32>
    %c3_193 = arith.constant 3 : index
    %c2_194 = arith.constant 2 : index
    %c0_195 = arith.constant 0 : index
    %c0_196 = arith.constant 0 : index
    %202 = vector.load %arg3[%c3_193, %c2_194, %c0_195, %c0_196] : memref<12x6x32x32xf32, #tpu.memory_space<vmem>>, vector<1x1x32x32xf32>
    %203 = vector.shape_cast %202 : vector<1x1x32x32xf32> to vector<32x32xf32>
    %cst_197 = arith.constant dense<0.000000e+00> : vector<32x32xf32>
    %204 = tpu.matmul %201, %203, %cst_197 {dimension_numbers = #tpu.dot_dimension_numbers<[1], [0], [0], [1], [0, 0, 1, 1], [], []>} : vector<32x32xf32>, vector<32x32xf32>, vector<32x32xf32> -> vector<32x32xf32>
    %205 = arith.addf %195, %204 : vector<32x32xf32>
    %c3_198 = arith.constant 3 : index
    %c5_199 = arith.constant 5 : index
    %c0_200 = arith.constant 0 : index
    %c0_201 = arith.constant 0 : index
    %206 = vector.load %arg3[%c3_198, %c5_199, %c0_200, %c0_201] : memref<12x6x32x32xf32, #tpu.memory_space<vmem>>, vector<1x1x32x32xf32>
    %207 = vector.shape_cast %206 : vector<1x1x32x32xf32> to vector<32x32xf32>
    %cst_202 = arith.constant dense<0.000000e+00> : vector<32x32xf32>
    %208 = tpu.matmul %201, %207, %cst_202 {dimension_numbers = #tpu.dot_dimension_numbers<[1], [0], [0], [1], [0, 0, 1, 1], [], []>} : vector<32x32xf32>, vector<32x32xf32>, vector<32x32xf32> -> vector<32x32xf32>
    %209 = arith.addf %199, %208 : vector<32x32xf32>
    %c3_203 = arith.constant 3 : index
    %c0_204 = arith.constant 0 : index
    %c0_205 = arith.constant 0 : index
    %210 = vector.load %arg4[%c3_203, %c0_204, %c0_205] : memref<12x1x32xf32, #tpu.memory_space<vmem>>, vector<1x1x32xf32>
    %211 = vector.shape_cast %210 : vector<1x1x32xf32> to vector<1x32xf32>
    %212 = vector.broadcast %211 : vector<1x32xf32> to vector<32x32xf32>
    %213 = arith.addf %205, %212 : vector<32x32xf32>
    %c3_206 = arith.constant 3 : index
    %c0_207 = arith.constant 0 : index
    %c0_208 = arith.constant 0 : index
    %214 = vector.load %arg5[%c3_206, %c0_207, %c0_208] : memref<12x1x32xf32, #tpu.memory_space<vmem>>, vector<1x1x32xf32>
    %215 = vector.shape_cast %214 : vector<1x1x32xf32> to vector<1x32xf32>
    %216 = vector.broadcast %215 : vector<1x32xf32> to vector<32x32xf32>
    %217 = arith.addf %209, %216 : vector<32x32xf32>
    %218 = arith.negf %213 : vector<32x32xf32>
    %219 = math.exp %218 : vector<32x32xf32>
    %cst_209 = arith.constant 1.000000e+00 : f32
    %220 = vector.broadcast %cst_209 : f32 to vector<32x32xf32>
    %221 = arith.addf %220, %219 : vector<32x32xf32>
    %222 = arith.divf %220, %221 : vector<32x32xf32>
    %c0_210 = arith.constant 0 : index
    %c5_211 = arith.constant 5 : index
    %c0_212 = arith.constant 0 : index
    %223 = vector.load %arg7[%c0_210, %c5_211, %c0_212] : memref<2x26x32xf32, #tpu.memory_space<vmem>>, vector<2x16x32xf32>
    %224 = vector.shape_cast %223 : vector<2x16x32xf32> to vector<32x32xf32>
    %225 = arith.mulf %222, %224 : vector<32x32xf32>
    %cst_213 = arith.constant 1.000000e+00 : f32
    %226 = vector.broadcast %cst_213 : f32 to vector<32x32xf32>
    %227 = arith.subf %226, %222 : vector<32x32xf32>
    %228 = arith.mulf %227, %217 : vector<32x32xf32>
    %229 = arith.addf %225, %228 : vector<32x32xf32>
    %230 = vector.shape_cast %229 : vector<32x32xf32> to vector<2x16x32xf32>
    %231 = vector.broadcast %25 : vector<2x16x1xf32> to vector<2x16x32xf32>
    %232 = arith.mulf %230, %231 : vector<2x16x32xf32>
    %c0_214 = arith.constant 0 : index
    %c5_215 = arith.constant 5 : index
    %c0_216 = arith.constant 0 : index
    %233 = vector.load %arg7[%c0_214, %c5_215, %c0_216] : memref<2x26x32xf32, #tpu.memory_space<vmem>>, vector<2x16x32xf32>
    tpu.vector_store %arg7[%c0_214, %c5_215, %c0_216], %232 {strides = array<i32>} : memref<2x26x32xf32, #tpu.memory_space<vmem>>, vector<2x16x32xf32>,
    %c0_217 = arith.constant 0 : index
    %c5_218 = arith.constant 5 : index
    %c0_219 = arith.constant 0 : index
    %234 = vector.load %arg7[%c0_217, %c5_218, %c0_219] : memref<2x26x32xf32, #tpu.memory_space<vmem>>, vector<2x16x32xf32>
    %235 = vector.shape_cast %234 : vector<2x16x32xf32> to vector<32x32xf32>
    %c4_220 = arith.constant 4 : index
    %c1_221 = arith.constant 1 : index
    %c0_222 = arith.constant 0 : index
    %c0_223 = arith.constant 0 : index
    %236 = vector.load %arg3[%c4_220, %c1_221, %c0_222, %c0_223] : memref<12x6x32x32xf32, #tpu.memory_space<vmem>>, vector<1x1x32x32xf32>
    %237 = vector.shape_cast %236 : vector<1x1x32x32xf32> to vector<32x32xf32>
    %cst_224 = arith.constant dense<0.000000e+00> : vector<32x32xf32>
    %238 = tpu.matmul %235, %237, %cst_224 {dimension_numbers = #tpu.dot_dimension_numbers<[1], [0], [0], [1], [0, 0, 1, 1], [], []>} : vector<32x32xf32>, vector<32x32xf32>, vector<32x32xf32> -> vector<32x32xf32>
    %c4_225 = arith.constant 4 : index
    %c4_226 = arith.constant 4 : index
    %c0_227 = arith.constant 0 : index
    %c0_228 = arith.constant 0 : index
    %239 = vector.load %arg3[%c4_225, %c4_226, %c0_227, %c0_228] : memref<12x6x32x32xf32, #tpu.memory_space<vmem>>, vector<1x1x32x32xf32>
    %240 = vector.shape_cast %239 : vector<1x1x32x32xf32> to vector<32x32xf32>
    %cst_229 = arith.constant dense<0.000000e+00> : vector<32x32xf32>
    %241 = tpu.matmul %235, %240, %cst_229 {dimension_numbers = #tpu.dot_dimension_numbers<[1], [0], [0], [1], [0, 0, 1, 1], [], []>} : vector<32x32xf32>, vector<32x32xf32>, vector<32x32xf32> -> vector<32x32xf32>
    %c0_230 = arith.constant 0 : index
    %c3_231 = arith.constant 3 : index
    %c0_232 = arith.constant 0 : index
    %242 = vector.load %arg7[%c0_230, %c3_231, %c0_232] : memref<2x26x32xf32, #tpu.memory_space<vmem>>, vector<2x16x32xf32>
    %243 = vector.shape_cast %242 : vector<2x16x32xf32> to vector<32x32xf32>
    %c4_233 = arith.constant 4 : index
    %c0_234 = arith.constant 0 : index
    %c0_235 = arith.constant 0 : index
    %c0_236 = arith.constant 0 : index
    %244 = vector.load %arg3[%c4_233, %c0_234, %c0_235, %c0_236] : memref<12x6x32x32xf32, #tpu.memory_space<vmem>>, vector<1x1x32x32xf32>
    %245 = vector.shape_cast %244 : vector<1x1x32x32xf32> to vector<32x32xf32>
    %cst_237 = arith.constant dense<0.000000e+00> : vector<32x32xf32>
    %246 = tpu.matmul %243, %245, %cst_237 {dimension_numbers = #tpu.dot_dimension_numbers<[1], [0], [0], [1], [0, 0, 1, 1], [], []>} : vector<32x32xf32>, vector<32x32xf32>, vector<32x32xf32> -> vector<32x32xf32>
    %247 = arith.addf %238, %246 : vector<32x32xf32>
    %c4_238 = arith.constant 4 : index
    %c3_239 = arith.constant 3 : index
    %c0_240 = arith.constant 0 : index
    %c0_241 = arith.constant 0 : index
    %248 = vector.load %arg3[%c4_238, %c3_239, %c0_240, %c0_241] : memref<12x6x32x32xf32, #tpu.memory_space<vmem>>, vector<1x1x32x32xf32>
    %249 = vector.shape_cast %248 : vector<1x1x32x32xf32> to vector<32x32xf32>
    %cst_242 = arith.constant dense<0.000000e+00> : vector<32x32xf32>
    %250 = tpu.matmul %243, %249, %cst_242 {dimension_numbers = #tpu.dot_dimension_numbers<[1], [0], [0], [1], [0, 0, 1, 1], [], []>} : vector<32x32xf32>, vector<32x32xf32>, vector<32x32xf32> -> vector<32x32xf32>
    %251 = arith.addf %241, %250 : vector<32x32xf32>
    %c0_243 = arith.constant 0 : index
    %c7_244 = arith.constant 7 : index
    %c0_245 = arith.constant 0 : index
    %252 = vector.load %arg7[%c0_243, %c7_244, %c0_245] : memref<2x26x32xf32, #tpu.memory_space<vmem>>, vector<2x16x32xf32>
    %253 = vector.shape_cast %252 : vector<2x16x32xf32> to vector<32x32xf32>
    %c4_246 = arith.constant 4 : index
    %c2_247 = arith.constant 2 : index
    %c0_248 = arith.constant 0 : index
    %c0_249 = arith.constant 0 : index
    %254 = vector.load %arg3[%c4_246, %c2_247, %c0_248, %c0_249] : memref<12x6x32x32xf32, #tpu.memory_space<vmem>>, vector<1x1x32x32xf32>
    %255 = vector.shape_cast %254 : vector<1x1x32x32xf32> to vector<32x32xf32>
    %cst_250 = arith.constant dense<0.000000e+00> : vector<32x32xf32>
    %256 = tpu.matmul %253, %255, %cst_250 {dimension_numbers = #tpu.dot_dimension_numbers<[1], [0], [0], [1], [0, 0, 1, 1], [], []>} : vector<32x32xf32>, vector<32x32xf32>, vector<32x32xf32> -> vector<32x32xf32>
    %257 = arith.addf %247, %256 : vector<32x32xf32>
    %c4_251 = arith.constant 4 : index
    %c5_252 = arith.constant 5 : index
    %c0_253 = arith.constant 0 : index
    %c0_254 = arith.constant 0 : index
    %258 = vector.load %arg3[%c4_251, %c5_252, %c0_253, %c0_254] : memref<12x6x32x32xf32, #tpu.memory_space<vmem>>, vector<1x1x32x32xf32>
    %259 = vector.shape_cast %258 : vector<1x1x32x32xf32> to vector<32x32xf32>
    %cst_255 = arith.constant dense<0.000000e+00> : vector<32x32xf32>
    %260 = tpu.matmul %253, %259, %cst_255 {dimension_numbers = #tpu.dot_dimension_numbers<[1], [0], [0], [1], [0, 0, 1, 1], [], []>} : vector<32x32xf32>, vector<32x32xf32>, vector<32x32xf32> -> vector<32x32xf32>
    %261 = arith.addf %251, %260 : vector<32x32xf32>
    %c4_256 = arith.constant 4 : index
    %c0_257 = arith.constant 0 : index
    %c0_258 = arith.constant 0 : index
    %262 = vector.load %arg4[%c4_256, %c0_257, %c0_258] : memref<12x1x32xf32, #tpu.memory_space<vmem>>, vector<1x1x32xf32>
    %263 = vector.shape_cast %262 : vector<1x1x32xf32> to vector<1x32xf32>
    %264 = vector.broadcast %263 : vector<1x32xf32> to vector<32x32xf32>
    %265 = arith.addf %257, %264 : vector<32x32xf32>
    %c4_259 = arith.constant 4 : index
    %c0_260 = arith.constant 0 : index
    %c0_261 = arith.constant 0 : index
    %266 = vector.load %arg5[%c4_259, %c0_260, %c0_261] : memref<12x1x32xf32, #tpu.memory_space<vmem>>, vector<1x1x32xf32>
    %267 = vector.shape_cast %266 : vector<1x1x32xf32> to vector<1x32xf32>
    %268 = vector.broadcast %267 : vector<1x32xf32> to vector<32x32xf32>
    %269 = arith.addf %261, %268 : vector<32x32xf32>
    %270 = arith.negf %265 : vector<32x32xf32>
    %271 = math.exp %270 : vector<32x32xf32>
    %cst_262 = arith.constant 1.000000e+00 : f32
    %272 = vector.broadcast %cst_262 : f32 to vector<32x32xf32>
    %273 = arith.addf %272, %271 : vector<32x32xf32>
    %274 = arith.divf %272, %273 : vector<32x32xf32>
    %c0_263 = arith.constant 0 : index
    %c5_264 = arith.constant 5 : index
    %c0_265 = arith.constant 0 : index
    %275 = vector.load %arg7[%c0_263, %c5_264, %c0_265] : memref<2x26x32xf32, #tpu.memory_space<vmem>>, vector<2x16x32xf32>
    %276 = vector.shape_cast %275 : vector<2x16x32xf32> to vector<32x32xf32>
    %277 = arith.mulf %274, %276 : vector<32x32xf32>
    %cst_266 = arith.constant 1.000000e+00 : f32
    %278 = vector.broadcast %cst_266 : f32 to vector<32x32xf32>
    %279 = arith.subf %278, %274 : vector<32x32xf32>
    %280 = arith.mulf %279, %269 : vector<32x32xf32>
    %281 = arith.addf %277, %280 : vector<32x32xf32>
    %282 = vector.shape_cast %281 : vector<32x32xf32> to vector<2x16x32xf32>
    %283 = vector.broadcast %25 : vector<2x16x1xf32> to vector<2x16x32xf32>
    %284 = arith.mulf %282, %283 : vector<2x16x32xf32>
    %c0_267 = arith.constant 0 : index
    %c5_268 = arith.constant 5 : index
    %c0_269 = arith.constant 0 : index
    %285 = vector.load %arg7[%c0_267, %c5_268, %c0_269] : memref<2x26x32xf32, #tpu.memory_space<vmem>>, vector<2x16x32xf32>
    tpu.vector_store %arg7[%c0_267, %c5_268, %c0_269], %284 {strides = array<i32>} : memref<2x26x32xf32, #tpu.memory_space<vmem>>, vector<2x16x32xf32>,
    %c0_270 = arith.constant 0 : index
    %c5_271 = arith.constant 5 : index
    %c0_272 = arith.constant 0 : index
    %286 = vector.load %arg7[%c0_270, %c5_271, %c0_272] : memref<2x26x32xf32, #tpu.memory_space<vmem>>, vector<2x16x32xf32>
    %287 = vector.shape_cast %286 : vector<2x16x32xf32> to vector<32x32xf32>
    %c5_273 = arith.constant 5 : index
    %c1_274 = arith.constant 1 : index
    %c0_275 = arith.constant 0 : index
    %c0_276 = arith.constant 0 : index
    %288 = vector.load %arg3[%c5_273, %c1_274, %c0_275, %c0_276] : memref<12x6x32x32xf32, #tpu.memory_space<vmem>>, vector<1x1x32x32xf32>
    %289 = vector.shape_cast %288 : vector<1x1x32x32xf32> to vector<32x32xf32>
    %cst_277 = arith.constant dense<0.000000e+00> : vector<32x32xf32>
    %290 = tpu.matmul %287, %289, %cst_277 {dimension_numbers = #tpu.dot_dimension_numbers<[1], [0], [0], [1], [0, 0, 1, 1], [], []>} : vector<32x32xf32>, vector<32x32xf32>, vector<32x32xf32> -> vector<32x32xf32>
    %c5_278 = arith.constant 5 : index
    %c4_279 = arith.constant 4 : index
    %c0_280 = arith.constant 0 : index
    %c0_281 = arith.constant 0 : index
    %291 = vector.load %arg3[%c5_278, %c4_279, %c0_280, %c0_281] : memref<12x6x32x32xf32, #tpu.memory_space<vmem>>, vector<1x1x32x32xf32>
    %292 = vector.shape_cast %291 : vector<1x1x32x32xf32> to vector<32x32xf32>
    %cst_282 = arith.constant dense<0.000000e+00> : vector<32x32xf32>
    %293 = tpu.matmul %287, %292, %cst_282 {dimension_numbers = #tpu.dot_dimension_numbers<[1], [0], [0], [1], [0, 0, 1, 1], [], []>} : vector<32x32xf32>, vector<32x32xf32>, vector<32x32xf32> -> vector<32x32xf32>
    %c0_283 = arith.constant 0 : index
    %c0_284 = arith.constant 0 : index
    %c0_285 = arith.constant 0 : index
    %294 = vector.load %arg7[%c0_283, %c0_284, %c0_285] : memref<2x26x32xf32, #tpu.memory_space<vmem>>, vector<2x16x32xf32>
    %295 = vector.shape_cast %294 : vector<2x16x32xf32> to vector<32x32xf32>
    %c5_286 = arith.constant 5 : index
    %c0_287 = arith.constant 0 : index
    %c0_288 = arith.constant 0 : index
    %c0_289 = arith.constant 0 : index
    %296 = vector.load %arg3[%c5_286, %c0_287, %c0_288, %c0_289] : memref<12x6x32x32xf32, #tpu.memory_space<vmem>>, vector<1x1x32x32xf32>
    %297 = vector.shape_cast %296 : vector<1x1x32x32xf32> to vector<32x32xf32>
    %cst_290 = arith.constant dense<0.000000e+00> : vector<32x32xf32>
    %298 = tpu.matmul %295, %297, %cst_290 {dimension_numbers = #tpu.dot_dimension_numbers<[1], [0], [0], [1], [0, 0, 1, 1], [], []>} : vector<32x32xf32>, vector<32x32xf32>, vector<32x32xf32> -> vector<32x32xf32>
    %299 = arith.addf %290, %298 : vector<32x32xf32>
    %c5_291 = arith.constant 5 : index
    %c3_292 = arith.constant 3 : index
    %c0_293 = arith.constant 0 : index
    %c0_294 = arith.constant 0 : index
    %300 = vector.load %arg3[%c5_291, %c3_292, %c0_293, %c0_294] : memref<12x6x32x32xf32, #tpu.memory_space<vmem>>, vector<1x1x32x32xf32>
    %301 = vector.shape_cast %300 : vector<1x1x32x32xf32> to vector<32x32xf32>
    %cst_295 = arith.constant dense<0.000000e+00> : vector<32x32xf32>
    %302 = tpu.matmul %295, %301, %cst_295 {dimension_numbers = #tpu.dot_dimension_numbers<[1], [0], [0], [1], [0, 0, 1, 1], [], []>} : vector<32x32xf32>, vector<32x32xf32>, vector<32x32xf32> -> vector<32x32xf32>
    %303 = arith.addf %293, %302 : vector<32x32xf32>
    %c0_296 = arith.constant 0 : index
    %c10_297 = arith.constant 10 : index
    %c0_298 = arith.constant 0 : index
    %304 = vector.load %arg7[%c0_296, %c10_297, %c0_298] : memref<2x26x32xf32, #tpu.memory_space<vmem>>, vector<2x16x32xf32>
    %305 = vector.shape_cast %304 : vector<2x16x32xf32> to vector<32x32xf32>
    %c5_299 = arith.constant 5 : index
    %c2_300 = arith.constant 2 : index
    %c0_301 = arith.constant 0 : index
    %c0_302 = arith.constant 0 : index
    %306 = vector.load %arg3[%c5_299, %c2_300, %c0_301, %c0_302] : memref<12x6x32x32xf32, #tpu.memory_space<vmem>>, vector<1x1x32x32xf32>
    %307 = vector.shape_cast %306 : vector<1x1x32x32xf32> to vector<32x32xf32>
    %cst_303 = arith.constant dense<0.000000e+00> : vector<32x32xf32>
    %308 = tpu.matmul %305, %307, %cst_303 {dimension_numbers = #tpu.dot_dimension_numbers<[1], [0], [0], [1], [0, 0, 1, 1], [], []>} : vector<32x32xf32>, vector<32x32xf32>, vector<32x32xf32> -> vector<32x32xf32>
    %309 = arith.addf %299, %308 : vector<32x32xf32>
    %c5_304 = arith.constant 5 : index
    %c5_305 = arith.constant 5 : index
    %c0_306 = arith.constant 0 : index
    %c0_307 = arith.constant 0 : index
    %310 = vector.load %arg3[%c5_304, %c5_305, %c0_306, %c0_307] : memref<12x6x32x32xf32, #tpu.memory_space<vmem>>, vector<1x1x32x32xf32>
    %311 = vector.shape_cast %310 : vector<1x1x32x32xf32> to vector<32x32xf32>
    %cst_308 = arith.constant dense<0.000000e+00> : vector<32x32xf32>
    %312 = tpu.matmul %305, %311, %cst_308 {dimension_numbers = #tpu.dot_dimension_numbers<[1], [0], [0], [1], [0, 0, 1, 1], [], []>} : vector<32x32xf32>, vector<32x32xf32>, vector<32x32xf32> -> vector<32x32xf32>
    %313 = arith.addf %303, %312 : vector<32x32xf32>
    %c5_309 = arith.constant 5 : index
    %c0_310 = arith.constant 0 : index
    %c0_311 = arith.constant 0 : index
    %314 = vector.load %arg4[%c5_309, %c0_310, %c0_311] : memref<12x1x32xf32, #tpu.memory_space<vmem>>, vector<1x1x32xf32>
    %315 = vector.shape_cast %314 : vector<1x1x32xf32> to vector<1x32xf32>
    %316 = vector.broadcast %315 : vector<1x32xf32> to vector<32x32xf32>
    %317 = arith.addf %309, %316 : vector<32x32xf32>
    %c5_312 = arith.constant 5 : index
    %c0_313 = arith.constant 0 : index
    %c0_314 = arith.constant 0 : index
    %318 = vector.load %arg5[%c5_312, %c0_313, %c0_314] : memref<12x1x32xf32, #tpu.memory_space<vmem>>, vector<1x1x32xf32>
    %319 = vector.shape_cast %318 : vector<1x1x32xf32> to vector<1x32xf32>
    %320 = vector.broadcast %319 : vector<1x32xf32> to vector<32x32xf32>
    %321 = arith.addf %313, %320 : vector<32x32xf32>
    %322 = arith.negf %317 : vector<32x32xf32>
    %323 = math.exp %322 : vector<32x32xf32>
    %cst_315 = arith.constant 1.000000e+00 : f32
    %324 = vector.broadcast %cst_315 : f32 to vector<32x32xf32>
    %325 = arith.addf %324, %323 : vector<32x32xf32>
    %326 = arith.divf %324, %325 : vector<32x32xf32>
    %c0_316 = arith.constant 0 : index
    %c5_317 = arith.constant 5 : index
    %c0_318 = arith.constant 0 : index
    %327 = vector.load %arg7[%c0_316, %c5_317, %c0_318] : memref<2x26x32xf32, #tpu.memory_space<vmem>>, vector<2x16x32xf32>
    %328 = vector.shape_cast %327 : vector<2x16x32xf32> to vector<32x32xf32>
    %329 = arith.mulf %326, %328 : vector<32x32xf32>
    %cst_319 = arith.constant 1.000000e+00 : f32
    %330 = vector.broadcast %cst_319 : f32 to vector<32x32xf32>
    %331 = arith.subf %330, %326 : vector<32x32xf32>
    %332 = arith.mulf %331, %321 : vector<32x32xf32>
    %333 = arith.addf %329, %332 : vector<32x32xf32>
    %334 = vector.shape_cast %333 : vector<32x32xf32> to vector<2x16x32xf32>
    %335 = vector.broadcast %25 : vector<2x16x1xf32> to vector<2x16x32xf32>
    %336 = arith.mulf %334, %335 : vector<2x16x32xf32>
    %c0_320 = arith.constant 0 : index
    %c5_321 = arith.constant 5 : index
    %c0_322 = arith.constant 0 : index
    %337 = vector.load %arg7[%c0_320, %c5_321, %c0_322] : memref<2x26x32xf32, #tpu.memory_space<vmem>>, vector<2x16x32xf32>
    tpu.vector_store %arg7[%c0_320, %c5_321, %c0_322], %336 {strides = array<i32>} : memref<2x26x32xf32, #tpu.memory_space<vmem>>, vector<2x16x32xf32>,
    %c0_323 = arith.constant 0 : index
    %c5_324 = arith.constant 5 : index
    %c0_325 = arith.constant 0 : index
    %338 = vector.load %arg7[%c0_323, %c5_324, %c0_325] : memref<2x26x32xf32, #tpu.memory_space<vmem>>, vector<2x16x32xf32>
    %339 = vector.shape_cast %338 : vector<2x16x32xf32> to vector<32x32xf32>
    %c6_326 = arith.constant 6 : index
    %c1_327 = arith.constant 1 : index
    %c0_328 = arith.constant 0 : index
    %c0_329 = arith.constant 0 : index
    %340 = vector.load %arg3[%c6_326, %c1_327, %c0_328, %c0_329] : memref<12x6x32x32xf32, #tpu.memory_space<vmem>>, vector<1x1x32x32xf32>
    %341 = vector.shape_cast %340 : vector<1x1x32x32xf32> to vector<32x32xf32>
    %cst_330 = arith.constant dense<0.000000e+00> : vector<32x32xf32>
    %342 = tpu.matmul %339, %341, %cst_330 {dimension_numbers = #tpu.dot_dimension_numbers<[1], [0], [0], [1], [0, 0, 1, 1], [], []>} : vector<32x32xf32>, vector<32x32xf32>, vector<32x32xf32> -> vector<32x32xf32>
    %c6_331 = arith.constant 6 : index
    %c4_332 = arith.constant 4 : index
    %c0_333 = arith.constant 0 : index
    %c0_334 = arith.constant 0 : index
    %343 = vector.load %arg3[%c6_331, %c4_332, %c0_333, %c0_334] : memref<12x6x32x32xf32, #tpu.memory_space<vmem>>, vector<1x1x32x32xf32>
    %344 = vector.shape_cast %343 : vector<1x1x32x32xf32> to vector<32x32xf32>
    %cst_335 = arith.constant dense<0.000000e+00> : vector<32x32xf32>
    %345 = tpu.matmul %339, %344, %cst_335 {dimension_numbers = #tpu.dot_dimension_numbers<[1], [0], [0], [1], [0, 0, 1, 1], [], []>} : vector<32x32xf32>, vector<32x32xf32>, vector<32x32xf32> -> vector<32x32xf32>
    %c0_336 = arith.constant 0 : index
    %c4_337 = arith.constant 4 : index
    %c0_338 = arith.constant 0 : index
    %346 = vector.load %arg7[%c0_336, %c4_337, %c0_338] : memref<2x26x32xf32, #tpu.memory_space<vmem>>, vector<2x16x32xf32>
    %347 = vector.shape_cast %346 : vector<2x16x32xf32> to vector<32x32xf32>
    %c6_339 = arith.constant 6 : index
    %c0_340 = arith.constant 0 : index
    %c0_341 = arith.constant 0 : index
    %c0_342 = arith.constant 0 : index
    %348 = vector.load %arg3[%c6_339, %c0_340, %c0_341, %c0_342] : memref<12x6x32x32xf32, #tpu.memory_space<vmem>>, vector<1x1x32x32xf32>
    %349 = vector.shape_cast %348 : vector<1x1x32x32xf32> to vector<32x32xf32>
    %cst_343 = arith.constant dense<0.000000e+00> : vector<32x32xf32>
    %350 = tpu.matmul %347, %349, %cst_343 {dimension_numbers = #tpu.dot_dimension_numbers<[1], [0], [0], [1], [0, 0, 1, 1], [], []>} : vector<32x32xf32>, vector<32x32xf32>, vector<32x32xf32> -> vector<32x32xf32>
    %351 = arith.addf %342, %350 : vector<32x32xf32>
    %c6_344 = arith.constant 6 : index
    %c3_345 = arith.constant 3 : index
    %c0_346 = arith.constant 0 : index
    %c0_347 = arith.constant 0 : index
    %352 = vector.load %arg3[%c6_344, %c3_345, %c0_346, %c0_347] : memref<12x6x32x32xf32, #tpu.memory_space<vmem>>, vector<1x1x32x32xf32>
    %353 = vector.shape_cast %352 : vector<1x1x32x32xf32> to vector<32x32xf32>
    %cst_348 = arith.constant dense<0.000000e+00> : vector<32x32xf32>
    %354 = tpu.matmul %347, %353, %cst_348 {dimension_numbers = #tpu.dot_dimension_numbers<[1], [0], [0], [1], [0, 0, 1, 1], [], []>} : vector<32x32xf32>, vector<32x32xf32>, vector<32x32xf32> -> vector<32x32xf32>
    %355 = arith.addf %345, %354 : vector<32x32xf32>
    %c0_349 = arith.constant 0 : index
    %c6_350 = arith.constant 6 : index
    %c0_351 = arith.constant 0 : index
    %356 = vector.load %arg7[%c0_349, %c6_350, %c0_351] : memref<2x26x32xf32, #tpu.memory_space<vmem>>, vector<2x16x32xf32>
    %357 = vector.shape_cast %356 : vector<2x16x32xf32> to vector<32x32xf32>
    %c6_352 = arith.constant 6 : index
    %c2_353 = arith.constant 2 : index
    %c0_354 = arith.constant 0 : index
    %c0_355 = arith.constant 0 : index
    %358 = vector.load %arg3[%c6_352, %c2_353, %c0_354, %c0_355] : memref<12x6x32x32xf32, #tpu.memory_space<vmem>>, vector<1x1x32x32xf32>
    %359 = vector.shape_cast %358 : vector<1x1x32x32xf32> to vector<32x32xf32>
    %cst_356 = arith.constant dense<0.000000e+00> : vector<32x32xf32>
    %360 = tpu.matmul %357, %359, %cst_356 {dimension_numbers = #tpu.dot_dimension_numbers<[1], [0], [0], [1], [0, 0, 1, 1], [], []>} : vector<32x32xf32>, vector<32x32xf32>, vector<32x32xf32> -> vector<32x32xf32>
    %361 = arith.addf %351, %360 : vector<32x32xf32>
    %c6_357 = arith.constant 6 : index
    %c5_358 = arith.constant 5 : index
    %c0_359 = arith.constant 0 : index
    %c0_360 = arith.constant 0 : index
    %362 = vector.load %arg3[%c6_357, %c5_358, %c0_359, %c0_360] : memref<12x6x32x32xf32, #tpu.memory_space<vmem>>, vector<1x1x32x32xf32>
    %363 = vector.shape_cast %362 : vector<1x1x32x32xf32> to vector<32x32xf32>
    %cst_361 = arith.constant dense<0.000000e+00> : vector<32x32xf32>
    %364 = tpu.matmul %357, %363, %cst_361 {dimension_numbers = #tpu.dot_dimension_numbers<[1], [0], [0], [1], [0, 0, 1, 1], [], []>} : vector<32x32xf32>, vector<32x32xf32>, vector<32x32xf32> -> vector<32x32xf32>
    %365 = arith.addf %355, %364 : vector<32x32xf32>
    %c6_362 = arith.constant 6 : index
    %c0_363 = arith.constant 0 : index
    %c0_364 = arith.constant 0 : index
    %366 = vector.load %arg4[%c6_362, %c0_363, %c0_364] : memref<12x1x32xf32, #tpu.memory_space<vmem>>, vector<1x1x32xf32>
    %367 = vector.shape_cast %366 : vector<1x1x32xf32> to vector<1x32xf32>
    %368 = vector.broadcast %367 : vector<1x32xf32> to vector<32x32xf32>
    %369 = arith.addf %361, %368 : vector<32x32xf32>
    %c6_365 = arith.constant 6 : index
    %c0_366 = arith.constant 0 : index
    %c0_367 = arith.constant 0 : index
    %370 = vector.load %arg5[%c6_365, %c0_366, %c0_367] : memref<12x1x32xf32, #tpu.memory_space<vmem>>, vector<1x1x32xf32>
    %371 = vector.shape_cast %370 : vector<1x1x32xf32> to vector<1x32xf32>
    %372 = vector.broadcast %371 : vector<1x32xf32> to vector<32x32xf32>
    %373 = arith.addf %365, %372 : vector<32x32xf32>
    %374 = arith.negf %369 : vector<32x32xf32>
    %375 = math.exp %374 : vector<32x32xf32>
    %cst_368 = arith.constant 1.000000e+00 : f32
    %376 = vector.broadcast %cst_368 : f32 to vector<32x32xf32>
    %377 = arith.addf %376, %375 : vector<32x32xf32>
    %378 = arith.divf %376, %377 : vector<32x32xf32>
    %c0_369 = arith.constant 0 : index
    %c5_370 = arith.constant 5 : index
    %c0_371 = arith.constant 0 : index
    %379 = vector.load %arg7[%c0_369, %c5_370, %c0_371] : memref<2x26x32xf32, #tpu.memory_space<vmem>>, vector<2x16x32xf32>
    %380 = vector.shape_cast %379 : vector<2x16x32xf32> to vector<32x32xf32>
    %381 = arith.mulf %378, %380 : vector<32x32xf32>
    %cst_372 = arith.constant 1.000000e+00 : f32
    %382 = vector.broadcast %cst_372 : f32 to vector<32x32xf32>
    %383 = arith.subf %382, %378 : vector<32x32xf32>
    %384 = arith.mulf %383, %373 : vector<32x32xf32>
    %385 = arith.addf %381, %384 : vector<32x32xf32>
    %386 = vector.shape_cast %385 : vector<32x32xf32> to vector<2x16x32xf32>
    %387 = vector.broadcast %25 : vector<2x16x1xf32> to vector<2x16x32xf32>
    %388 = arith.mulf %386, %387 : vector<2x16x32xf32>
    %c0_373 = arith.constant 0 : index
    %c5_374 = arith.constant 5 : index
    %c0_375 = arith.constant 0 : index
    %389 = vector.load %arg7[%c0_373, %c5_374, %c0_375] : memref<2x26x32xf32, #tpu.memory_space<vmem>>, vector<2x16x32xf32>
    tpu.vector_store %arg7[%c0_373, %c5_374, %c0_375], %388 {strides = array<i32>} : memref<2x26x32xf32, #tpu.memory_space<vmem>>, vector<2x16x32xf32>,
    %c0_376 = arith.constant 0 : index
    %c5_377 = arith.constant 5 : index
    %c0_378 = arith.constant 0 : index
    %390 = vector.load %arg7[%c0_376, %c5_377, %c0_378] : memref<2x26x32xf32, #tpu.memory_space<vmem>>, vector<2x16x32xf32>
    %391 = vector.shape_cast %390 : vector<2x16x32xf32> to vector<32x32xf32>
    %c7_379 = arith.constant 7 : index
    %c1_380 = arith.constant 1 : index
    %c0_381 = arith.constant 0 : index
    %c0_382 = arith.constant 0 : index
    %392 = vector.load %arg3[%c7_379, %c1_380, %c0_381, %c0_382] : memref<12x6x32x32xf32, #tpu.memory_space<vmem>>, vector<1x1x32x32xf32>
    %393 = vector.shape_cast %392 : vector<1x1x32x32xf32> to vector<32x32xf32>
    %cst_383 = arith.constant dense<0.000000e+00> : vector<32x32xf32>
    %394 = tpu.matmul %391, %393, %cst_383 {dimension_numbers = #tpu.dot_dimension_numbers<[1], [0], [0], [1], [0, 0, 1, 1], [], []>} : vector<32x32xf32>, vector<32x32xf32>, vector<32x32xf32> -> vector<32x32xf32>
    %c7_384 = arith.constant 7 : index
    %c4_385 = arith.constant 4 : index
    %c0_386 = arith.constant 0 : index
    %c0_387 = arith.constant 0 : index
    %395 = vector.load %arg3[%c7_384, %c4_385, %c0_386, %c0_387] : memref<12x6x32x32xf32, #tpu.memory_space<vmem>>, vector<1x1x32x32xf32>
    %396 = vector.shape_cast %395 : vector<1x1x32x32xf32> to vector<32x32xf32>
    %cst_388 = arith.constant dense<0.000000e+00> : vector<32x32xf32>
    %397 = tpu.matmul %391, %396, %cst_388 {dimension_numbers = #tpu.dot_dimension_numbers<[1], [0], [0], [1], [0, 0, 1, 1], [], []>} : vector<32x32xf32>, vector<32x32xf32>, vector<32x32xf32> -> vector<32x32xf32>
    %c0_389 = arith.constant 0 : index
    %c3_390 = arith.constant 3 : index
    %c0_391 = arith.constant 0 : index
    %398 = vector.load %arg7[%c0_389, %c3_390, %c0_391] : memref<2x26x32xf32, #tpu.memory_space<vmem>>, vector<2x16x32xf32>
    %399 = vector.shape_cast %398 : vector<2x16x32xf32> to vector<32x32xf32>
    %c7_392 = arith.constant 7 : index
    %c0_393 = arith.constant 0 : index
    %c0_394 = arith.constant 0 : index
    %c0_395 = arith.constant 0 : index
    %400 = vector.load %arg3[%c7_392, %c0_393, %c0_394, %c0_395] : memref<12x6x32x32xf32, #tpu.memory_space<vmem>>, vector<1x1x32x32xf32>
    %401 = vector.shape_cast %400 : vector<1x1x32x32xf32> to vector<32x32xf32>
    %cst_396 = arith.constant dense<0.000000e+00> : vector<32x32xf32>
    %402 = tpu.matmul %399, %401, %cst_396 {dimension_numbers = #tpu.dot_dimension_numbers<[1], [0], [0], [1], [0, 0, 1, 1], [], []>} : vector<32x32xf32>, vector<32x32xf32>, vector<32x32xf32> -> vector<32x32xf32>
    %403 = arith.addf %394, %402 : vector<32x32xf32>
    %c7_397 = arith.constant 7 : index
    %c3_398 = arith.constant 3 : index
    %c0_399 = arith.constant 0 : index
    %c0_400 = arith.constant 0 : index
    %404 = vector.load %arg3[%c7_397, %c3_398, %c0_399, %c0_400] : memref<12x6x32x32xf32, #tpu.memory_space<vmem>>, vector<1x1x32x32xf32>
    %405 = vector.shape_cast %404 : vector<1x1x32x32xf32> to vector<32x32xf32>
    %cst_401 = arith.constant dense<0.000000e+00> : vector<32x32xf32>
    %406 = tpu.matmul %399, %405, %cst_401 {dimension_numbers = #tpu.dot_dimension_numbers<[1], [0], [0], [1], [0, 0, 1, 1], [], []>} : vector<32x32xf32>, vector<32x32xf32>, vector<32x32xf32> -> vector<32x32xf32>
    %407 = arith.addf %397, %406 : vector<32x32xf32>
    %c0_402 = arith.constant 0 : index
    %c7_403 = arith.constant 7 : index
    %c0_404 = arith.constant 0 : index
    %408 = vector.load %arg7[%c0_402, %c7_403, %c0_404] : memref<2x26x32xf32, #tpu.memory_space<vmem>>, vector<2x16x32xf32>
    %409 = vector.shape_cast %408 : vector<2x16x32xf32> to vector<32x32xf32>
    %c7_405 = arith.constant 7 : index
    %c2_406 = arith.constant 2 : index
    %c0_407 = arith.constant 0 : index
    %c0_408 = arith.constant 0 : index
    %410 = vector.load %arg3[%c7_405, %c2_406, %c0_407, %c0_408] : memref<12x6x32x32xf32, #tpu.memory_space<vmem>>, vector<1x1x32x32xf32>
    %411 = vector.shape_cast %410 : vector<1x1x32x32xf32> to vector<32x32xf32>
    %cst_409 = arith.constant dense<0.000000e+00> : vector<32x32xf32>
    %412 = tpu.matmul %409, %411, %cst_409 {dimension_numbers = #tpu.dot_dimension_numbers<[1], [0], [0], [1], [0, 0, 1, 1], [], []>} : vector<32x32xf32>, vector<32x32xf32>, vector<32x32xf32> -> vector<32x32xf32>
    %413 = arith.addf %403, %412 : vector<32x32xf32>
    %c7_410 = arith.constant 7 : index
    %c5_411 = arith.constant 5 : index
    %c0_412 = arith.constant 0 : index
    %c0_413 = arith.constant 0 : index
    %414 = vector.load %arg3[%c7_410, %c5_411, %c0_412, %c0_413] : memref<12x6x32x32xf32, #tpu.memory_space<vmem>>, vector<1x1x32x32xf32>
    %415 = vector.shape_cast %414 : vector<1x1x32x32xf32> to vector<32x32xf32>
    %cst_414 = arith.constant dense<0.000000e+00> : vector<32x32xf32>
    %416 = tpu.matmul %409, %415, %cst_414 {dimension_numbers = #tpu.dot_dimension_numbers<[1], [0], [0], [1], [0, 0, 1, 1], [], []>} : vector<32x32xf32>, vector<32x32xf32>, vector<32x32xf32> -> vector<32x32xf32>
    %417 = arith.addf %407, %416 : vector<32x32xf32>
    %c7_415 = arith.constant 7 : index
    %c0_416 = arith.constant 0 : index
    %c0_417 = arith.constant 0 : index
    %418 = vector.load %arg4[%c7_415, %c0_416, %c0_417] : memref<12x1x32xf32, #tpu.memory_space<vmem>>, vector<1x1x32xf32>
    %419 = vector.shape_cast %418 : vector<1x1x32xf32> to vector<1x32xf32>
    %420 = vector.broadcast %419 : vector<1x32xf32> to vector<32x32xf32>
    %421 = arith.addf %413, %420 : vector<32x32xf32>
    %c7_418 = arith.constant 7 : index
    %c0_419 = arith.constant 0 : index
    %c0_420 = arith.constant 0 : index
    %422 = vector.load %arg5[%c7_418, %c0_419, %c0_420] : memref<12x1x32xf32, #tpu.memory_space<vmem>>, vector<1x1x32xf32>
    %423 = vector.shape_cast %422 : vector<1x1x32xf32> to vector<1x32xf32>
    %424 = vector.broadcast %423 : vector<1x32xf32> to vector<32x32xf32>
    %425 = arith.addf %417, %424 : vector<32x32xf32>
    %426 = arith.negf %421 : vector<32x32xf32>
    %427 = math.exp %426 : vector<32x32xf32>
    %cst_421 = arith.constant 1.000000e+00 : f32
    %428 = vector.broadcast %cst_421 : f32 to vector<32x32xf32>
    %429 = arith.addf %428, %427 : vector<32x32xf32>
    %430 = arith.divf %428, %429 : vector<32x32xf32>
    %c0_422 = arith.constant 0 : index
    %c5_423 = arith.constant 5 : index
    %c0_424 = arith.constant 0 : index
    %431 = vector.load %arg7[%c0_422, %c5_423, %c0_424] : memref<2x26x32xf32, #tpu.memory_space<vmem>>, vector<2x16x32xf32>
    %432 = vector.shape_cast %431 : vector<2x16x32xf32> to vector<32x32xf32>
    %433 = arith.mulf %430, %432 : vector<32x32xf32>
    %cst_425 = arith.constant 1.000000e+00 : f32
    %434 = vector.broadcast %cst_425 : f32 to vector<32x32xf32>
    %435 = arith.subf %434, %430 : vector<32x32xf32>
    %436 = arith.mulf %435, %425 : vector<32x32xf32>
    %437 = arith.addf %433, %436 : vector<32x32xf32>
    %438 = vector.shape_cast %437 : vector<32x32xf32> to vector<2x16x32xf32>
    %439 = vector.broadcast %25 : vector<2x16x1xf32> to vector<2x16x32xf32>
    %440 = arith.mulf %438, %439 : vector<2x16x32xf32>
    %c0_426 = arith.constant 0 : index
    %c5_427 = arith.constant 5 : index
    %c0_428 = arith.constant 0 : index
    %441 = vector.load %arg7[%c0_426, %c5_427, %c0_428] : memref<2x26x32xf32, #tpu.memory_space<vmem>>, vector<2x16x32xf32>
    tpu.vector_store %arg7[%c0_426, %c5_427, %c0_428], %440 {strides = array<i32>} : memref<2x26x32xf32, #tpu.memory_space<vmem>>, vector<2x16x32xf32>,
    %c0_429 = arith.constant 0 : index
    %c5_430 = arith.constant 5 : index
    %c0_431 = arith.constant 0 : index
    %442 = vector.load %arg7[%c0_429, %c5_430, %c0_431] : memref<2x26x32xf32, #tpu.memory_space<vmem>>, vector<2x16x32xf32>
    %443 = vector.shape_cast %442 : vector<2x16x32xf32> to vector<32x32xf32>
    %c8 = arith.constant 8 : index
    %c1_432 = arith.constant 1 : index
    %c0_433 = arith.constant 0 : index
    %c0_434 = arith.constant 0 : index
    %444 = vector.load %arg3[%c8, %c1_432, %c0_433, %c0_434] : memref<12x6x32x32xf32, #tpu.memory_space<vmem>>, vector<1x1x32x32xf32>
    %445 = vector.shape_cast %444 : vector<1x1x32x32xf32> to vector<32x32xf32>
    %cst_435 = arith.constant dense<0.000000e+00> : vector<32x32xf32>
    %446 = tpu.matmul %443, %445, %cst_435 {dimension_numbers = #tpu.dot_dimension_numbers<[1], [0], [0], [1], [0, 0, 1, 1], [], []>} : vector<32x32xf32>, vector<32x32xf32>, vector<32x32xf32> -> vector<32x32xf32>
    %c8_436 = arith.constant 8 : index
    %c4_437 = arith.constant 4 : index
    %c0_438 = arith.constant 0 : index
    %c0_439 = arith.constant 0 : index
    %447 = vector.load %arg3[%c8_436, %c4_437, %c0_438, %c0_439] : memref<12x6x32x32xf32, #tpu.memory_space<vmem>>, vector<1x1x32x32xf32>
    %448 = vector.shape_cast %447 : vector<1x1x32x32xf32> to vector<32x32xf32>
    %cst_440 = arith.constant dense<0.000000e+00> : vector<32x32xf32>
    %449 = tpu.matmul %443, %448, %cst_440 {dimension_numbers = #tpu.dot_dimension_numbers<[1], [0], [0], [1], [0, 0, 1, 1], [], []>} : vector<32x32xf32>, vector<32x32xf32>, vector<32x32xf32> -> vector<32x32xf32>
    %c0_441 = arith.constant 0 : index
    %c0_442 = arith.constant 0 : index
    %c0_443 = arith.constant 0 : index
    %450 = vector.load %arg7[%c0_441, %c0_442, %c0_443] : memref<2x26x32xf32, #tpu.memory_space<vmem>>, vector<2x16x32xf32>
    %451 = vector.shape_cast %450 : vector<2x16x32xf32> to vector<32x32xf32>
    %c8_444 = arith.constant 8 : index
    %c0_445 = arith.constant 0 : index
    %c0_446 = arith.constant 0 : index
    %c0_447 = arith.constant 0 : index
    %452 = vector.load %arg3[%c8_444, %c0_445, %c0_446, %c0_447] : memref<12x6x32x32xf32, #tpu.memory_space<vmem>>, vector<1x1x32x32xf32>
    %453 = vector.shape_cast %452 : vector<1x1x32x32xf32> to vector<32x32xf32>
    %cst_448 = arith.constant dense<0.000000e+00> : vector<32x32xf32>
    %454 = tpu.matmul %451, %453, %cst_448 {dimension_numbers = #tpu.dot_dimension_numbers<[1], [0], [0], [1], [0, 0, 1, 1], [], []>} : vector<32x32xf32>, vector<32x32xf32>, vector<32x32xf32> -> vector<32x32xf32>
    %455 = arith.addf %446, %454 : vector<32x32xf32>
    %c8_449 = arith.constant 8 : index
    %c3_450 = arith.constant 3 : index
    %c0_451 = arith.constant 0 : index
    %c0_452 = arith.constant 0 : index
    %456 = vector.load %arg3[%c8_449, %c3_450, %c0_451, %c0_452] : memref<12x6x32x32xf32, #tpu.memory_space<vmem>>, vector<1x1x32x32xf32>
    %457 = vector.shape_cast %456 : vector<1x1x32x32xf32> to vector<32x32xf32>
    %cst_453 = arith.constant dense<0.000000e+00> : vector<32x32xf32>
    %458 = tpu.matmul %451, %457, %cst_453 {dimension_numbers = #tpu.dot_dimension_numbers<[1], [0], [0], [1], [0, 0, 1, 1], [], []>} : vector<32x32xf32>, vector<32x32xf32>, vector<32x32xf32> -> vector<32x32xf32>
    %459 = arith.addf %449, %458 : vector<32x32xf32>
    %c0_454 = arith.constant 0 : index
    %c10_455 = arith.constant 10 : index
    %c0_456 = arith.constant 0 : index
    %460 = vector.load %arg7[%c0_454, %c10_455, %c0_456] : memref<2x26x32xf32, #tpu.memory_space<vmem>>, vector<2x16x32xf32>
    %461 = vector.shape_cast %460 : vector<2x16x32xf32> to vector<32x32xf32>
    %c8_457 = arith.constant 8 : index
    %c2_458 = arith.constant 2 : index
    %c0_459 = arith.constant 0 : index
    %c0_460 = arith.constant 0 : index
    %462 = vector.load %arg3[%c8_457, %c2_458, %c0_459, %c0_460] : memref<12x6x32x32xf32, #tpu.memory_space<vmem>>, vector<1x1x32x32xf32>
    %463 = vector.shape_cast %462 : vector<1x1x32x32xf32> to vector<32x32xf32>
    %cst_461 = arith.constant dense<0.000000e+00> : vector<32x32xf32>
    %464 = tpu.matmul %461, %463, %cst_461 {dimension_numbers = #tpu.dot_dimension_numbers<[1], [0], [0], [1], [0, 0, 1, 1], [], []>} : vector<32x32xf32>, vector<32x32xf32>, vector<32x32xf32> -> vector<32x32xf32>
    %465 = arith.addf %455, %464 : vector<32x32xf32>
    %c8_462 = arith.constant 8 : index
    %c5_463 = arith.constant 5 : index
    %c0_464 = arith.constant 0 : index
    %c0_465 = arith.constant 0 : index
    %466 = vector.load %arg3[%c8_462, %c5_463, %c0_464, %c0_465] : memref<12x6x32x32xf32, #tpu.memory_space<vmem>>, vector<1x1x32x32xf32>
    %467 = vector.shape_cast %466 : vector<1x1x32x32xf32> to vector<32x32xf32>
    %cst_466 = arith.constant dense<0.000000e+00> : vector<32x32xf32>
    %468 = tpu.matmul %461, %467, %cst_466 {dimension_numbers = #tpu.dot_dimension_numbers<[1], [0], [0], [1], [0, 0, 1, 1], [], []>} : vector<32x32xf32>, vector<32x32xf32>, vector<32x32xf32> -> vector<32x32xf32>
    %469 = arith.addf %459, %468 : vector<32x32xf32>
    %c8_467 = arith.constant 8 : index
    %c0_468 = arith.constant 0 : index
    %c0_469 = arith.constant 0 : index
    %470 = vector.load %arg4[%c8_467, %c0_468, %c0_469] : memref<12x1x32xf32, #tpu.memory_space<vmem>>, vector<1x1x32xf32>
    %471 = vector.shape_cast %470 : vector<1x1x32xf32> to vector<1x32xf32>
    %472 = vector.broadcast %471 : vector<1x32xf32> to vector<32x32xf32>
    %473 = arith.addf %465, %472 : vector<32x32xf32>
    %c8_470 = arith.constant 8 : index
    %c0_471 = arith.constant 0 : index
    %c0_472 = arith.constant 0 : index
    %474 = vector.load %arg5[%c8_470, %c0_471, %c0_472] : memref<12x1x32xf32, #tpu.memory_space<vmem>>, vector<1x1x32xf32>
    %475 = vector.shape_cast %474 : vector<1x1x32xf32> to vector<1x32xf32>
    %476 = vector.broadcast %475 : vector<1x32xf32> to vector<32x32xf32>
    %477 = arith.addf %469, %476 : vector<32x32xf32>
    %478 = arith.negf %473 : vector<32x32xf32>
    %479 = math.exp %478 : vector<32x32xf32>
    %cst_473 = arith.constant 1.000000e+00 : f32
    %480 = vector.broadcast %cst_473 : f32 to vector<32x32xf32>
    %481 = arith.addf %480, %479 : vector<32x32xf32>
    %482 = arith.divf %480, %481 : vector<32x32xf32>
    %c0_474 = arith.constant 0 : index
    %c5_475 = arith.constant 5 : index
    %c0_476 = arith.constant 0 : index
    %483 = vector.load %arg7[%c0_474, %c5_475, %c0_476] : memref<2x26x32xf32, #tpu.memory_space<vmem>>, vector<2x16x32xf32>
    %484 = vector.shape_cast %483 : vector<2x16x32xf32> to vector<32x32xf32>
    %485 = arith.mulf %482, %484 : vector<32x32xf32>
    %cst_477 = arith.constant 1.000000e+00 : f32
    %486 = vector.broadcast %cst_477 : f32 to vector<32x32xf32>
    %487 = arith.subf %486, %482 : vector<32x32xf32>
    %488 = arith.mulf %487, %477 : vector<32x32xf32>
    %489 = arith.addf %485, %488 : vector<32x32xf32>
    %490 = vector.shape_cast %489 : vector<32x32xf32> to vector<2x16x32xf32>
    %491 = vector.broadcast %25 : vector<2x16x1xf32> to vector<2x16x32xf32>
    %492 = arith.mulf %490, %491 : vector<2x16x32xf32>
    %c0_478 = arith.constant 0 : index
    %c5_479 = arith.constant 5 : index
    %c0_480 = arith.constant 0 : index
    %493 = vector.load %arg7[%c0_478, %c5_479, %c0_480] : memref<2x26x32xf32, #tpu.memory_space<vmem>>, vector<2x16x32xf32>
    tpu.vector_store %arg7[%c0_478, %c5_479, %c0_480], %492 {strides = array<i32>} : memref<2x26x32xf32, #tpu.memory_space<vmem>>, vector<2x16x32xf32>,
    %c0_481 = arith.constant 0 : index
    %c5_482 = arith.constant 5 : index
    %c0_483 = arith.constant 0 : index
    %494 = vector.load %arg7[%c0_481, %c5_482, %c0_483] : memref<2x26x32xf32, #tpu.memory_space<vmem>>, vector<2x16x32xf32>
    %495 = vector.shape_cast %494 : vector<2x16x32xf32> to vector<32x32xf32>
    %c9 = arith.constant 9 : index
    %c1_484 = arith.constant 1 : index
    %c0_485 = arith.constant 0 : index
    %c0_486 = arith.constant 0 : index
    %496 = vector.load %arg3[%c9, %c1_484, %c0_485, %c0_486] : memref<12x6x32x32xf32, #tpu.memory_space<vmem>>, vector<1x1x32x32xf32>
    %497 = vector.shape_cast %496 : vector<1x1x32x32xf32> to vector<32x32xf32>
    %cst_487 = arith.constant dense<0.000000e+00> : vector<32x32xf32>
    %498 = tpu.matmul %495, %497, %cst_487 {dimension_numbers = #tpu.dot_dimension_numbers<[1], [0], [0], [1], [0, 0, 1, 1], [], []>} : vector<32x32xf32>, vector<32x32xf32>, vector<32x32xf32> -> vector<32x32xf32>
    %c9_488 = arith.constant 9 : index
    %c4_489 = arith.constant 4 : index
    %c0_490 = arith.constant 0 : index
    %c0_491 = arith.constant 0 : index
    %499 = vector.load %arg3[%c9_488, %c4_489, %c0_490, %c0_491] : memref<12x6x32x32xf32, #tpu.memory_space<vmem>>, vector<1x1x32x32xf32>
    %500 = vector.shape_cast %499 : vector<1x1x32x32xf32> to vector<32x32xf32>
    %cst_492 = arith.constant dense<0.000000e+00> : vector<32x32xf32>
    %501 = tpu.matmul %495, %500, %cst_492 {dimension_numbers = #tpu.dot_dimension_numbers<[1], [0], [0], [1], [0, 0, 1, 1], [], []>} : vector<32x32xf32>, vector<32x32xf32>, vector<32x32xf32> -> vector<32x32xf32>
    %c0_493 = arith.constant 0 : index
    %c4_494 = arith.constant 4 : index
    %c0_495 = arith.constant 0 : index
    %502 = vector.load %arg7[%c0_493, %c4_494, %c0_495] : memref<2x26x32xf32, #tpu.memory_space<vmem>>, vector<2x16x32xf32>
    %503 = vector.shape_cast %502 : vector<2x16x32xf32> to vector<32x32xf32>
    %c9_496 = arith.constant 9 : index
    %c0_497 = arith.constant 0 : index
    %c0_498 = arith.constant 0 : index
    %c0_499 = arith.constant 0 : index
    %504 = vector.load %arg3[%c9_496, %c0_497, %c0_498, %c0_499] : memref<12x6x32x32xf32, #tpu.memory_space<vmem>>, vector<1x1x32x32xf32>
    %505 = vector.shape_cast %504 : vector<1x1x32x32xf32> to vector<32x32xf32>
    %cst_500 = arith.constant dense<0.000000e+00> : vector<32x32xf32>
    %506 = tpu.matmul %503, %505, %cst_500 {dimension_numbers = #tpu.dot_dimension_numbers<[1], [0], [0], [1], [0, 0, 1, 1], [], []>} : vector<32x32xf32>, vector<32x32xf32>, vector<32x32xf32> -> vector<32x32xf32>
    %507 = arith.addf %498, %506 : vector<32x32xf32>
    %c9_501 = arith.constant 9 : index
    %c3_502 = arith.constant 3 : index
    %c0_503 = arith.constant 0 : index
    %c0_504 = arith.constant 0 : index
    %508 = vector.load %arg3[%c9_501, %c3_502, %c0_503, %c0_504] : memref<12x6x32x32xf32, #tpu.memory_space<vmem>>, vector<1x1x32x32xf32>
    %509 = vector.shape_cast %508 : vector<1x1x32x32xf32> to vector<32x32xf32>
    %cst_505 = arith.constant dense<0.000000e+00> : vector<32x32xf32>
    %510 = tpu.matmul %503, %509, %cst_505 {dimension_numbers = #tpu.dot_dimension_numbers<[1], [0], [0], [1], [0, 0, 1, 1], [], []>} : vector<32x32xf32>, vector<32x32xf32>, vector<32x32xf32> -> vector<32x32xf32>
    %511 = arith.addf %501, %510 : vector<32x32xf32>
    %c0_506 = arith.constant 0 : index
    %c6_507 = arith.constant 6 : index
    %c0_508 = arith.constant 0 : index
    %512 = vector.load %arg7[%c0_506, %c6_507, %c0_508] : memref<2x26x32xf32, #tpu.memory_space<vmem>>, vector<2x16x32xf32>
    %513 = vector.shape_cast %512 : vector<2x16x32xf32> to vector<32x32xf32>
    %c9_509 = arith.constant 9 : index
    %c2_510 = arith.constant 2 : index
    %c0_511 = arith.constant 0 : index
    %c0_512 = arith.constant 0 : index
    %514 = vector.load %arg3[%c9_509, %c2_510, %c0_511, %c0_512] : memref<12x6x32x32xf32, #tpu.memory_space<vmem>>, vector<1x1x32x32xf32>
    %515 = vector.shape_cast %514 : vector<1x1x32x32xf32> to vector<32x32xf32>
    %cst_513 = arith.constant dense<0.000000e+00> : vector<32x32xf32>
    %516 = tpu.matmul %513, %515, %cst_513 {dimension_numbers = #tpu.dot_dimension_numbers<[1], [0], [0], [1], [0, 0, 1, 1], [], []>} : vector<32x32xf32>, vector<32x32xf32>, vector<32x32xf32> -> vector<32x32xf32>
    %517 = arith.addf %507, %516 : vector<32x32xf32>
    %c9_514 = arith.constant 9 : index
    %c5_515 = arith.constant 5 : index
    %c0_516 = arith.constant 0 : index
    %c0_517 = arith.constant 0 : index
    %518 = vector.load %arg3[%c9_514, %c5_515, %c0_516, %c0_517] : memref<12x6x32x32xf32, #tpu.memory_space<vmem>>, vector<1x1x32x32xf32>
    %519 = vector.shape_cast %518 : vector<1x1x32x32xf32> to vector<32x32xf32>
    %cst_518 = arith.constant dense<0.000000e+00> : vector<32x32xf32>
    %520 = tpu.matmul %513, %519, %cst_518 {dimension_numbers = #tpu.dot_dimension_numbers<[1], [0], [0], [1], [0, 0, 1, 1], [], []>} : vector<32x32xf32>, vector<32x32xf32>, vector<32x32xf32> -> vector<32x32xf32>
    %521 = arith.addf %511, %520 : vector<32x32xf32>
    %c9_519 = arith.constant 9 : index
    %c0_520 = arith.constant 0 : index
    %c0_521 = arith.constant 0 : index
    %522 = vector.load %arg4[%c9_519, %c0_520, %c0_521] : memref<12x1x32xf32, #tpu.memory_space<vmem>>, vector<1x1x32xf32>
    %523 = vector.shape_cast %522 : vector<1x1x32xf32> to vector<1x32xf32>
    %524 = vector.broadcast %523 : vector<1x32xf32> to vector<32x32xf32>
    %525 = arith.addf %517, %524 : vector<32x32xf32>
    %c9_522 = arith.constant 9 : index
    %c0_523 = arith.constant 0 : index
    %c0_524 = arith.constant 0 : index
    %526 = vector.load %arg5[%c9_522, %c0_523, %c0_524] : memref<12x1x32xf32, #tpu.memory_space<vmem>>, vector<1x1x32xf32>
    %527 = vector.shape_cast %526 : vector<1x1x32xf32> to vector<1x32xf32>
    %528 = vector.broadcast %527 : vector<1x32xf32> to vector<32x32xf32>
    %529 = arith.addf %521, %528 : vector<32x32xf32>
    %530 = arith.negf %525 : vector<32x32xf32>
    %531 = math.exp %530 : vector<32x32xf32>
    %cst_525 = arith.constant 1.000000e+00 : f32
    %532 = vector.broadcast %cst_525 : f32 to vector<32x32xf32>
    %533 = arith.addf %532, %531 : vector<32x32xf32>
    %534 = arith.divf %532, %533 : vector<32x32xf32>
    %c0_526 = arith.constant 0 : index
    %c5_527 = arith.constant 5 : index
    %c0_528 = arith.constant 0 : index
    %535 = vector.load %arg7[%c0_526, %c5_527, %c0_528] : memref<2x26x32xf32, #tpu.memory_space<vmem>>, vector<2x16x32xf32>
    %536 = vector.shape_cast %535 : vector<2x16x32xf32> to vector<32x32xf32>
    %537 = arith.mulf %534, %536 : vector<32x32xf32>
    %cst_529 = arith.constant 1.000000e+00 : f32
    %538 = vector.broadcast %cst_529 : f32 to vector<32x32xf32>
    %539 = arith.subf %538, %534 : vector<32x32xf32>
    %540 = arith.mulf %539, %529 : vector<32x32xf32>
    %541 = arith.addf %537, %540 : vector<32x32xf32>
    %542 = vector.shape_cast %541 : vector<32x32xf32> to vector<2x16x32xf32>
    %543 = vector.broadcast %25 : vector<2x16x1xf32> to vector<2x16x32xf32>
    %544 = arith.mulf %542, %543 : vector<2x16x32xf32>
    %c0_530 = arith.constant 0 : index
    %c5_531 = arith.constant 5 : index
    %c0_532 = arith.constant 0 : index
    %545 = vector.load %arg7[%c0_530, %c5_531, %c0_532] : memref<2x26x32xf32, #tpu.memory_space<vmem>>, vector<2x16x32xf32>
    tpu.vector_store %arg7[%c0_530, %c5_531, %c0_532], %544 {strides = array<i32>} : memref<2x26x32xf32, #tpu.memory_space<vmem>>, vector<2x16x32xf32>,
    %c0_533 = arith.constant 0 : index
    %c5_534 = arith.constant 5 : index
    %c0_535 = arith.constant 0 : index
    %546 = vector.load %arg7[%c0_533, %c5_534, %c0_535] : memref<2x26x32xf32, #tpu.memory_space<vmem>>, vector<2x16x32xf32>
    %547 = vector.shape_cast %546 : vector<2x16x32xf32> to vector<32x32xf32>
    %c10_536 = arith.constant 10 : index
    %c1_537 = arith.constant 1 : index
    %c0_538 = arith.constant 0 : index
    %c0_539 = arith.constant 0 : index
    %548 = vector.load %arg3[%c10_536, %c1_537, %c0_538, %c0_539] : memref<12x6x32x32xf32, #tpu.memory_space<vmem>>, vector<1x1x32x32xf32>
    %549 = vector.shape_cast %548 : vector<1x1x32x32xf32> to vector<32x32xf32>
    %cst_540 = arith.constant dense<0.000000e+00> : vector<32x32xf32>
    %550 = tpu.matmul %547, %549, %cst_540 {dimension_numbers = #tpu.dot_dimension_numbers<[1], [0], [0], [1], [0, 0, 1, 1], [], []>} : vector<32x32xf32>, vector<32x32xf32>, vector<32x32xf32> -> vector<32x32xf32>
    %c10_541 = arith.constant 10 : index
    %c4_542 = arith.constant 4 : index
    %c0_543 = arith.constant 0 : index
    %c0_544 = arith.constant 0 : index
    %551 = vector.load %arg3[%c10_541, %c4_542, %c0_543, %c0_544] : memref<12x6x32x32xf32, #tpu.memory_space<vmem>>, vector<1x1x32x32xf32>
    %552 = vector.shape_cast %551 : vector<1x1x32x32xf32> to vector<32x32xf32>
    %cst_545 = arith.constant dense<0.000000e+00> : vector<32x32xf32>
    %553 = tpu.matmul %547, %552, %cst_545 {dimension_numbers = #tpu.dot_dimension_numbers<[1], [0], [0], [1], [0, 0, 1, 1], [], []>} : vector<32x32xf32>, vector<32x32xf32>, vector<32x32xf32> -> vector<32x32xf32>
    %c0_546 = arith.constant 0 : index
    %c4_547 = arith.constant 4 : index
    %c0_548 = arith.constant 0 : index
    %554 = vector.load %arg7[%c0_546, %c4_547, %c0_548] : memref<2x26x32xf32, #tpu.memory_space<vmem>>, vector<2x16x32xf32>
    %555 = vector.shape_cast %554 : vector<2x16x32xf32> to vector<32x32xf32>
    %c10_549 = arith.constant 10 : index
    %c0_550 = arith.constant 0 : index
    %c0_551 = arith.constant 0 : index
    %c0_552 = arith.constant 0 : index
    %556 = vector.load %arg3[%c10_549, %c0_550, %c0_551, %c0_552] : memref<12x6x32x32xf32, #tpu.memory_space<vmem>>, vector<1x1x32x32xf32>
    %557 = vector.shape_cast %556 : vector<1x1x32x32xf32> to vector<32x32xf32>
    %cst_553 = arith.constant dense<0.000000e+00> : vector<32x32xf32>
    %558 = tpu.matmul %555, %557, %cst_553 {dimension_numbers = #tpu.dot_dimension_numbers<[1], [0], [0], [1], [0, 0, 1, 1], [], []>} : vector<32x32xf32>, vector<32x32xf32>, vector<32x32xf32> -> vector<32x32xf32>
    %559 = arith.addf %550, %558 : vector<32x32xf32>
    %c10_554 = arith.constant 10 : index
    %c3_555 = arith.constant 3 : index
    %c0_556 = arith.constant 0 : index
    %c0_557 = arith.constant 0 : index
    %560 = vector.load %arg3[%c10_554, %c3_555, %c0_556, %c0_557] : memref<12x6x32x32xf32, #tpu.memory_space<vmem>>, vector<1x1x32x32xf32>
    %561 = vector.shape_cast %560 : vector<1x1x32x32xf32> to vector<32x32xf32>
    %cst_558 = arith.constant dense<0.000000e+00> : vector<32x32xf32>
    %562 = tpu.matmul %555, %561, %cst_558 {dimension_numbers = #tpu.dot_dimension_numbers<[1], [0], [0], [1], [0, 0, 1, 1], [], []>} : vector<32x32xf32>, vector<32x32xf32>, vector<32x32xf32> -> vector<32x32xf32>
    %563 = arith.addf %553, %562 : vector<32x32xf32>
    %c0_559 = arith.constant 0 : index
    %c6_560 = arith.constant 6 : index
    %c0_561 = arith.constant 0 : index
    %564 = vector.load %arg7[%c0_559, %c6_560, %c0_561] : memref<2x26x32xf32, #tpu.memory_space<vmem>>, vector<2x16x32xf32>
    %565 = vector.shape_cast %564 : vector<2x16x32xf32> to vector<32x32xf32>
    %c10_562 = arith.constant 10 : index
    %c2_563 = arith.constant 2 : index
    %c0_564 = arith.constant 0 : index
    %c0_565 = arith.constant 0 : index
    %566 = vector.load %arg3[%c10_562, %c2_563, %c0_564, %c0_565] : memref<12x6x32x32xf32, #tpu.memory_space<vmem>>, vector<1x1x32x32xf32>
    %567 = vector.shape_cast %566 : vector<1x1x32x32xf32> to vector<32x32xf32>
    %cst_566 = arith.constant dense<0.000000e+00> : vector<32x32xf32>
    %568 = tpu.matmul %565, %567, %cst_566 {dimension_numbers = #tpu.dot_dimension_numbers<[1], [0], [0], [1], [0, 0, 1, 1], [], []>} : vector<32x32xf32>, vector<32x32xf32>, vector<32x32xf32> -> vector<32x32xf32>
    %569 = arith.addf %559, %568 : vector<32x32xf32>
    %c10_567 = arith.constant 10 : index
    %c5_568 = arith.constant 5 : index
    %c0_569 = arith.constant 0 : index
    %c0_570 = arith.constant 0 : index
    %570 = vector.load %arg3[%c10_567, %c5_568, %c0_569, %c0_570] : memref<12x6x32x32xf32, #tpu.memory_space<vmem>>, vector<1x1x32x32xf32>
    %571 = vector.shape_cast %570 : vector<1x1x32x32xf32> to vector<32x32xf32>
    %cst_571 = arith.constant dense<0.000000e+00> : vector<32x32xf32>
    %572 = tpu.matmul %565, %571, %cst_571 {dimension_numbers = #tpu.dot_dimension_numbers<[1], [0], [0], [1], [0, 0, 1, 1], [], []>} : vector<32x32xf32>, vector<32x32xf32>, vector<32x32xf32> -> vector<32x32xf32>
    %573 = arith.addf %563, %572 : vector<32x32xf32>
    %c10_572 = arith.constant 10 : index
    %c0_573 = arith.constant 0 : index
    %c0_574 = arith.constant 0 : index
    %574 = vector.load %arg4[%c10_572, %c0_573, %c0_574] : memref<12x1x32xf32, #tpu.memory_space<vmem>>, vector<1x1x32xf32>
    %575 = vector.shape_cast %574 : vector<1x1x32xf32> to vector<1x32xf32>
    %576 = vector.broadcast %575 : vector<1x32xf32> to vector<32x32xf32>
    %577 = arith.addf %569, %576 : vector<32x32xf32>
    %c10_575 = arith.constant 10 : index
    %c0_576 = arith.constant 0 : index
    %c0_577 = arith.constant 0 : index
    %578 = vector.load %arg5[%c10_575, %c0_576, %c0_577] : memref<12x1x32xf32, #tpu.memory_space<vmem>>, vector<1x1x32xf32>
    %579 = vector.shape_cast %578 : vector<1x1x32xf32> to vector<1x32xf32>
    %580 = vector.broadcast %579 : vector<1x32xf32> to vector<32x32xf32>
    %581 = arith.addf %573, %580 : vector<32x32xf32>
    %582 = arith.negf %577 : vector<32x32xf32>
    %583 = math.exp %582 : vector<32x32xf32>
    %cst_578 = arith.constant 1.000000e+00 : f32
    %584 = vector.broadcast %cst_578 : f32 to vector<32x32xf32>
    %585 = arith.addf %584, %583 : vector<32x32xf32>
    %586 = arith.divf %584, %585 : vector<32x32xf32>
    %c0_579 = arith.constant 0 : index
    %c5_580 = arith.constant 5 : index
    %c0_581 = arith.constant 0 : index
    %587 = vector.load %arg7[%c0_579, %c5_580, %c0_581] : memref<2x26x32xf32, #tpu.memory_space<vmem>>, vector<2x16x32xf32>
    %588 = vector.shape_cast %587 : vector<2x16x32xf32> to vector<32x32xf32>
    %589 = arith.mulf %586, %588 : vector<32x32xf32>
    %cst_582 = arith.constant 1.000000e+00 : f32
    %590 = vector.broadcast %cst_582 : f32 to vector<32x32xf32>
    %591 = arith.subf %590, %586 : vector<32x32xf32>
    %592 = arith.mulf %591, %581 : vector<32x32xf32>
    %593 = arith.addf %589, %592 : vector<32x32xf32>
    %594 = vector.shape_cast %593 : vector<32x32xf32> to vector<2x16x32xf32>
    %595 = vector.broadcast %25 : vector<2x16x1xf32> to vector<2x16x32xf32>
    %596 = arith.mulf %594, %595 : vector<2x16x32xf32>
    %c0_583 = arith.constant 0 : index
    %c5_584 = arith.constant 5 : index
    %c0_585 = arith.constant 0 : index
    %597 = vector.load %arg7[%c0_583, %c5_584, %c0_585] : memref<2x26x32xf32, #tpu.memory_space<vmem>>, vector<2x16x32xf32>
    tpu.vector_store %arg7[%c0_583, %c5_584, %c0_585], %596 {strides = array<i32>} : memref<2x26x32xf32, #tpu.memory_space<vmem>>, vector<2x16x32xf32>,
    %c0_586 = arith.constant 0 : index
    %c5_587 = arith.constant 5 : index
    %c0_588 = arith.constant 0 : index
    %598 = vector.load %arg7[%c0_586, %c5_587, %c0_588] : memref<2x26x32xf32, #tpu.memory_space<vmem>>, vector<2x16x32xf32>
    %599 = vector.shape_cast %598 : vector<2x16x32xf32> to vector<32x32xf32>
    %c11 = arith.constant 11 : index
    %c1_589 = arith.constant 1 : index
    %c0_590 = arith.constant 0 : index
    %c0_591 = arith.constant 0 : index
    %600 = vector.load %arg3[%c11, %c1_589, %c0_590, %c0_591] : memref<12x6x32x32xf32, #tpu.memory_space<vmem>>, vector<1x1x32x32xf32>
    %601 = vector.shape_cast %600 : vector<1x1x32x32xf32> to vector<32x32xf32>
    %cst_592 = arith.constant dense<0.000000e+00> : vector<32x32xf32>
    %602 = tpu.matmul %599, %601, %cst_592 {dimension_numbers = #tpu.dot_dimension_numbers<[1], [0], [0], [1], [0, 0, 1, 1], [], []>} : vector<32x32xf32>, vector<32x32xf32>, vector<32x32xf32> -> vector<32x32xf32>
    %c11_593 = arith.constant 11 : index
    %c4_594 = arith.constant 4 : index
    %c0_595 = arith.constant 0 : index
    %c0_596 = arith.constant 0 : index
    %603 = vector.load %arg3[%c11_593, %c4_594, %c0_595, %c0_596] : memref<12x6x32x32xf32, #tpu.memory_space<vmem>>, vector<1x1x32x32xf32>
    %604 = vector.shape_cast %603 : vector<1x1x32x32xf32> to vector<32x32xf32>
    %cst_597 = arith.constant dense<0.000000e+00> : vector<32x32xf32>
    %605 = tpu.matmul %599, %604, %cst_597 {dimension_numbers = #tpu.dot_dimension_numbers<[1], [0], [0], [1], [0, 0, 1, 1], [], []>} : vector<32x32xf32>, vector<32x32xf32>, vector<32x32xf32> -> vector<32x32xf32>
    %c0_598 = arith.constant 0 : index
    %c4_599 = arith.constant 4 : index
    %c0_600 = arith.constant 0 : index
    %606 = vector.load %arg7[%c0_598, %c4_599, %c0_600] : memref<2x26x32xf32, #tpu.memory_space<vmem>>, vector<2x16x32xf32>
    %607 = vector.shape_cast %606 : vector<2x16x32xf32> to vector<32x32xf32>
    %c11_601 = arith.constant 11 : index
    %c0_602 = arith.constant 0 : index
    %c0_603 = arith.constant 0 : index
    %c0_604 = arith.constant 0 : index
    %608 = vector.load %arg3[%c11_601, %c0_602, %c0_603, %c0_604] : memref<12x6x32x32xf32, #tpu.memory_space<vmem>>, vector<1x1x32x32xf32>
    %609 = vector.shape_cast %608 : vector<1x1x32x32xf32> to vector<32x32xf32>
    %cst_605 = arith.constant dense<0.000000e+00> : vector<32x32xf32>
    %610 = tpu.matmul %607, %609, %cst_605 {dimension_numbers = #tpu.dot_dimension_numbers<[1], [0], [0], [1], [0, 0, 1, 1], [], []>} : vector<32x32xf32>, vector<32x32xf32>, vector<32x32xf32> -> vector<32x32xf32>
    %611 = arith.addf %602, %610 : vector<32x32xf32>
    %c11_606 = arith.constant 11 : index
    %c3_607 = arith.constant 3 : index
    %c0_608 = arith.constant 0 : index
    %c0_609 = arith.constant 0 : index
    %612 = vector.load %arg3[%c11_606, %c3_607, %c0_608, %c0_609] : memref<12x6x32x32xf32, #tpu.memory_space<vmem>>, vector<1x1x32x32xf32>
    %613 = vector.shape_cast %612 : vector<1x1x32x32xf32> to vector<32x32xf32>
    %cst_610 = arith.constant dense<0.000000e+00> : vector<32x32xf32>
    %614 = tpu.matmul %607, %613, %cst_610 {dimension_numbers = #tpu.dot_dimension_numbers<[1], [0], [0], [1], [0, 0, 1, 1], [], []>} : vector<32x32xf32>, vector<32x32xf32>, vector<32x32xf32> -> vector<32x32xf32>
    %615 = arith.addf %605, %614 : vector<32x32xf32>
    %c0_611 = arith.constant 0 : index
    %c6_612 = arith.constant 6 : index
    %c0_613 = arith.constant 0 : index
    %616 = vector.load %arg7[%c0_611, %c6_612, %c0_613] : memref<2x26x32xf32, #tpu.memory_space<vmem>>, vector<2x16x32xf32>
    %617 = vector.shape_cast %616 : vector<2x16x32xf32> to vector<32x32xf32>
    %c11_614 = arith.constant 11 : index
    %c2_615 = arith.constant 2 : index
    %c0_616 = arith.constant 0 : index
    %c0_617 = arith.constant 0 : index
    %618 = vector.load %arg3[%c11_614, %c2_615, %c0_616, %c0_617] : memref<12x6x32x32xf32, #tpu.memory_space<vmem>>, vector<1x1x32x32xf32>
    %619 = vector.shape_cast %618 : vector<1x1x32x32xf32> to vector<32x32xf32>
    %cst_618 = arith.constant dense<0.000000e+00> : vector<32x32xf32>
    %620 = tpu.matmul %617, %619, %cst_618 {dimension_numbers = #tpu.dot_dimension_numbers<[1], [0], [0], [1], [0, 0, 1, 1], [], []>} : vector<32x32xf32>, vector<32x32xf32>, vector<32x32xf32> -> vector<32x32xf32>
    %621 = arith.addf %611, %620 : vector<32x32xf32>
    %c11_619 = arith.constant 11 : index
    %c5_620 = arith.constant 5 : index
    %c0_621 = arith.constant 0 : index
    %c0_622 = arith.constant 0 : index
    %622 = vector.load %arg3[%c11_619, %c5_620, %c0_621, %c0_622] : memref<12x6x32x32xf32, #tpu.memory_space<vmem>>, vector<1x1x32x32xf32>
    %623 = vector.shape_cast %622 : vector<1x1x32x32xf32> to vector<32x32xf32>
    %cst_623 = arith.constant dense<0.000000e+00> : vector<32x32xf32>
    %624 = tpu.matmul %617, %623, %cst_623 {dimension_numbers = #tpu.dot_dimension_numbers<[1], [0], [0], [1], [0, 0, 1, 1], [], []>} : vector<32x32xf32>, vector<32x32xf32>, vector<32x32xf32> -> vector<32x32xf32>
    %625 = arith.addf %615, %624 : vector<32x32xf32>
    %c11_624 = arith.constant 11 : index
    %c0_625 = arith.constant 0 : index
    %c0_626 = arith.constant 0 : index
    %626 = vector.load %arg4[%c11_624, %c0_625, %c0_626] : memref<12x1x32xf32, #tpu.memory_space<vmem>>, vector<1x1x32xf32>
    %627 = vector.shape_cast %626 : vector<1x1x32xf32> to vector<1x32xf32>
    %628 = vector.broadcast %627 : vector<1x32xf32> to vector<32x32xf32>
    %629 = arith.addf %621, %628 : vector<32x32xf32>
    %c11_627 = arith.constant 11 : index
    %c0_628 = arith.constant 0 : index
    %c0_629 = arith.constant 0 : index
    %630 = vector.load %arg5[%c11_627, %c0_628, %c0_629] : memref<12x1x32xf32, #tpu.memory_space<vmem>>, vector<1x1x32xf32>
    %631 = vector.shape_cast %630 : vector<1x1x32xf32> to vector<1x32xf32>
    %632 = vector.broadcast %631 : vector<1x32xf32> to vector<32x32xf32>
    %633 = arith.addf %625, %632 : vector<32x32xf32>
    %634 = arith.negf %629 : vector<32x32xf32>
    %635 = math.exp %634 : vector<32x32xf32>
    %cst_630 = arith.constant 1.000000e+00 : f32
    %636 = vector.broadcast %cst_630 : f32 to vector<32x32xf32>
    %637 = arith.addf %636, %635 : vector<32x32xf32>
    %638 = arith.divf %636, %637 : vector<32x32xf32>
    %c0_631 = arith.constant 0 : index
    %c5_632 = arith.constant 5 : index
    %c0_633 = arith.constant 0 : index
    %639 = vector.load %arg7[%c0_631, %c5_632, %c0_633] : memref<2x26x32xf32, #tpu.memory_space<vmem>>, vector<2x16x32xf32>
    %640 = vector.shape_cast %639 : vector<2x16x32xf32> to vector<32x32xf32>
    %641 = arith.mulf %638, %640 : vector<32x32xf32>
    %cst_634 = arith.constant 1.000000e+00 : f32
    %642 = vector.broadcast %cst_634 : f32 to vector<32x32xf32>
    %643 = arith.subf %642, %638 : vector<32x32xf32>
    %644 = arith.mulf %643, %633 : vector<32x32xf32>
    %645 = arith.addf %641, %644 : vector<32x32xf32>
    %646 = vector.shape_cast %645 : vector<32x32xf32> to vector<2x16x32xf32>
    %647 = vector.broadcast %25 : vector<2x16x1xf32> to vector<2x16x32xf32>
    %648 = arith.mulf %646, %647 : vector<2x16x32xf32>
    %c0_635 = arith.constant 0 : index
    %c0_636 = arith.constant 0 : index
    %c0_637 = arith.constant 0 : index
    %649 = vector.load %arg6[%c0_635, %c0_636, %c0_637] : memref<2x16x32xf32, #tpu.memory_space<vmem>>, vector<2x16x32xf32>
    tpu.vector_store %arg6[%c0_635, %c0_636, %c0_637], %648 {strides = array<i32>} : memref<2x16x32xf32, #tpu.memory_space<vmem>>, vector<2x16x32xf32>,
    return
  }
  func.func @transform_0(%arg0: i32, %arg1: memref<4xi32, #tpu.memory_space<smem>>) -> (i32, i32, i32) {
    %c0_i32 = arith.constant 0 : i32
    %c0_i32_0 = arith.constant 0 : i32
    %c0_i32_1 = arith.constant 0 : i32
    return %arg0, %c0_i32, %c0_i32_0 : i32, i32, i32
  }
  func.func @transform_1(%arg0: i32, %arg1: memref<4xi32, #tpu.memory_space<smem>>) -> (i32, i32, i32, i32) {
    %c0_i32 = arith.constant 0 : i32
    %c0_i32_0 = arith.constant 0 : i32
    %c0_i32_1 = arith.constant 0 : i32
    %c0_i32_2 = arith.constant 0 : i32
    %c0_i32_3 = arith.constant 0 : i32
    return %c0_i32, %c0_i32_0, %c0_i32_1, %c0_i32_2 : i32, i32, i32, i32
  }
  func.func @transform_2(%arg0: i32, %arg1: memref<4xi32, #tpu.memory_space<smem>>) -> (i32, i32, i32) {
    %c0_i32 = arith.constant 0 : i32
    %c0_i32_0 = arith.constant 0 : i32
    %c0_i32_1 = arith.constant 0 : i32
    %c0_i32_2 = arith.constant 0 : i32
    return %c0_i32, %c0_i32_0, %c0_i32_1 : i32, i32, i32
  }
  func.func @transform_3(%arg0: i32, %arg1: memref<4xi32, #tpu.memory_space<smem>>) -> (i32, i32, i32) {
    %c0_i32 = arith.constant 0 : i32
    %c0_i32_0 = arith.constant 0 : i32
    %c0_i32_1 = arith.constant 0 : i32
    %c0_i32_2 = arith.constant 0 : i32
    return %c0_i32, %c0_i32_0, %c0_i32_1 : i32, i32, i32
  }
  func.func @transform_4(%arg0: i32, %arg1: memref<4xi32, #tpu.memory_space<smem>>) -> (i32, i32, i32) {
    %c0_i32 = arith.constant 0 : i32
    %c0_i32_0 = arith.constant 0 : i32
    %c0_i32_1 = arith.constant 0 : i32
    return %arg0, %c0_i32, %c0_i32_0 : i32, i32, i32
  }
}

</mosaic_0001>

<bundles_post_ra>
// kernel: tpu_custom_call.1
= control target key start
LH: loop header
LB: loop body
LE: loop exit
PB: predicated region body
PF: predicated region fallthrough
CT: control target
= control target key end

     0   :  { %s10875_s18 = smov [#allocation4]   ;;  %s11876_s0 = inlined_call_operand.hbm [shape: s32[4], index: 0, kind: input, shape index: {}]   ;;  %s11877_s1 = inlined_call_operand.hbm [shape: f32[4,16,32], index: 1, kind: input, shape index: {}]   ;;  %s11878_s2 = inlined_call_operand.hbm [shape: f32[12,6,32,32], index: 2, kind: input, shape index: {}]   ;;  %s11879_s3 = inlined_call_operand.hbm [shape: f32[12,1,32], index: 3, kind: input, shape index: {}]   ;;  %s11880_s4 = inlined_call_operand.hbm [shape: f32[12,1,32], index: 4, kind: input, shape index: {}]   ;;  %s11881_s5 = inlined_call_operand.hbm [shape: f32[4,16,32], index: 5, kind: output, shape index: {}]  }
   0x1   :  { %11 = dma.hbm_to_smem %s11876_s0, 16, %s10875_s18, [#allocation3] }
   0x2   :  { %10841 = dma.done.wait [#allocation3], 16 }
   0x3   :  { %10842 = vsyncadd [#allocation3], 4294967280 }
   0x4   :  { %13 = sfence }
   0x5   :  { %14 = vsyncpa [#allocation6], 0 }
   0x6   :  { %16 = vsyncpa [#allocation6 + $0x1], 0 }
   0x7   :  { %17 = vsyncpa [#allocation9], 0 }
   0x8   :  { %18 = vsyncpa [#allocation12], 0 }
   0x9   :  { %19 = vsyncpa [#allocation7], 0 }
   0xa   :  { %21 = vsyncpa [#allocation7 + $0x1], 0  ;;  %s10921_s21 = smov 0   ;;  %s10923_s22 = smov 0  }
   0xb   :  { %s10925_s23 = smov 0   ;;  %s10927_s24 = smov 0  }
   0xc LB: > { %s10942_s0 = sadd.s32 4294967295, %s10873_s24   ;;  %s8433_s25 = sadd.s32 4294967294, %s10873_s24   ;;  %s10873_s24 = sphi %s10927_s24, %s11904_s24   ;;  %s10869_s23 = sphi %s10925_s23, %s11903_s23   ;;  %s10865_s22 = sphi %s10923_s22, %s11902_s22   ;;  %s10861_s21 = sphi %s10921_s21, %s11901_s21  }
   0xd   : > { %p47_p0 = scmp.ne.s32.totalorder %s10865_s22, %s10861_s21  ;;  %p11882_p1 = scmp.eq.s32.totalorder %s10942_s0, 0 }
   0xe   : > { %p134_p2 = scmp.eq.s32.totalorder %s10942_s0, 1  ;;  %p140_p3 = scmp.eq.s32.totalorder %s8433_s25, 1 }
   0xf   : > { %p10951_p4 = por %p11882_p1, %p47_p0  ;;  %p8434_p5 = scmp.ge.s32.totalorder %s10873_s24, 1 }
  0x10   : > { %p10956_p6 = por %p140_p3, %p47_p0  ;;  %p147_p7 = scmp.lt.s32.totalorder %s10873_s24, 3 }
  0x11   : > { %s11886_s26 = scalar_select %p10951_p4, 1, 0 }
  0x12   : > { %s11887_s27 = scalar_select %p10956_p6, 1, 0 }
  0x13   : > { %p10961_p8 = pnand %p8434_p5, %p147_p7  ;;  %s10876_s29 = smov [#allocation8]  }
  0x14   : > { %s159_s30 = sshll.u32 %s10876_s29, 4  ;;  %s10877_s7 = smov [#allocation10]   ;;  %s160_s30 = int_to_ptr.vmem [resolvable:$true] %s159_s30 }
  0x15   : > { %s11888_s28 = scalar_select %p10961_p8, 1, 0 }
  0x16   : > { %p10424_p9 = pneg %p10961_p8  ;;  %s172_s8 = sshll.u32 %s10877_s7, 4  ;;  %s173_s8 = int_to_ptr.vmem [resolvable:$true] %s172_s8 }
  0x17   : > { %s10704_s9 = scalar_lea.vmem %s160_s30, 36864  ;;  %p10712_p5 = scmp.lt.s32.totalorder %s160_s30, %s160_s30 }
  0x18   : > { %p10970_p11 = pnand %p10424_p9, %p11882_p1  ;;  %p10705_p13 = scmp.ne.s32.totalorder %s160_s30, %s10704_s9 }
  0x19   : > { %p10713_p7 = scmp.lt.s32.totalorder %s10704_s9, %s10704_s9 }
  0x1a   : > { %p10695_p12 = pneg %p10970_p11 }
  0x1b   : > { %p10714_p10 = por %p10713_p7, %p10712_p5 }
  0x1c   : > { %p10707_p0 = pnand %p10705_p13, %p10695_p12 }
  0x1e   : > { %p10708_p3 = pneg %p10707_p0 }
  0x20   : > { %p10715_p9 = pnand %p10714_p10, %p10708_p3 }
  0x22   : > { %10718 = shalt.err (!%p10715_p9)
}
  0x23   : > { %s10878_s10 = smov 128   ;;  %s10879_s11 = smov 8  }
  0x24   : > { %10427 = dma.hbm_to_vmem [thread:$0]  (!%p10970_p11), %s11878_s2, 36864, %s160_s30, [#allocation9], %s10878_s10, %s10878_s10, %s10879_s11  }
  0x25   : > { %s10730_s14 = scalar_lea.vmem %s173_s8, 192  ;;  %p10738_p10 = scmp.lt.s32.totalorder %s173_s8, %s173_s8 }
  0x26   : > { %p10731_p13 = scmp.ne.s32.totalorder %s173_s8, %s10730_s14  ;;  %p10739_p3 = scmp.lt.s32.totalorder %s10730_s14, %s10730_s14 }
  0x28   : > { %p10733_p0 = pnand %p10731_p13, %p10695_p12  ;;  %p10740_p7 = por %p10739_p3, %p10738_p10 }
  0x2a   : > { %p10734_p5 = pneg %p10733_p0 }
  0x2c   : > { %p10741_p9 = pnand %p10740_p7, %p10734_p5 }
  0x2e   : > { %10744 = shalt.err (!%p10741_p9)
}
  0x2f   : > { %s10880_s15 = smov 16   ;;  %s10881_s16 = smov 1  }
  0x30   : > { %10430 = dma.hbm_to_vmem [thread:$0]  (!%p10970_p11), %s11879_s3, 192, %s173_s8, [#allocation9], %s10880_s15, %s10880_s15, %s10881_s16  }
  0x31   : > { %s10882_s19 = smov [#allocation11]   ;;  %s10996_s25 = sadd.s32 1, %s10873_s24  }
  0x32   : > { %s185_s20 = sshll.u32 %s10882_s19, 4  ;;  %s186_s20 = int_to_ptr.vmem [resolvable:$true] %s185_s20 }
  0x33   : > { %s10756_s29 = scalar_lea.vmem %s186_s20, 192  ;;  %p10764_p10 = scmp.lt.s32.totalorder %s186_s20, %s186_s20 }
  0x34   : > { %p10757_p13 = scmp.ne.s32.totalorder %s186_s20, %s10756_s29  ;;  %p10765_p3 = scmp.lt.s32.totalorder %s10756_s29, %s10756_s29 }
  0x36   : > { %p10759_p0 = pnand %p10757_p13, %p10695_p12  ;;  %p10766_p7 = por %p10765_p3, %p10764_p10 }
  0x38   : > { %p10760_p5 = pneg %p10759_p0 }
  0x3a   : > { %p10767_p9 = pnand %p10766_p7, %p10760_p5 }
  0x3c   : > { %10770 = shalt.err (!%p10767_p9)
}
  0x3d   : > { %10433 = dma.hbm_to_vmem [thread:$0]  (!%p10970_p11), %s11880_s4, 192, %s186_s20, [#allocation12], %s10880_s15, %s10880_s15, %s10881_s16  }
  0x3e   : > { %s31_s8 = ssub.s32 %s10873_s24, %s10996_s25  ;;  %s34_s9 = sadd.s32 1, %s10869_s23 }
  0x3f   : > { %p32_p12 = scmp.eq.s32.totalorder %s31_s8, 0  ;;  %p41_p13 = scmp.ne.s32.totalorder %s10869_s23, %s10865_s22 }
  0x40   : > { %p42_p0 = scmp.eq.s32.totalorder %s10873_s24, 0  ;;  %p10445_p5 = scmp.lt.s32.totalorder %s10873_s24, 2 }
  0x41   : > { %s11014_s6 = scalar_select %p32_p12, %s10869_s23, %s34_s9  }
  0x42   : > { %p43_p10 = por %p42_p0, %p41_p13  ;;  %p11018_p3 = por %p134_p2, %p41_p13 }
  0x43   : > { %s199_s13 = sand.u32 1, %s10869_s23   ;;  %s8821_s14 = sshll.u32 %s10873_s24, 9 }
  0x44   : > { %s11890_s12 = scalar_select %p11018_p3, 1, 0 }
  0x45   : > { %s8439_s17 = sshll.u32 %s199_s13, 5  ;;  %s11027_s15 = scalar_lea.hbm %s11877_s1, %s8821_s14 }
  0x46   : > { %s203_s16 = scalar_lea.vmem [#allocation5], %s8439_s17  ;;  %p11029_p11 = pnand %p10445_p5, %p43_p10 }
  0x47   : > { %s211_s20 = sshll.u32 %s203_s16, 4  ;;  %s11035_s30 = scalar_lea.sflag [#allocation6], %s199_s13  ;;  %s11033_s20 = int_to_ptr.vmem [resolvable:$true] %s211_s20 }
  0x48   : > { %s10771_s7 = scalar_lea.hbm %s11027_s15, 512  ;;  %p10773_p7 = pneg %p11029_p11 }
  0x49   : > { %p10772_p2 = scmp.ne.s32.totalorder %s11027_s15, %s10771_s7  ;;  %s10776_s14 = scalar_lea.hbm %s11877_s1, 1024 }
  0x4a   : > { %p10777_p13 = scmp.lt.s32.totalorder %s11027_s15, %s11877_s1  ;;  %p10778_p0 = scmp.lt.s32.totalorder %s10776_s14, %s10771_s7 }
  0x4b   : > { %p10774_p9 = pnand %p10773_p7, %p10772_p2 }
  0x4c   : > { %p10779_p5 = por %p10778_p0, %p10777_p13 }
  0x4d   : > { %p10775_p12 = pneg %p10774_p9 }
  0x4f   : > { %p10780_p10 = pnand %p10779_p5, %p10775_p12 }
  0x51   : > { %10783 = shalt.err (!%p10780_p10)
}
  0x52   : > { %s10784_s13 = scalar_lea.vmem %s11033_s20, 512  ;;  %s10883_s19 = smov [#allocation5]  }
  0x53   : > { %p10785_p1 = scmp.ne.s32.totalorder %s11033_s20, %s10784_s13  ;;  %s10789_s16 = sshll.u32 %s10883_s19, 4  ;;  %s10790_s16 = int_to_ptr.vmem [resolvable:$false] %s10789_s16 }
  0x54   : > { %s10791_s8 = scalar_lea.vmem %s10790_s16, 1024  ;;  %p10792_p9 = scmp.lt.s32.totalorder %s11033_s20, %s10790_s16 }
  0x55   : > { %p10787_p6 = pnand %p10785_p1, %p10773_p7  ;;  %p10793_p3 = scmp.lt.s32.totalorder %s10791_s8, %s10784_s13 }
  0x57   : > { %p10788_p2 = pneg %p10787_p6  ;;  %p10794_p4 = por %p10793_p3, %p10792_p9 }
  0x59   : > { %p10795_p8 = pnand %p10794_p4, %p10788_p2 }
  0x5b   : > { %10798 = shalt.err (!%p10795_p8)
}
  0x5c   : > { %10437 = dma.hbm_to_vmem [thread:$0]  (!%p11029_p11), %s11027_s15, 512, %s11033_s20, %s11035_s30, %s10878_s10, %s10878_s10, %s10879_s11  }
  0x5d   : > { %p11892_p1 = scmp.ne.s32.totalorder %s11888_s28, 0 }
  0x5e   : > { %s11062_s7 = sand.u32 (!%p11892_p1), 1, %s10865_s22   ;;  %p11893_p4 = scmp.ne.s32.totalorder (!%p11892_p1), %s11886_s26, 0 }
  0x5f   : > { %223 = sbr.rel (%p11892_p1) target bundleno = 3381 (0xd35), region = 36  ;;  %s8444_s9 = sshll.u32 (!%p11892_p1), %s11062_s7, 5 }
  0x60   : > { %s226_s14 = scalar_lea.sflag (!%p11892_p1), [#allocation6], %s11062_s7  ;;  %s11068_s29 = scalar_lea.vmem (!%p11892_p1), [#allocation5], %s8444_s9 }
  0x64   : > { %10844 = dma.done.wait (%p11893_p4), %s226_s14, 512  }
  0x65   : > { %10846 = vsyncadd (%p11893_p4), %s226_s14, 4294966784  ;;  %p11894_p6 = scmp.eq.s32.totalorder %s10942_s0, 0 }
  0x67   : > { %10848 = dma.done.wait (%p11894_p6), [#allocation9], 37056   ;;  %p11895_p8 = pmov %p11894_p6 }
  0x68   : > { %p11896_p3 = pmov %p11894_p6 }
  0x69   : > { %10850 = vsyncadd (%p11895_p8), [#allocation9], 4294930240 }
  0x6a   : > { %10852 = dma.done.wait (%p11896_p3), [#allocation12], 192   ;;  %p11897_p11 = pmov %p11896_p3 }
  0x6b   : > { %vm268_vm0 = vcmask 258048   ;;  %v10884_v0 = vmov 0.0   ;;  %v324_v1 = vld [vmem:[#allocation8 + $0x18] sm:$0xff]  ;;  %v323_v3 = vld [vmem:[#allocation8 + $0x10] sm:$0xff]  ;;  %vm277_vm1 = vcmask 261120   ;;  %v322_v5 = vld [vmem:[#allocation8 + $0x8] sm:$0xff] }
  0x6c   : > { %10854 = vsyncadd (%p11897_p11), [#allocation12], 4294967104  ;;  %269 = vst.msk [vmem:[#allocation2] sm:$0x1f] %vm268_vm0, %v10884_v0  ;;  %v311_v2 = vld [vmem:[#allocation8 + $0x38] sm:$0xff]  ;;  %9400 = vmatprep.subr.mxu0 %v324_v1  ;;  %v310_v4 = vld [vmem:[#allocation8 + $0x30] sm:$0xff] }
  0x6d   : > { %270 = vst.msk [vmem:[#allocation2 + $0x20] sm:$0x1f] %vm268_vm0, %v10884_v0  ;;  %271 = vst.msk [vmem:[#allocation2 + $0x15] sm:$0x1f] %vm268_vm0, %v10884_v0  ;;  %9414 = vmatprep.subr.mxu1 %v311_v2  ;;  %9401 = vmatpush3.msra.mxu0 %v324_v1  ;;  %v309_v6 = vld [vmem:[#allocation8 + $0x28] sm:$0xff]  ;;  %v273_v7 = vld [vmem:[%s11068_s29] sm:$0xff] }
  0x6e   : > { %272 = vst.msk [vmem:[#allocation2 + $0x35] sm:$0x1f] %vm268_vm0, %v10884_v0  ;;  %9415 = vmatpush3.msra.mxu1 %v311_v2  ;;  %9402 = vmatprep.subr.mxu0 %v323_v3  ;;  %v274_v8 = vld [vmem:[%s11068_s29 + $0x8] sm:$0xff]  ;;  %v321_v9 = vld [vmem:[#allocation8] sm:$0xff]  ;;  %v275_v11 = vld [vmem:[%s11068_s29 + $0x10] sm:$0xff]  ;;  %s8449_s26 = sshll.u32 %s10942_s0, 1 }
  0x6f   : > { %9416 = vmatprep.subr.mxu1 %v310_v4  ;;  %278 = vst.msk [vmem:[#allocation2 + $0x5] sm:$0xff] %vm277_vm1, %v273_v7  ;;  %9403 = vmatpush3.msra.mxu0 %v323_v3  ;;  %v308_v10 = vld [vmem:[#allocation8 + $0x20] sm:$0xff]  ;;  %279 = vst.msk [vmem:[#allocation2 + $0xd] sm:$0xff] %vm277_vm1, %v274_v8  ;;  %v276_v12 = vld [vmem:[%s11068_s29 + $0x18] sm:$0xff]  ;;  %s286_s28 = sld [smem:[#allocation4 + %s8449_s26]]  ;;  %s288_s10 = sadd.s32 1, %s8449_s26 }
  0x70   : > { %9417 = vmatpush3.msra.mxu1 %v310_v4  ;;  %9404 = vmatprep.subr.mxu0 %v322_v5  ;;  %280 = vst.msk [vmem:[#allocation2 + $0x25] sm:$0xff] %vm277_vm1, %v275_v11  ;;  %v523_v13 = vld [vmem:[#allocation8 + $0x78] sm:$0xff]  ;;  %281 = vst.msk [vmem:[#allocation2 + $0x2d] sm:$0xff] %vm277_vm1, %v276_v12  ;;  %v522_v17 = vld [vmem:[#allocation8 + $0x70] sm:$0xff]  ;;  %s11143_s11 = sld [smem:[#allocation4 + %s288_s10]]  ;;  %s265_s15 = scalar_lea.vmem [#allocation13], %s8444_s9 }
  0x71   : > { %9418 = vmatprep.subr.mxu1 %v309_v6  ;;  %9405 = vmatpush3.msra.mxu0 %v322_v5  ;;  %v316_v14 = vld [vmem:[#allocation8 + $0x98] sm:$0xff]  ;;  %v315_v20 = vld [vmem:[#allocation8 + $0x90] sm:$0xff]  ;;  %v521_v23 = vld [vmem:[#allocation8 + $0x68] sm:$0xff]  ;;  %s8823_s20 = sshll.u32 %s10942_s0, 9  ;;  %s8331_s30 = sshll.u32 %s265_s15, 4  ;;  %s11830_s30 = int_to_ptr.vmem [resolvable:$true] %s8331_s30 }
  0x72   : > { %9419 = vmatpush3.msra.mxu1 %v309_v6  ;;  %9406 = vmatprep.subr.mxu0 %v321_v9  ;;  %v314_v26 = vld [vmem:[#allocation8 + $0x88] sm:$0xff]  ;;  %v520_v27 = vld [vmem:[#allocation8 + $0x60] sm:$0xff]  ;;  %v702_v29 = vld [vmem:[#allocation8 + $0x58] sm:$0xff]  ;;  %s11828_s13 = scalar_lea.hbm %s11881_s5, %s8823_s20  ;;  %s8317_s0 = scalar_lea.sflag [#allocation7], %s11062_s7 }
  0x73   : > { %9420 = vmatprep.subr.mxu1 %v308_v10  ;;  %9407 = vmatpush3.msra.mxu0 %v321_v9  ;;  %v313_v28 = vld [vmem:[#allocation8 + $0x80] sm:$0xff]  ;;  %v808_v30 = vld [vmem:[#allocation8 + $0xb8] sm:$0xff]  ;;  %v701_v31 = vld [vmem:[#allocation8 + $0x50] sm:$0xff]  ;;  %s10799_s19 = scalar_lea.vmem %s11830_s30, 512  ;;  %p11898_p12 = scmp.ne.s32.totalorder %s11890_s12, 0 }
  0x74   : > { %9421 = vmatpush3.msra.mxu1 %v308_v10  ;;  %9428 = vmatprep.subr.mxu0 %v523_v13  ;;  %v807_v32 = vld [vmem:[#allocation8 + $0xb0] sm:$0xff]  ;;  %v700_v33 = vld [vmem:[#allocation8 + $0x48] sm:$0xff]  ;;  %v699_v35 = vld [vmem:[#allocation8 + $0x40] sm:$0xff]  ;;  %p10800_p7 = scmp.ne.s32.totalorder %s11830_s30, %s10799_s19  ;;  %s10885_s16 = smov [#allocation13]  }
  0x75   : > { %9442 = vmatprep.subr.mxu1 %v316_v14  ;;  %v806_v34 = vld [vmem:[#allocation8 + $0xa8] sm:$0xff]  ;;  %v805_v37 = vld [vmem:[#allocation8 + $0xa0] sm:$0xff]  ;;  %v990_v41 = vld [vmem:[#allocation8 + $0xd8] sm:$0xff]  ;;  %s10803_s8 = sshll.u32 %s10885_s16, 4  ;;  %s10804_s8 = int_to_ptr.vmem [resolvable:$false] %s10803_s8 }
  0x76   : > { %v317_v15 = vld [vmem:[#allocation2 + $0x4] sm:$0xff]  ;;  %v318_v18 = vld [vmem:[#allocation2 + $0xc] sm:$0xff]  ;;  %v976_v42 = vld [vmem:[#allocation8 + $0xf8] sm:$0xff]  ;;  %p10801_p13 = pnand %p10800_p7, %p11898_p12  ;;  %s10805_s9 = scalar_lea.vmem %s10804_s8, 1024 }
  0x77   : > { %v11094_v16 = vld [vmem:[#allocation2 + $0x5] sm:$0xff]  ;;  %9408 = vmatprep.mubr.msk.f32.mxu0 %vm277_vm1, %v317_v15  ;;  %v11099_v19 = vld [vmem:[#allocation2 + $0xd] sm:$0xff]  ;;  %v11134_v49 = vld [vmem:[#allocation8 + $0x138] sm:$0xff]  ;;  %p10806_p5 = scmp.lt.s32.totalorder %s11830_s30, %s10804_s8  ;;  %p10807_p10 = scmp.lt.s32.totalorder %s10805_s9, %s10799_s19 }
  0x78   : > { %9422 = vmatprep.mubr.msk.f32.mxu1 %vm277_vm1, %v11094_v16  ;;  %9409 = vmatmul.mubr.msk.f32.vlgmr.msra.gmra.mxu0 %vm277_vm1, %v318_v18  ;;  %v319_v21 = vld [vmem:[#allocation2 + $0x24] sm:$0xff]  ;;  %v320_v24 = vld [vmem:[#allocation2 + $0x2c] sm:$0xff]  ;;  %v11136_v50 = vld [vmem:[#allocation8 + $0x158] sm:$0xff]  ;;  %p10802_p0 = pneg %p10801_p13 }
  0x79   : > { %9423 = vmatmul.mubr.msk.f32.vlgmr.msra.gmra.mxu1 %vm277_vm1, %v11099_v19  ;;  %9429 = vmatpush3.msra.mxu0 %v523_v13  ;;  %v11104_v22 = vld [vmem:[#allocation2 + $0x25] sm:$0xff]  ;;  %v11107_v25 = vld [vmem:[#allocation2 + $0x2d] sm:$0xff]  ;;  %v8478_v1 = vld [vmem:[#allocation10] ss:$0 sm:$0xff]  ;;  %p10808_p2 = por %p10807_p10, %p10806_p5 }
  0x7a   : > { %9443 = vmatpush3.msra.mxu1 %v316_v14  ;;  %9430 = vmatprep.subr.mxu0 %v522_v17  ;;  %v694_v36 = vld [vmem:[#allocation2 + $0x6] sm:$0xff]  ;;  %v695_v38 = vld [vmem:[#allocation2 + $0xe] sm:$0xff] }
  0x7b   : > { %9444 = vmatprep.subr.mxu1 %v315_v20  ;;  %9431 = vmatpush3.msra.mxu0 %v522_v17  ;;  %v696_v39 = vld [vmem:[#allocation2 + $0x26] sm:$0xff]  ;;  %v697_v40 = vld [vmem:[#allocation2 + $0x2e] sm:$0xff]  ;;  %p10809_p9 = pnand %p10808_p2, %p10802_p0 }
  0x7c   : > { %9411 = vmatprep.mubr.msk.f32.mxu0 %vm277_vm1, %v319_v21  ;;  %9425 = vmatprep.mubr.msk.f32.mxu1 %vm277_vm1, %v11104_v22  ;;  %v989_v43 = vld [vmem:[#allocation8 + $0xd0] sm:$0xff]  ;;  %v988_v45 = vld [vmem:[#allocation8 + $0xc8] sm:$0xff]  ;;  %v987_v47 = vld [vmem:[#allocation8 + $0xc0] sm:$0xff] }
  0x7d   : > { %9432 = vmatprep.subr.mxu0 %v521_v23  ;;  %9445 = vmatpush3.msra.mxu1 %v315_v20  ;;  %v975_v44 = vld [vmem:[#allocation8 + $0xf0] sm:$0xff]  ;;  %v974_v46 = vld [vmem:[#allocation8 + $0xe8] sm:$0xff]  ;;  %v973_v48 = vld [vmem:[#allocation8 + $0xe0] sm:$0xff] }
  0x7e   : > { %9412 = vmatmul.mubr.msk.f32.gmra.mxu0 %vm277_vm1, %v320_v24  ;;  %9426 = vmatmul.mubr.msk.f32.gmra.mxu1 %vm277_vm1, %v11107_v25 }
  0x7f   : > { %9433 = vmatpush3.msra.mxu0 %v521_v23  ;;  %9446 = vmatprep.subr.mxu1 %v314_v26 }
  0x80   : > { %9434 = vmatprep.subr.mxu0 %v520_v27  ;;  %9447 = vmatpush3.msra.mxu1 %v314_v26 }
  0x81   : > { %9435 = vmatpush3.msra.mxu0 %v520_v27  ;;  %9448 = vmatprep.subr.mxu1 %v313_v28 }
  0x82   : > { %9436 = vmatprep.mubr.msk.f32.mxu0 %vm277_vm1, %v317_v15  ;;  %9449 = vmatpush3.msra.mxu1 %v313_v28 }
  0x83   : > { %9450 = vmatprep.mubr.msk.f32.mxu1 %vm277_vm1, %v11094_v16  ;;  %9456 = vmatprep.subr.mxu0 %v702_v29 }
  0x84   : > { %9437 = vmatmul.mubr.msk.f32.vlgmr.msra.gmra.mxu0 %vm277_vm1, %v318_v18  ;;  %9451 = vmatmul.mubr.msk.f32.vlgmr.msra.gmra.mxu1 %vm277_vm1, %v11099_v19 }
  0x85   : > { %9457 = vmatpush3.msra.mxu0 %v702_v29  ;;  %9470 = vmatprep.subr.mxu1 %v808_v30 }
  0x86   : > { %9458 = vmatprep.subr.mxu0 %v701_v31  ;;  %9471 = vmatpush3.msra.mxu1 %v808_v30 }
  0x87   : > { %9459 = vmatpush3.msra.mxu0 %v701_v31  ;;  %9472 = vmatprep.subr.mxu1 %v807_v32 }
  0x88   : > { %9439 = vmatprep.mubr.msk.f32.mxu0 %vm277_vm1, %v319_v21  ;;  %9453 = vmatprep.mubr.msk.f32.mxu1 %vm277_vm1, %v11104_v22 }
  0x89   : > { %9460 = vmatprep.subr.mxu0 %v700_v33  ;;  %9473 = vmatpush3.msra.mxu1 %v807_v32 }
  0x8a   : > { %9440 = vmatmul.mubr.msk.f32.gmra.mxu0 %vm277_vm1, %v320_v24  ;;  %9454 = vmatmul.mubr.msk.f32.gmra.mxu1 %vm277_vm1, %v11107_v25 }
  0x8b   : > { %9461 = vmatpush3.msra.mxu0 %v700_v33  ;;  %9474 = vmatprep.subr.mxu1 %v806_v34 }
  0x8c   : > { %9462 = vmatprep.subr.mxu0 %v699_v35  ;;  %9475 = vmatpush3.msra.mxu1 %v806_v34  ;;  %v283_v34 = vlaneseq }
  0x8d   : > { %9463 = vmatpush3.msra.mxu0 %v699_v35  ;;  %9476 = vmatprep.subr.mxu1 %v805_v37 }
  0x8e   : > { %9464 = vmatprep.mubr.msk.f32.mxu0 %vm277_vm1, %v694_v36  ;;  %9477 = vmatpush3.msra.mxu1 %v805_v37 }
  0x8f   : > { %9478 = vmatprep.mubr.msk.f32.mxu1 %vm277_vm1, %v694_v36  ;;  %9465 = vmatmul.mubr.msk.f32.vlgmr.msra.gmra.mxu0 %vm277_vm1, %v695_v38 }
  0x90   : > { %9479 = vmatmul.mubr.msk.f32.vlgmr.msra.gmra.mxu1 %vm277_vm1, %v695_v38  ;;  %9467 = vmatprep.mubr.msk.f32.mxu0 %vm277_vm1, %v696_v39 }
  0x91   : > { %9481 = vmatprep.mubr.msk.f32.mxu1 %vm277_vm1, %v696_v39  ;;  %9484 = vmatprep.subr.mxu0 %v990_v41  ;;  %v284_v39 = vshrl.u32 %v283_v34, 7 }
  0x92   : > { %9498 = vmatprep.subr.mxu1 %v976_v42  ;;  %9485 = vmatpush3.msra.mxu0 %v990_v41 }
  0x93   : > { %9468 = vmatmul.mubr.msk.f32.gmra.mxu0 %vm277_vm1, %v697_v40  ;;  %9499 = vmatpush3.msra.mxu1 %v976_v42 }
  0x94   : > { %9482 = vmatmul.mubr.msk.f32.gmra.mxu1 %vm277_vm1, %v697_v40  ;;  %9486 = vmatprep.subr.mxu0 %v989_v43 }
  0x95   : > { %9500 = vmatprep.subr.mxu1 %v975_v44  ;;  %9487 = vmatpush3.msra.mxu0 %v989_v43  ;;  %v285_v43 = vadd.s32 8, %v284_v39 }
  0x96   : > { %9501 = vmatpush3.msra.mxu1 %v975_v44  ;;  %9488 = vmatprep.subr.mxu0 %v988_v45 }
  0x97   : > { %9502 = vmatprep.subr.mxu1 %v974_v46  ;;  %9489 = vmatpush3.msra.mxu0 %v988_v45 }
  0x98   : > { %9503 = vmatpush3.msra.mxu1 %v974_v46  ;;  %9490 = vmatprep.subr.mxu0 %v987_v47 }
  0x99   : > { %9504 = vmatprep.subr.mxu1 %v973_v48  ;;  %9491 = vmatpush3.msra.mxu0 %v987_v47  ;;  %v287_v47 = vstv %s286_s28 }
  0x9a   : > { %9505 = vmatpush3.msra.mxu1 %v973_v48  ;;  %9512 = vmatprep.subr.mxu0 %v11134_v49  ;;  %v8479_v48 = vld [vmem:[#allocation11] ss:$0 sm:$0xff]  ;;  %vm292_vm2 = vcmp.lt.s32.totalorder %v285_v43, %v287_v47  ;;  %vm291_vm3 = vcmp.lt.s32.totalorder %v284_v39, %v287_v47 }
  0x9b   : > { %9526 = vmatprep.subr.mxu1 %v11136_v50 }
 0x138   : > { %v9410_v51 = vpop.f32.mrf.mxu0 }
 0x139   : > { %v9424_v56 = vpop.f32.mrf.mxu1 }
 0x13a   : > { %v403_v52 = vpop.f32.mrf.mxu0  ;;  %v506_v62 = vadd.f32 %v9424_v56, %v9410_v51 }
 0x13b   : > { %v500_v58 = vpop.f32.mrf.mxu1 }
 0x13c   : > { %v501_v2 = vadd.f32 %v500_v58, %v403_v52  ;;  %v290_v58 = vstv %s11143_s11 }
 0x13d   : > { %vm294_vm4 = vcmp.lt.s32.totalorder %v285_v43, %v290_v58  ;;  %vm293_vm5 = vcmp.lt.s32.totalorder %v284_v39, %v290_v58  ;;  %v1367_v39 = vld [vmem:[#allocation8 + $0x110] sm:$0xff]  ;;  %v1365_v43 = vld [vmem:[#allocation8 + $0x100] sm:$0xff]  ;;  %v1642_v58 = vld [vmem:[#allocation8 + $0x1a8] sm:$0xff] }
 0x13e   : > { %v9413_v53 = vpop.f32.mrf.mxu0  ;;  %v9427_v61 = vpop.f32.mrf.mxu1 }
 0x13f   : > { %v516_v6 = vadd.f32 %v9427_v61, %v9413_v53 }
 0x140   : > { %v413_v54 = vpop.f32.mrf.mxu0  ;;  %v510_v4 = vpop.f32.mrf.mxu1 }
 0x141   : > { %v511_v10 = vadd.f32 %v510_v4, %v413_v54 }
 0x144   : > { %v9438_v55 = vpop.f32.mrf.mxu0  ;;  %v9452_v20 = vpop.f32.mrf.mxu1 }
 0x145   : > { %v681_v41 = vadd.f32 %v9452_v20, %v9438_v55 }
 0x146   : > { %v590_v57 = vpop.f32.mrf.mxu0  ;;  %v675_v26 = vpop.f32.mrf.mxu1 }
 0x147   : > { %v676_v42 = vadd.f32 %v675_v26, %v590_v57 }
 0x14a   : > { %v9441_v59 = vpop.f32.mrf.mxu0  ;;  %v9455_v27 = vpop.f32.mrf.mxu1 }
 0x14b   : > { %v691_v46 = vadd.f32 %v9455_v27, %v9441_v59 }
 0x14c   : > { %v11140_v60 = vpop.f32.mrf.mxu0  ;;  %v685_v29 = vpop.f32.mrf.mxu1 }
 0x14f   : > { %v9466_v63 = vpop.f32.mrf.mxu0 }
 0x150   : > { %v801_v3 = vadd.f32 %v9466_v63, %v506_v62  ;;  %v9480_v35 = vpop.f32.mrf.mxu1  ;;  %v686_v63 = vadd.f32 %v685_v29, %v11140_v60  ;;  %v11153_v60 = vsel %vm291_vm3, 1.0, %v10884_v0  ;;  %v1188_v29 = vld [vmem:[#allocation8 + $0x130] sm:$0xff] }
 0x151   : > { %v781_v5 = vpop.f32.mrf.mxu0  ;;  %v895_v44 = vadd.f32 %v9480_v35, %v681_v41  ;;  %v979_v35 = vld [vmem:[#allocation8 + $0x148] sm:$0xff] }
 0x152   : > { %v906_v7 = vadd.f32 %v8478_v1, %v801_v3  ;;  %v800_v8 = vadd.f32 %v781_v5, %v501_v2  ;;  %v875_v40 = vpop.f32.mrf.mxu1  ;;  %v11149_v3 = vsel %vm292_vm2, 1.0, %v10884_v0  ;;  %v1366_v41 = vld [vmem:[#allocation8 + $0x108] sm:$0xff] }
 0x153   : > { %v9469_v9 = vpop.f32.mrf.mxu0  ;;  %v894_v51 = vadd.f32 %v875_v40, %v676_v42  ;;  %v917_v54 = vadd.f32 %v8479_v48, %v895_v44  ;;  %v1473_v40 = vld [vmem:[#allocation8 + $0x170] sm:$0xff]  ;;  %v1472_v42 = vld [vmem:[#allocation8 + $0x168] sm:$0xff] }
 0x154   : > { %v8481_v11 = vmul.f32 -1.442695, %v906_v7  ;;  %v905_v12 = vadd.f32 %v8478_v1, %v800_v8  ;;  %v803_v13 = vadd.f32 %v9469_v9, %v516_v6  ;;  %v9483_v45 = vpop.f32.mrf.mxu1 }
 0x155   : > { %v791_v14 = vpop.f32.mrf.mxu0  ;;  %v897_v53 = vadd.f32 %v9483_v45, %v691_v46  ;;  %v1471_v45 = vld [vmem:[#allocation8 + $0x160] sm:$0xff] }
 0x156   : > { %10493 = vpow2.f32 %v8481_v11  ;;  %v8480_v15 = vmul.f32 -1.442695, %v905_v12  ;;  %v908_v17 = vadd.f32 %v8478_v1, %v803_v13  ;;  %v802_v18 = vadd.f32 %v791_v14, %v511_v10  ;;  %v885_v61 = vpop.f32.mrf.mxu1 }
 0x157   : > { %v919_v4 = vadd.f32 %v8479_v48, %v897_v53  ;;  %v896_v5 = vadd.f32 %v885_v61, %v686_v63  ;;  %v11158_v14 = vsel %vm294_vm4, 1.0, %v10884_v0  ;;  %v1657_v53 = vld [vmem:[#allocation8 + $0x190] sm:$0xff]  ;;  %v1655_v61 = vld [vmem:[#allocation8 + $0x180] sm:$0xff]  ;;  %v11213_v63 = vld [vmem:[#allocation8 + $0x1f8] sm:$0xff] }
 0x158   : > { %10495 = vpow2.f32 %v8480_v15  ;;  %v8483_v21 = vmul.f32 -1.442695, %v908_v17  ;;  %v907_v23 = vadd.f32 %v8478_v1, %v802_v18  ;;  %v916_v1 = vadd.f32 %v8479_v48, %v894_v51  ;;  %v1658_v51 = vld [vmem:[#allocation8 + $0x198] sm:$0xff] }
 0x159   : > { %v918_v15 = vadd.f32 %v8479_v48, %v896_v5 }
 0x15a   : > { %10497 = vpow2.f32 %v8483_v21  ;;  %v8482_v24 = vmul.f32 -1.442695, %v907_v23 }
 0x15c   : > { %10499 = vpow2.f32 %v8482_v24 }
 0x163   : > { %v10494_v28 = vpop.eup %10493 }
 0x164   : > { %v933_v30 = vadd.f32 1.0, %v10494_v28 }
 0x165   : > { %v10496_v31 = vpop.eup %10495 }
 0x166   : > { %10501 = vrcp.f32 %v933_v30  ;;  %v932_v32 = vadd.f32 1.0, %v10496_v31  ;;  %v980_v30 = vld [vmem:[#allocation8 + $0x150] sm:$0xff]  ;;  %v1187_v31 = vld [vmem:[#allocation8 + $0x128] sm:$0xff] }
 0x167   : > { %v10498_v33 = vpop.eup %10497 }
 0x168   : > { %10503 = vrcp.f32 %v932_v32  ;;  %v935_v36 = vadd.f32 1.0, %v10498_v33 }
 0x169   : > { %v10500_v37 = vpop.eup %10499 }
 0x16a   : > { %10505 = vrcp.f32 %v935_v36  ;;  %v934_v38 = vadd.f32 1.0, %v10500_v37  ;;  %v1368_v37 = vld [vmem:[#allocation8 + $0x118] sm:$0xff] }
 0x16c   : > { %10507 = vrcp.f32 %v934_v38  ;;  %v1474_v38 = vld [vmem:[#allocation8 + $0x178] sm:$0xff] }
 0x173   : > { %v10502_v52 = vpop.eup %10501 }
 0x174   : > { %v949_v56 = vsub.f32 1.0, %v10502_v52  ;;  %v945_v55 = vmul.f32 %v10502_v52, %v11099_v19  ;;  %v1644_v52 = vld [vmem:[#allocation8 + $0x1b8] sm:$0xff] }
 0x175   : > { %v10504_v62 = vpop.eup %10503 }
 0x176   : > { %v953_v57 = vmul.f32 %v949_v56, %v917_v54  ;;  %v948_v2 = vsub.f32 1.0, %v10504_v62  ;;  %v944_v7 = vmul.f32 %v10504_v62, %v11094_v16  ;;  %v1643_v54 = vld [vmem:[#allocation8 + $0x1b0] sm:$0xff]  ;;  %v1656_v56 = vld [vmem:[#allocation8 + $0x188] sm:$0xff]  ;;  %v1641_v62 = vld [vmem:[#allocation8 + $0x1a0] sm:$0xff] }
 0x177   : > { %v10506_v59 = vpop.eup %10505 }
 0x178   : > { %v957_v6 = vadd.f32 %v953_v57, %v945_v55  ;;  %v952_v8 = vmul.f32 %v948_v2, %v916_v1  ;;  %v951_v9 = vsub.f32 1.0, %v10506_v59  ;;  %v947_v12 = vmul.f32 %v10506_v59, %v11107_v25  ;;  %v11215_v55 = vld [vmem:[#allocation8 + $0x218] sm:$0xff] }
 0x179   : > { %v10508_v10 = vpop.eup %10507  ;;  %v11166_v25 = vsel %vm293_vm5, 1.0, %v10884_v0 }
 0x17a   : > { %v961_v19 = vmul.f32 %v11149_v3, %v957_v6  ;;  %v956_v11 = vadd.f32 %v952_v8, %v944_v7  ;;  %v955_v13 = vmul.f32 %v951_v9, %v919_v4  ;;  %v950_v17 = vsub.f32 1.0, %v10508_v10 }
 0x17b   : > { %v946_v20 = vmul.f32 %v10508_v10, %v11104_v22 }
 0x17c   : > { %965 = vst.msk [vmem:[#allocation2 + $0xd] sm:$0xff] %vm277_vm1, %v961_v19  ;;  %v960_v16 = vmul.f32 %v11153_v60, %v956_v11  ;;  %v959_v18 = vadd.f32 %v955_v13, %v947_v12  ;;  %v954_v21 = vmul.f32 %v950_v17, %v918_v15  ;;  %v8508_v12 = vld [vmem:[#allocation10 + $0x1] ss:$0 sm:$0xff] }
 0x17e   : > { %964 = vst.msk [vmem:[#allocation2 + $0x5] sm:$0xff] %vm277_vm1, %v960_v16  ;;  %v963_v23 = vmul.f32 %v11158_v14, %v959_v18  ;;  %v958_v24 = vadd.f32 %v954_v21, %v946_v20 }
 0x180   : > { %967 = vst.msk [vmem:[#allocation2 + $0x2d] sm:$0xff] %vm277_vm1, %v963_v23  ;;  %v962_v26 = vmul.f32 %v11166_v25, %v958_v24 }
 0x182   : > { %966 = vst.msk [vmem:[#allocation2 + $0x25] sm:$0xff] %vm277_vm1, %v962_v26 }
 0x183   : > { %v11177_v0 = vld [vmem:[#allocation2 + $0xd] sm:$0xff] }
 0x184   : > { %v1361_v46 = vld [vmem:[#allocation2 + $0xf] sm:$0xff] }
 0x185   : > { %v983_v27 = vld [vmem:[#allocation2 + $0xb] sm:$0xff]  ;;  %v982_v28 = vld [vmem:[#allocation2 + $0x3] sm:$0xff] }
 0x186   : > { %9492 = vmatprep.mubr.msk.f32.mxu0 %vm277_vm1, %v982_v28  ;;  %v11172_v22 = vld [vmem:[#allocation2 + $0x5] sm:$0xff] }
 0x187   : > { %9506 = vmatprep.mubr.msk.f32.mxu1 %vm277_vm1, %v11172_v22  ;;  %9493 = vmatmul.mubr.msk.f32.vlgmr.msra.gmra.mxu0 %vm277_vm1, %v983_v27  ;;  %v11188_v36 = vld [vmem:[#allocation2 + $0x2d] sm:$0xff] }
 0x188   : > { %9507 = vmatmul.mubr.msk.f32.vlgmr.msra.gmra.mxu1 %vm277_vm1, %v11177_v0  ;;  %9513 = vmatpush3.msra.mxu0 %v11134_v49  ;;  %v1186_v49 = vld [vmem:[#allocation8 + $0x120] sm:$0xff]  ;;  %v1363_v48 = vld [vmem:[#allocation2 + $0x2f] sm:$0xff] }
 0x189   : > { %9514 = vmatprep.subr.mxu0 %v1188_v29  ;;  %9527 = vmatpush3.msra.mxu1 %v11136_v50  ;;  %v985_v32 = vld [vmem:[#allocation2 + $0x2b] sm:$0xff]  ;;  %v984_v33 = vld [vmem:[#allocation2 + $0x23] sm:$0xff] }
 0x18a   : > { %9515 = vmatpush3.msra.mxu0 %v1188_v29  ;;  %9528 = vmatprep.subr.mxu1 %v980_v30  ;;  %v11184_v34 = vld [vmem:[#allocation2 + $0x25] sm:$0xff] }
 0x18b   : > { %9495 = vmatprep.mubr.msk.f32.mxu0 %vm277_vm1, %v984_v33  ;;  %9516 = vmatprep.subr.mxu0 %v1187_v31  ;;  %v978_v50 = vld [vmem:[#allocation8 + $0x140] sm:$0xff] }
 0x18c   : > { %9509 = vmatprep.mubr.msk.f32.mxu1 %vm277_vm1, %v11184_v34  ;;  %9529 = vmatpush3.msra.mxu1 %v980_v30  ;;  %v1360_v44 = vld [vmem:[#allocation2 + $0x7] sm:$0xff] }
 0x18d   : > { %9496 = vmatmul.mubr.msk.f32.gmra.mxu0 %vm277_vm1, %v985_v32  ;;  %9510 = vmatmul.mubr.msk.f32.gmra.mxu1 %vm277_vm1, %v11188_v36  ;;  %v1362_v47 = vld [vmem:[#allocation2 + $0x27] sm:$0xff] }
 0x18e   : > { %9517 = vmatpush3.msra.mxu0 %v1187_v31  ;;  %9530 = vmatprep.subr.mxu1 %v979_v35 }
 0x18f   : > { %9518 = vmatprep.subr.mxu0 %v1186_v49  ;;  %9520 = vmatprep.mubr.msk.f32.mxu0 %vm277_vm1, %v982_v28 }
 0x190   : > { %9531 = vmatpush3.msra.mxu1 %v979_v35  ;;  %9534 = vmatprep.mubr.msk.f32.mxu1 %vm277_vm1, %v11172_v22 }
 0x191   : > { %9519 = vmatpush3.msra.mxu0 %v1186_v49  ;;  %9532 = vmatprep.subr.mxu1 %v978_v50 }
 0x192   : > { %9533 = vmatpush3.msra.mxu1 %v978_v50  ;;  %9540 = vmatprep.subr.mxu0 %v1368_v37 }
 0x193   : > { %9521 = vmatmul.mubr.msk.f32.vlgmr.msra.gmra.mxu0 %vm277_vm1, %v983_v27  ;;  %9535 = vmatmul.mubr.msk.f32.vlgmr.msra.gmra.mxu1 %vm277_vm1, %v11177_v0 }
 0x194   : > { %9541 = vmatpush3.msra.mxu0 %v1368_v37  ;;  %9554 = vmatprep.subr.mxu1 %v1474_v38 }
 0x195   : > { %9523 = vmatprep.mubr.msk.f32.mxu0 %vm277_vm1, %v984_v33  ;;  %9537 = vmatprep.mubr.msk.f32.mxu1 %vm277_vm1, %v11184_v34 }
 0x196   : > { %9542 = vmatprep.subr.mxu0 %v1367_v39  ;;  %9555 = vmatpush3.msra.mxu1 %v1474_v38 }
 0x197   : > { %9543 = vmatpush3.msra.mxu0 %v1367_v39  ;;  %9556 = vmatprep.subr.mxu1 %v1473_v40 }
 0x198   : > { %9544 = vmatprep.subr.mxu0 %v1366_v41  ;;  %9557 = vmatpush3.msra.mxu1 %v1473_v40 }
 0x199   : > { %9524 = vmatmul.mubr.msk.f32.gmra.mxu0 %vm277_vm1, %v985_v32  ;;  %9538 = vmatmul.mubr.msk.f32.gmra.mxu1 %vm277_vm1, %v11188_v36 }
 0x19a   : > { %9545 = vmatpush3.msra.mxu0 %v1366_v41  ;;  %9558 = vmatprep.subr.mxu1 %v1472_v42 }
 0x19b   : > { %9546 = vmatprep.subr.mxu0 %v1365_v43  ;;  %9548 = vmatprep.mubr.msk.f32.mxu0 %vm277_vm1, %v1360_v44 }
 0x19c   : > { %9559 = vmatpush3.msra.mxu1 %v1472_v42  ;;  %9562 = vmatprep.mubr.msk.f32.mxu1 %vm277_vm1, %v1360_v44 }
 0x19d   : > { %9547 = vmatpush3.msra.mxu0 %v1365_v43  ;;  %9560 = vmatprep.subr.mxu1 %v1471_v45 }
 0x19e   : > { %9561 = vmatpush3.msra.mxu1 %v1471_v45  ;;  %9549 = vmatmul.mubr.msk.f32.vlgmr.msra.gmra.mxu0 %vm277_vm1, %v1361_v46 }
 0x19f   : > { %9563 = vmatmul.mubr.msk.f32.vlgmr.msra.gmra.mxu1 %vm277_vm1, %v1361_v46  ;;  %9551 = vmatprep.mubr.msk.f32.mxu0 %vm277_vm1, %v1362_v47 }
 0x1a0   : > { %9565 = vmatprep.mubr.msk.f32.mxu1 %vm277_vm1, %v1362_v47  ;;  %9568 = vmatprep.subr.mxu0 %v1658_v51 }
 0x1a1   : > { %9582 = vmatprep.subr.mxu1 %v1644_v52  ;;  %9569 = vmatpush3.msra.mxu0 %v1658_v51 }
 0x1a2   : > { %9552 = vmatmul.mubr.msk.f32.gmra.mxu0 %vm277_vm1, %v1363_v48  ;;  %9583 = vmatpush3.msra.mxu1 %v1644_v52 }
 0x1a3   : > { %9566 = vmatmul.mubr.msk.f32.gmra.mxu1 %vm277_vm1, %v1363_v48  ;;  %9570 = vmatprep.subr.mxu0 %v1657_v53 }
 0x1a4   : > { %9584 = vmatprep.subr.mxu1 %v1643_v54  ;;  %9571 = vmatpush3.msra.mxu0 %v1657_v53 }
 0x1a5   : > { %9585 = vmatpush3.msra.mxu1 %v1643_v54  ;;  %9572 = vmatprep.subr.mxu0 %v1656_v56 }
 0x1a6   : > { %9586 = vmatprep.subr.mxu1 %v1642_v58  ;;  %9573 = vmatpush3.msra.mxu0 %v1656_v56 }
 0x1a7   : > { %9587 = vmatpush3.msra.mxu1 %v1642_v58  ;;  %9574 = vmatprep.subr.mxu0 %v1655_v61 }
 0x1a8   : > { %9588 = vmatprep.subr.mxu1 %v1641_v62  ;;  %9575 = vmatpush3.msra.mxu0 %v1655_v61  ;;  %v8509_v61 = vld [vmem:[#allocation11 + $0x1] ss:$0 sm:$0xff] }
 0x1a9   : > { %9589 = vmatpush3.msra.mxu1 %v1641_v62  ;;  %9596 = vmatprep.subr.mxu0 %v11213_v63 }
 0x1aa   : > { %9610 = vmatprep.subr.mxu1 %v11215_v55 }
 0x247   : > { %v9494_v57 = vpop.f32.mrf.mxu0 }
 0x248   : > { %v9508_v5 = vpop.f32.mrf.mxu1 }
 0x249   : > { %v1069_v1 = vpop.f32.mrf.mxu0  ;;  %v1172_v19 = vadd.f32 %v9508_v5, %v9494_v57 }
 0x24a   : > { %v1166_v7 = vpop.f32.mrf.mxu1 }
 0x24b   : > { %v1167_v13 = vadd.f32 %v1166_v7, %v1069_v1 }
 0x24d   : > { %v9497_v2 = vpop.f32.mrf.mxu0  ;;  %v9511_v10 = vpop.f32.mrf.mxu1 }
 0x24e   : > { %v1182_v18 = vadd.f32 %v9511_v10, %v9497_v2 }
 0x24f   : > { %v1079_v59 = vpop.f32.mrf.mxu0  ;;  %v1176_v17 = vpop.f32.mrf.mxu1 }
 0x250   : > { %v1177_v24 = vadd.f32 %v1176_v17, %v1079_v59 }
 0x253   : > { %v9522_v4 = vpop.f32.mrf.mxu0  ;;  %v9536_v33 = vpop.f32.mrf.mxu1 }
 0x254   : > { %v1347_v52 = vadd.f32 %v9536_v33, %v9522_v4 }
 0x255   : > { %v1256_v6 = vpop.f32.mrf.mxu0  ;;  %v1341_v37 = vpop.f32.mrf.mxu1 }
 0x256   : > { %v1342_v53 = vadd.f32 %v1341_v37, %v1256_v6  ;;  %v1855_v37 = vld [vmem:[#allocation8 + $0x1e8] sm:$0xff] }
 0x259   : > { %v9525_v8 = vpop.f32.mrf.mxu0  ;;  %v9539_v38 = vpop.f32.mrf.mxu1 }
 0x25a   : > { %v1357_v58 = vadd.f32 %v9539_v38, %v9525_v8 }
 0x25b   : > { %v1266_v9 = vpop.f32.mrf.mxu0  ;;  %v1351_v40 = vpop.f32.mrf.mxu1 }
 0x25c   : > { %v1352_v10 = vadd.f32 %v1351_v40, %v1266_v9 }
 0x25e   : > { %v9550_v11 = vpop.f32.mrf.mxu0 }
 0x25f   : > { %v1467_v15 = vadd.f32 %v9550_v11, %v1172_v19  ;;  %v9564_v45 = vpop.f32.mrf.mxu1 }
 0x260   : > { %v1447_v16 = vpop.f32.mrf.mxu0  ;;  %v1561_v54 = vadd.f32 %v9564_v45, %v1347_v52  ;;  %v2035_v45 = vld [vmem:[#allocation8 + $0x1d0] sm:$0xff] }
 0x261   : > { %v1573_v20 = vadd.f32 %v8508_v12, %v1467_v15  ;;  %v1466_v21 = vadd.f32 %v1447_v16, %v1167_v13  ;;  %v1541_v51 = vpop.f32.mrf.mxu1 }
 0x262   : > { %v9553_v23 = vpop.f32.mrf.mxu0  ;;  %v1560_v62 = vadd.f32 %v1541_v51, %v1342_v53  ;;  %v1585_v2 = vadd.f32 %v8509_v61, %v1561_v54  ;;  %v2033_v51 = vld [vmem:[#allocation8 + $0x1c0] sm:$0xff] }
 0x263   : > { %v8511_v26 = vmul.f32 -1.442695, %v1573_v20  ;;  %v1572_v27 = vadd.f32 %v8508_v12, %v1466_v21  ;;  %v1469_v28 = vadd.f32 %v9553_v23, %v1182_v18  ;;  %v9567_v56 = vpop.f32.mrf.mxu1  ;;  %v2139_v53 = vld [vmem:[#allocation8 + $0x220] sm:$0xff] }
 0x264   : > { %v1457_v29 = vpop.f32.mrf.mxu0  ;;  %v1563_v1 = vadd.f32 %v9567_v56, %v1357_v58 }
 0x265   : > { %10509 = vpow2.f32 %v8511_v26  ;;  %v8510_v30 = vmul.f32 -1.442695, %v1572_v27  ;;  %v1575_v31 = vadd.f32 %v8508_v12, %v1469_v28  ;;  %v1468_v32 = vadd.f32 %v1457_v29, %v1177_v24  ;;  %v1551_v5 = vpop.f32.mrf.mxu1 }
 0x266   : > { %v1587_v4 = vadd.f32 %v8509_v61, %v1563_v1  ;;  %v1562_v6 = vadd.f32 %v1551_v5, %v1352_v10  ;;  %v2311_v1 = vld [vmem:[#allocation8 + $0x270] sm:$0xff]  ;;  %v2323_v5 = vld [vmem:[#allocation8 + $0x240] sm:$0xff]  ;;  %v11273_v10 = vld [vmem:[#allocation8 + $0x2b8] sm:$0xff] }
 0x267   : > { %10511 = vpow2.f32 %v8510_v30  ;;  %v8513_v35 = vmul.f32 -1.442695, %v1575_v31  ;;  %v1574_v49 = vadd.f32 %v8508_v12, %v1468_v32  ;;  %v1584_v12 = vadd.f32 %v8509_v61, %v1560_v62  ;;  %v2312_v62 = vld [vmem:[#allocation8 + $0x278] sm:$0xff] }
 0x268   : > { %v1586_v26 = vadd.f32 %v8509_v61, %v1562_v6  ;;  %v2326_v61 = vld [vmem:[#allocation8 + $0x258] sm:$0xff] }
 0x269   : > { %10513 = vpow2.f32 %v8513_v35  ;;  %v8512_v50 = vmul.f32 -1.442695, %v1574_v49  ;;  %v1856_v49 = vld [vmem:[#allocation8 + $0x1f0] sm:$0xff] }
 0x26b   : > { %10515 = vpow2.f32 %v8512_v50  ;;  %v1648_v50 = vld [vmem:[#allocation8 + $0x210] sm:$0xff] }
 0x272   : > { %v10510_v39 = vpop.eup %10509 }
 0x273   : > { %v1601_v41 = vadd.f32 1.0, %v10510_v39 }
 0x274   : > { %v10512_v42 = vpop.eup %10511 }
 0x275   : > { %10517 = vrcp.f32 %v1601_v41  ;;  %v1600_v43 = vadd.f32 1.0, %v10512_v42  ;;  %v1647_v41 = vld [vmem:[#allocation8 + $0x208] sm:$0xff] }
 0x276   : > { %v10514_v44 = vpop.eup %10513 }
 0x277   : > { %10519 = vrcp.f32 %v1600_v43  ;;  %v1603_v46 = vadd.f32 1.0, %v10514_v44  ;;  %v2036_v43 = vld [vmem:[#allocation8 + $0x1d8] sm:$0xff] }
 0x278   : > { %v10516_v47 = vpop.eup %10515  ;;  %v2142_v44 = vld [vmem:[#allocation8 + $0x238] sm:$0xff] }
 0x279   : > { %10521 = vrcp.f32 %v1603_v46  ;;  %v1602_v48 = vadd.f32 1.0, %v10516_v47  ;;  %v2141_v46 = vld [vmem:[#allocation8 + $0x230] sm:$0xff]  ;;  %v2034_v47 = vld [vmem:[#allocation8 + $0x1c8] sm:$0xff] }
 0x27b   : > { %10523 = vrcp.f32 %v1602_v48  ;;  %v2140_v48 = vld [vmem:[#allocation8 + $0x228] sm:$0xff] }
 0x282   : > { %v10518_v57 = vpop.eup %10517 }
 0x283   : > { %v1617_v59 = vsub.f32 1.0, %v10518_v57  ;;  %v1613_v19 = vmul.f32 %v10518_v57, %v11177_v0  ;;  %v2325_v57 = vld [vmem:[#allocation8 + $0x250] sm:$0xff] }
 0x284   : > { %v10520_v7 = vpop.eup %10519 }
 0x285   : > { %v1621_v11 = vmul.f32 %v1617_v59, %v1585_v2  ;;  %v1616_v13 = vsub.f32 1.0, %v10520_v7  ;;  %v1612_v8 = vmul.f32 %v10520_v7, %v11172_v22  ;;  %v2324_v2 = vld [vmem:[#allocation8 + $0x248] sm:$0xff]  ;;  %v2309_v7 = vld [vmem:[#allocation8 + $0x260] sm:$0xff] }
 0x286   : > { %v10522_v15 = vpop.eup %10521  ;;  %v2310_v59 = vld [vmem:[#allocation8 + $0x268] sm:$0xff] }
 0x287   : > { %v1625_v17 = vadd.f32 %v1621_v11, %v1613_v19  ;;  %v1620_v16 = vmul.f32 %v1616_v13, %v1584_v12  ;;  %v1619_v18 = vsub.f32 1.0, %v10522_v15  ;;  %v1615_v24 = vmul.f32 %v10522_v15, %v11188_v36  ;;  %v11275_v19 = vld [vmem:[#allocation8 + $0x2d8] sm:$0xff] }
 0x288   : > { %v10524_v20 = vpop.eup %10523 }
 0x289   : > { %v1629_v21 = vmul.f32 %v11149_v3, %v1625_v17  ;;  %v1624_v23 = vadd.f32 %v1620_v16, %v1612_v8  ;;  %v1623_v9 = vmul.f32 %v1619_v18, %v1587_v4  ;;  %v1618_v0 = vsub.f32 1.0, %v10524_v20 }
 0x28a   : > { %v1614_v29 = vmul.f32 %v10524_v20, %v11184_v34 }
 0x28b   : > { %1633 = vst.msk [vmem:[#allocation2 + $0xd] sm:$0xff] %vm277_vm1, %v1629_v21  ;;  %v1628_v27 = vmul.f32 %v11153_v60, %v1624_v23  ;;  %v1627_v28 = vadd.f32 %v1623_v9, %v1615_v24  ;;  %v1622_v30 = vmul.f32 %v1618_v0, %v1586_v26  ;;  %v8538_v24 = vld [vmem:[#allocation10 + $0x2] ss:$0 sm:$0xff] }
 0x28d   : > { %1632 = vst.msk [vmem:[#allocation2 + $0x5] sm:$0xff] %vm277_vm1, %v1628_v27  ;;  %v1631_v22 = vmul.f32 %v11158_v14, %v1627_v28  ;;  %v1626_v31 = vadd.f32 %v1622_v30, %v1614_v29 }
 0x28f   : > { %1635 = vst.msk [vmem:[#allocation2 + $0x2d] sm:$0xff] %vm277_vm1, %v1631_v22  ;;  %v1630_v36 = vmul.f32 %v11166_v25, %v1626_v31 }
 0x291   : > { %1634 = vst.msk [vmem:[#allocation2 + $0x25] sm:$0xff] %vm277_vm1, %v1630_v36 }
 0x292   : > { %v11237_v34 = vld [vmem:[#allocation2 + $0xd] sm:$0xff] }
 0x293   : > { %v2029_v54 = vld [vmem:[#allocation2 + $0x12] sm:$0xff] }
 0x294   : > { %v1650_v32 = vld [vmem:[#allocation2] sm:$0xff]  ;;  %v1651_v33 = vld [vmem:[#allocation2 + $0x8] sm:$0xff] }
 0x295   : > { %9576 = vmatprep.mubr.msk.f32.mxu0 %vm277_vm1, %v1650_v32  ;;  %v11232_v35 = vld [vmem:[#allocation2 + $0x5] sm:$0xff] }
 0x296   : > { %9590 = vmatprep.mubr.msk.f32.mxu1 %vm277_vm1, %v11232_v35  ;;  %9577 = vmatmul.mubr.msk.f32.vlgmr.msra.gmra.mxu0 %vm277_vm1, %v1651_v33  ;;  %v11248_v42 = vld [vmem:[#allocation2 + $0x2d] sm:$0xff] }
 0x297   : > { %9591 = vmatmul.mubr.msk.f32.vlgmr.msra.gmra.mxu1 %vm277_vm1, %v11237_v34  ;;  %9597 = vmatpush3.msra.mxu0 %v11213_v63  ;;  %v1854_v63 = vld [vmem:[#allocation8 + $0x1e0] sm:$0xff]  ;;  %v2028_v52 = vld [vmem:[#allocation2 + $0xa] sm:$0xff]  ;;  %v2031_v58 = vld [vmem:[#allocation2 + $0x32] sm:$0xff] }
 0x298   : > { %9598 = vmatprep.subr.mxu0 %v1856_v49  ;;  %9611 = vmatpush3.msra.mxu1 %v11215_v55  ;;  %v1652_v38 = vld [vmem:[#allocation2 + $0x20] sm:$0xff]  ;;  %v1653_v39 = vld [vmem:[#allocation2 + $0x28] sm:$0xff] }
 0x299   : > { %9599 = vmatpush3.msra.mxu0 %v1856_v49  ;;  %9612 = vmatprep.subr.mxu1 %v1648_v50  ;;  %v11244_v40 = vld [vmem:[#allocation2 + $0x25] sm:$0xff] }
 0x29a   : > { %9579 = vmatprep.mubr.msk.f32.mxu0 %vm277_vm1, %v1652_v38  ;;  %9600 = vmatprep.subr.mxu0 %v1855_v37  ;;  %v1646_v55 = vld [vmem:[#allocation8 + $0x200] sm:$0xff]  ;;  %v2030_v56 = vld [vmem:[#allocation2 + $0x2a] sm:$0xff] }
 0x29b   : > { %9593 = vmatprep.mubr.msk.f32.mxu1 %vm277_vm1, %v11244_v40  ;;  %9613 = vmatpush3.msra.mxu1 %v1648_v50 }
 0x29c   : > { %9580 = vmatmul.mubr.msk.f32.gmra.mxu0 %vm277_vm1, %v1653_v39  ;;  %9594 = vmatmul.mubr.msk.f32.gmra.mxu1 %vm277_vm1, %v11248_v42 }
 0x29d   : > { %9601 = vmatpush3.msra.mxu0 %v1855_v37  ;;  %9614 = vmatprep.subr.mxu1 %v1647_v41 }
 0x29e   : > { %9602 = vmatprep.subr.mxu0 %v1854_v63  ;;  %9604 = vmatprep.mubr.msk.f32.mxu0 %vm277_vm1, %v1650_v32 }
 0x29f   : > { %9615 = vmatpush3.msra.mxu1 %v1647_v41  ;;  %9618 = vmatprep.mubr.msk.f32.mxu1 %vm277_vm1, %v11232_v35 }
 0x2a0   : > { %9603 = vmatpush3.msra.mxu0 %v1854_v63  ;;  %9616 = vmatprep.subr.mxu1 %v1646_v55 }
 0x2a1   : > { %9617 = vmatpush3.msra.mxu1 %v1646_v55  ;;  %9624 = vmatprep.subr.mxu0 %v2036_v43 }
 0x2a2   : > { %9605 = vmatmul.mubr.msk.f32.vlgmr.msra.gmra.mxu0 %vm277_vm1, %v1651_v33  ;;  %9619 = vmatmul.mubr.msk.f32.vlgmr.msra.gmra.mxu1 %vm277_vm1, %v11237_v34 }
 0x2a3   : > { %9625 = vmatpush3.msra.mxu0 %v2036_v43  ;;  %9638 = vmatprep.subr.mxu1 %v2142_v44 }
 0x2a4   : > { %9607 = vmatprep.mubr.msk.f32.mxu0 %vm277_vm1, %v1652_v38  ;;  %9621 = vmatprep.mubr.msk.f32.mxu1 %vm277_vm1, %v11244_v40 }
 0x2a5   : > { %9626 = vmatprep.subr.mxu0 %v2035_v45  ;;  %9639 = vmatpush3.msra.mxu1 %v2142_v44 }
 0x2a6   : > { %9627 = vmatpush3.msra.mxu0 %v2035_v45  ;;  %9640 = vmatprep.subr.mxu1 %v2141_v46 }
 0x2a7   : > { %9628 = vmatprep.subr.mxu0 %v2034_v47  ;;  %9641 = vmatpush3.msra.mxu1 %v2141_v46 }
 0x2a8   : > { %9608 = vmatmul.mubr.msk.f32.gmra.mxu0 %vm277_vm1, %v1653_v39  ;;  %9622 = vmatmul.mubr.msk.f32.gmra.mxu1 %vm277_vm1, %v11248_v42 }
 0x2a9   : > { %9629 = vmatpush3.msra.mxu0 %v2034_v47  ;;  %9642 = vmatprep.subr.mxu1 %v2140_v48 }
 0x2aa   : > { %9630 = vmatprep.subr.mxu0 %v2033_v51  ;;  %9632 = vmatprep.mubr.msk.f32.mxu0 %vm277_vm1, %v2028_v52 }
 0x2ab   : > { %9643 = vmatpush3.msra.mxu1 %v2140_v48  ;;  %9646 = vmatprep.mubr.msk.f32.mxu1 %vm277_vm1, %v2028_v52 }
 0x2ac   : > { %9631 = vmatpush3.msra.mxu0 %v2033_v51  ;;  %9644 = vmatprep.subr.mxu1 %v2139_v53 }
 0x2ad   : > { %9645 = vmatpush3.msra.mxu1 %v2139_v53  ;;  %9633 = vmatmul.mubr.msk.f32.vlgmr.msra.gmra.mxu0 %vm277_vm1, %v2029_v54 }
 0x2ae   : > { %9647 = vmatmul.mubr.msk.f32.vlgmr.msra.gmra.mxu1 %vm277_vm1, %v2029_v54  ;;  %9635 = vmatprep.mubr.msk.f32.mxu0 %vm277_vm1, %v2030_v56 }
 0x2af   : > { %9649 = vmatprep.mubr.msk.f32.mxu1 %vm277_vm1, %v2030_v56  ;;  %9652 = vmatprep.subr.mxu0 %v2326_v61 }
 0x2b0   : > { %9666 = vmatprep.subr.mxu1 %v2312_v62  ;;  %9653 = vmatpush3.msra.mxu0 %v2326_v61 }
 0x2b1   : > { %9636 = vmatmul.mubr.msk.f32.gmra.mxu0 %vm277_vm1, %v2031_v58  ;;  %9667 = vmatpush3.msra.mxu1 %v2312_v62 }
 0x2b2   : > { %9650 = vmatmul.mubr.msk.f32.gmra.mxu1 %vm277_vm1, %v2031_v58  ;;  %9654 = vmatprep.subr.mxu0 %v2325_v57 }
 0x2b3   : > { %9668 = vmatprep.subr.mxu1 %v2311_v1  ;;  %9655 = vmatpush3.msra.mxu0 %v2325_v57 }
 0x2b4   : > { %9669 = vmatpush3.msra.mxu1 %v2311_v1  ;;  %9656 = vmatprep.subr.mxu0 %v2324_v2 }
 0x2b5   : > { %9670 = vmatprep.subr.mxu1 %v2310_v59  ;;  %9657 = vmatpush3.msra.mxu0 %v2324_v2 }
 0x2b6   : > { %9671 = vmatpush3.msra.mxu1 %v2310_v59  ;;  %9658 = vmatprep.subr.mxu0 %v2323_v5 }
 0x2b7   : > { %9672 = vmatprep.subr.mxu1 %v2309_v7  ;;  %9659 = vmatpush3.msra.mxu0 %v2323_v5  ;;  %v8539_v5 = vld [vmem:[#allocation11 + $0x2] ss:$0 sm:$0xff] }
 0x2b8   : > { %9673 = vmatpush3.msra.mxu1 %v2309_v7  ;;  %9680 = vmatprep.subr.mxu0 %v11273_v10 }
 0x2b9   : > { %9694 = vmatprep.subr.mxu1 %v11275_v19 }
 0x356   : > { %v9578_v11 = vpop.f32.mrf.mxu0 }
 0x357   : > { %v9592_v6 = vpop.f32.mrf.mxu1 }
 0x358   : > { %v1737_v12 = vpop.f32.mrf.mxu0  ;;  %v1840_v21 = vadd.f32 %v9592_v6, %v9578_v11 }
 0x359   : > { %v1834_v8 = vpop.f32.mrf.mxu1 }
 0x35a   : > { %v1835_v9 = vadd.f32 %v1834_v8, %v1737_v12 }
 0x35c   : > { %v9581_v13 = vpop.f32.mrf.mxu0  ;;  %v9595_v20 = vpop.f32.mrf.mxu1 }
 0x35d   : > { %v1850_v28 = vadd.f32 %v9595_v20, %v9581_v13 }
 0x35e   : > { %v1747_v15 = vpop.f32.mrf.mxu0  ;;  %v1844_v0 = vpop.f32.mrf.mxu1 }
 0x35f   : > { %v1845_v31 = vadd.f32 %v1844_v0, %v1747_v15 }
 0x362   : > { %v9606_v4 = vpop.f32.mrf.mxu0  ;;  %v9620_v39 = vpop.f32.mrf.mxu1 }
 0x363   : > { %v2015_v62 = vadd.f32 %v9620_v39, %v9606_v4 }
 0x364   : > { %v1924_v17 = vpop.f32.mrf.mxu0  ;;  %v2009_v43 = vpop.f32.mrf.mxu1 }
 0x365   : > { %v2010_v57 = vadd.f32 %v2009_v43, %v1924_v17  ;;  %v2523_v43 = vld [vmem:[#allocation8 + $0x2a8] sm:$0xff] }
 0x368   : > { %v9609_v16 = vpop.f32.mrf.mxu0  ;;  %v9623_v44 = vpop.f32.mrf.mxu1 }
 0x369   : > { %v2025_v59 = vadd.f32 %v9623_v44, %v9609_v16 }
 0x36a   : > { %v1934_v18 = vpop.f32.mrf.mxu0  ;;  %v2019_v46 = vpop.f32.mrf.mxu1 }
 0x36b   : > { %v2020_v20 = vadd.f32 %v2019_v46, %v1934_v18 }
 0x36d   : > { %v9634_v23 = vpop.f32.mrf.mxu0 }
 0x36e   : > { %v2135_v26 = vadd.f32 %v9634_v23, %v1840_v21  ;;  %v9648_v53 = vpop.f32.mrf.mxu1 }
 0x36f   : > { %v2115_v27 = vpop.f32.mrf.mxu0  ;;  %v2229_v1 = vadd.f32 %v9648_v53, %v2015_v62  ;;  %v2703_v53 = vld [vmem:[#allocation8 + $0x290] sm:$0xff] }
 0x370   : > { %v2241_v29 = vadd.f32 %v8538_v24, %v2135_v26  ;;  %v2134_v30 = vadd.f32 %v2115_v27, %v1835_v9  ;;  %v2209_v61 = vpop.f32.mrf.mxu1 }
 0x371   : > { %v9637_v22 = vpop.f32.mrf.mxu0  ;;  %v2228_v7 = vadd.f32 %v2209_v61, %v2010_v57  ;;  %v2253_v13 = vadd.f32 %v8539_v5, %v2229_v1  ;;  %v2701_v61 = vld [vmem:[#allocation8 + $0x280] sm:$0xff] }
 0x372   : > { %v8541_v36 = vmul.f32 -1.442695, %v2241_v29  ;;  %v2240_v32 = vadd.f32 %v8538_v24, %v2134_v30  ;;  %v2137_v33 = vadd.f32 %v9637_v22, %v1850_v28  ;;  %v9651_v2 = vpop.f32.mrf.mxu1  ;;  %v2807_v57 = vld [vmem:[#allocation8 + $0x2e0] sm:$0xff] }
 0x373   : > { %v2125_v49 = vpop.f32.mrf.mxu0  ;;  %v2231_v12 = vadd.f32 %v9651_v2, %v2025_v59 }
 0x374   : > { %10525 = vpow2.f32 %v8541_v36  ;;  %v8540_v50 = vmul.f32 -1.442695, %v2240_v32  ;;  %v2243_v37 = vadd.f32 %v8538_v24, %v2137_v33  ;;  %v2136_v38 = vadd.f32 %v2125_v49, %v1845_v31  ;;  %v2219_v6 = vpop.f32.mrf.mxu1 }
 0x375   : > { %v2255_v4 = vadd.f32 %v8539_v5, %v2231_v12  ;;  %v2230_v17 = vadd.f32 %v2219_v6, %v2020_v20  ;;  %v2979_v12 = vld [vmem:[#allocation8 + $0x330] sm:$0xff]  ;;  %v2991_v6 = vld [vmem:[#allocation8 + $0x300] sm:$0xff]  ;;  %v11333_v20 = vld [vmem:[#allocation8 + $0x378] sm:$0xff] }
 0x376   : > { %10527 = vpow2.f32 %v8540_v50  ;;  %v8543_v41 = vmul.f32 -1.442695, %v2243_v37  ;;  %v2242_v63 = vadd.f32 %v8538_v24, %v2136_v38  ;;  %v2252_v24 = vadd.f32 %v8539_v5, %v2228_v7  ;;  %v2980_v7 = vld [vmem:[#allocation8 + $0x338] sm:$0xff] }
 0x377   : > { %v2254_v36 = vadd.f32 %v8539_v5, %v2230_v17  ;;  %v2994_v5 = vld [vmem:[#allocation8 + $0x318] sm:$0xff] }
 0x378   : > { %10529 = vpow2.f32 %v8543_v41  ;;  %v8542_v55 = vmul.f32 -1.442695, %v2242_v63  ;;  %v2524_v63 = vld [vmem:[#allocation8 + $0x2b0] sm:$0xff] }
 0x37a   : > { %10531 = vpow2.f32 %v8542_v55  ;;  %v2316_v55 = vld [vmem:[#allocation8 + $0x2d0] sm:$0xff] }
 0x381   : > { %v10526_v45 = vpop.eup %10525 }
 0x382   : > { %v2269_v47 = vadd.f32 1.0, %v10526_v45 }
 0x383   : > { %v10528_v48 = vpop.eup %10527 }
 0x384   : > { %10533 = vrcp.f32 %v2269_v47  ;;  %v2268_v51 = vadd.f32 1.0, %v10528_v48  ;;  %v2315_v47 = vld [vmem:[#allocation8 + $0x2c8] sm:$0xff]  ;;  %v2522_v48 = vld [vmem:[#allocation8 + $0x2a0] sm:$0xff] }
 0x385   : > { %v10530_v52 = vpop.eup %10529 }
 0x386   : > { %10535 = vrcp.f32 %v2268_v51  ;;  %v2271_v54 = vadd.f32 1.0, %v10530_v52  ;;  %v2704_v51 = vld [vmem:[#allocation8 + $0x298] sm:$0xff] }
 0x387   : > { %v10532_v56 = vpop.eup %10531  ;;  %v2810_v52 = vld [vmem:[#allocation8 + $0x2f8] sm:$0xff] }
 0x388   : > { %10537 = vrcp.f32 %v2271_v54  ;;  %v2270_v58 = vadd.f32 1.0, %v10532_v56  ;;  %v2809_v54 = vld [vmem:[#allocation8 + $0x2f0] sm:$0xff]  ;;  %v2702_v56 = vld [vmem:[#allocation8 + $0x288] sm:$0xff] }
 0x38a   : > { %10539 = vrcp.f32 %v2270_v58  ;;  %v2808_v58 = vld [vmem:[#allocation8 + $0x2e8] sm:$0xff] }
 0x391   : > { %v10534_v11 = vpop.eup %10533 }
 0x392   : > { %v2285_v15 = vsub.f32 1.0, %v10534_v11  ;;  %v2281_v21 = vmul.f32 %v10534_v11, %v11237_v34  ;;  %v2993_v11 = vld [vmem:[#allocation8 + $0x310] sm:$0xff] }
 0x393   : > { %v10536_v8 = vpop.eup %10535 }
 0x394   : > { %v2289_v23 = vmul.f32 %v2285_v15, %v2253_v13  ;;  %v2284_v9 = vsub.f32 1.0, %v10536_v8  ;;  %v2280_v16 = vmul.f32 %v10536_v8, %v11232_v35  ;;  %v2992_v13 = vld [vmem:[#allocation8 + $0x308] sm:$0xff]  ;;  %v2977_v8 = vld [vmem:[#allocation8 + $0x320] sm:$0xff] }
 0x395   : > { %v10538_v26 = vpop.eup %10537  ;;  %v2978_v15 = vld [vmem:[#allocation8 + $0x328] sm:$0xff] }
 0x396   : > { %v2293_v0 = vadd.f32 %v2289_v23, %v2281_v21  ;;  %v2288_v27 = vmul.f32 %v2284_v9, %v2252_v24  ;;  %v2287_v28 = vsub.f32 1.0, %v10538_v26  ;;  %v2283_v31 = vmul.f32 %v10538_v26, %v11248_v42  ;;  %v11335_v21 = vld [vmem:[#allocation8 + $0x398] sm:$0xff] }
 0x397   : > { %v10540_v29 = vpop.eup %10539 }
 0x398   : > { %v2297_v30 = vmul.f32 %v11149_v3, %v2293_v0  ;;  %v2292_v22 = vadd.f32 %v2288_v27, %v2280_v16  ;;  %v2291_v18 = vmul.f32 %v2287_v28, %v2255_v4  ;;  %v2286_v34 = vsub.f32 1.0, %v10540_v29 }
 0x399   : > { %v2282_v49 = vmul.f32 %v10540_v29, %v11244_v40 }
 0x39a   : > { %2301 = vst.msk [vmem:[#allocation2 + $0xd] sm:$0xff] %vm277_vm1, %v2297_v30  ;;  %v2296_v32 = vmul.f32 %v11153_v60, %v2292_v22  ;;  %v2295_v33 = vadd.f32 %v2291_v18, %v2283_v31  ;;  %v2290_v50 = vmul.f32 %v2286_v34, %v2254_v36  ;;  %v8568_v31 = vld [vmem:[#allocation10 + $0x3] ss:$0 sm:$0xff] }
 0x39c   : > { %2300 = vst.msk [vmem:[#allocation2 + $0x5] sm:$0xff] %vm277_vm1, %v2296_v32  ;;  %v2299_v35 = vmul.f32 %v11158_v14, %v2295_v33  ;;  %v2294_v37 = vadd.f32 %v2290_v50, %v2282_v49 }
 0x39e   : > { %2303 = vst.msk [vmem:[#allocation2 + $0x2d] sm:$0xff] %vm277_vm1, %v2299_v35  ;;  %v2298_v42 = vmul.f32 %v11166_v25, %v2294_v37 }
 0x3a0   : > { %2302 = vst.msk [vmem:[#allocation2 + $0x25] sm:$0xff] %vm277_vm1, %v2298_v42 }
 0x3a1   : > { %v11296_v40 = vld [vmem:[#allocation2 + $0xd] sm:$0xff] }
 0x3a2   : > { %v2697_v1 = vld [vmem:[#allocation2 + $0xe] sm:$0xff] }
 0x3a3   : > { %v2318_v38 = vld [vmem:[#allocation2 + $0x4] sm:$0xff]  ;;  %v2319_v41 = vld [vmem:[#allocation2 + $0xc] sm:$0xff] }
 0x3a4   : > { %v11291_v39 = vld [vmem:[#allocation2 + $0x5] sm:$0xff]  ;;  %9660 = vmatprep.mubr.msk.f32.mxu0 %vm277_vm1, %v2318_v38 }
 0x3a5   : > { %9674 = vmatprep.mubr.msk.f32.mxu1 %vm277_vm1, %v11291_v39  ;;  %9661 = vmatmul.mubr.msk.f32.vlgmr.msra.gmra.mxu0 %vm277_vm1, %v2319_v41  ;;  %v2696_v62 = vld [vmem:[#allocation2 + $0x6] sm:$0xff]  ;;  %v2699_v59 = vld [vmem:[#allocation2 + $0x2e] sm:$0xff] }
 0x3a6   : > { %9675 = vmatmul.mubr.msk.f32.vlgmr.msra.gmra.mxu1 %vm277_vm1, %v11296_v40  ;;  %9681 = vmatpush3.msra.mxu0 %v11273_v10  ;;  %v11309_v10 = vld [vmem:[#allocation2 + $0x2d] sm:$0xff] }
 0x3a7   : > { %9695 = vmatpush3.msra.mxu1 %v11275_v19  ;;  %9682 = vmatprep.subr.mxu0 %v2524_v63  ;;  %v2320_v44 = vld [vmem:[#allocation2 + $0x24] sm:$0xff]  ;;  %v2321_v46 = vld [vmem:[#allocation2 + $0x2c] sm:$0xff] }
 0x3a8   : > { %9696 = vmatprep.subr.mxu1 %v2316_v55  ;;  %9683 = vmatpush3.msra.mxu0 %v2524_v63  ;;  %v11303_v45 = vld [vmem:[#allocation2 + $0x25] sm:$0xff] }
 0x3a9   : > { %9697 = vmatpush3.msra.mxu1 %v2316_v55  ;;  %9663 = vmatprep.mubr.msk.f32.mxu0 %vm277_vm1, %v2320_v44  ;;  %v2314_v19 = vld [vmem:[#allocation8 + $0x2c0] sm:$0xff] }
 0x3aa   : > { %9677 = vmatprep.mubr.msk.f32.mxu1 %vm277_vm1, %v11303_v45  ;;  %9684 = vmatprep.subr.mxu0 %v2523_v43  ;;  %v2698_v2 = vld [vmem:[#allocation2 + $0x26] sm:$0xff] }
 0x3ab   : > { %9664 = vmatmul.mubr.msk.f32.gmra.mxu0 %vm277_vm1, %v2321_v46  ;;  %9678 = vmatmul.mubr.msk.f32.gmra.mxu1 %vm277_vm1, %v11309_v10 }
 0x3ac   : > { %9685 = vmatpush3.msra.mxu0 %v2523_v43  ;;  %9698 = vmatprep.subr.mxu1 %v2315_v47 }
 0x3ad   : > { %9686 = vmatprep.subr.mxu0 %v2522_v48  ;;  %9688 = vmatprep.mubr.msk.f32.mxu0 %vm277_vm1, %v2318_v38 }
 0x3ae   : > { %9699 = vmatpush3.msra.mxu1 %v2315_v47  ;;  %9702 = vmatprep.mubr.msk.f32.mxu1 %vm277_vm1, %v11291_v39 }
 0x3af   : > { %9687 = vmatpush3.msra.mxu0 %v2522_v48  ;;  %9700 = vmatprep.subr.mxu1 %v2314_v19 }
 0x3b0   : > { %9708 = vmatprep.subr.mxu0 %v2704_v51  ;;  %9701 = vmatpush3.msra.mxu1 %v2314_v19 }
 0x3b1   : > { %9689 = vmatmul.mubr.msk.f32.vlgmr.msra.gmra.mxu0 %vm277_vm1, %v2319_v41  ;;  %9703 = vmatmul.mubr.msk.f32.vlgmr.msra.gmra.mxu1 %vm277_vm1, %v11296_v40 }
 0x3b2   : > { %9709 = vmatpush3.msra.mxu0 %v2704_v51  ;;  %9722 = vmatprep.subr.mxu1 %v2810_v52 }
 0x3b3   : > { %9691 = vmatprep.mubr.msk.f32.mxu0 %vm277_vm1, %v2320_v44  ;;  %9705 = vmatprep.mubr.msk.f32.mxu1 %vm277_vm1, %v11303_v45 }
 0x3b4   : > { %9710 = vmatprep.subr.mxu0 %v2703_v53  ;;  %9723 = vmatpush3.msra.mxu1 %v2810_v52 }
 0x3b5   : > { %9711 = vmatpush3.msra.mxu0 %v2703_v53  ;;  %9724 = vmatprep.subr.mxu1 %v2809_v54 }
 0x3b6   : > { %9712 = vmatprep.subr.mxu0 %v2702_v56  ;;  %9725 = vmatpush3.msra.mxu1 %v2809_v54 }
 0x3b7   : > { %9692 = vmatmul.mubr.msk.f32.gmra.mxu0 %vm277_vm1, %v2321_v46  ;;  %9706 = vmatmul.mubr.msk.f32.gmra.mxu1 %vm277_vm1, %v11309_v10 }
 0x3b8   : > { %9713 = vmatpush3.msra.mxu0 %v2702_v56  ;;  %9726 = vmatprep.subr.mxu1 %v2808_v58 }
 0x3b9   : > { %9714 = vmatprep.subr.mxu0 %v2701_v61  ;;  %9716 = vmatprep.mubr.msk.f32.mxu0 %vm277_vm1, %v2696_v62 }
 0x3ba   : > { %9727 = vmatpush3.msra.mxu1 %v2808_v58  ;;  %9730 = vmatprep.mubr.msk.f32.mxu1 %vm277_vm1, %v2696_v62 }
 0x3bb   : > { %9715 = vmatpush3.msra.mxu0 %v2701_v61  ;;  %9728 = vmatprep.subr.mxu1 %v2807_v57 }
 0x3bc   : > { %9717 = vmatmul.mubr.msk.f32.vlgmr.msra.gmra.mxu0 %vm277_vm1, %v2697_v1  ;;  %9729 = vmatpush3.msra.mxu1 %v2807_v57 }
 0x3bd   : > { %9719 = vmatprep.mubr.msk.f32.mxu0 %vm277_vm1, %v2698_v2  ;;  %9731 = vmatmul.mubr.msk.f32.vlgmr.msra.gmra.mxu1 %vm277_vm1, %v2697_v1 }
 0x3be   : > { %9733 = vmatprep.mubr.msk.f32.mxu1 %vm277_vm1, %v2698_v2  ;;  %9736 = vmatprep.subr.mxu0 %v2994_v5 }
 0x3bf   : > { %9750 = vmatprep.subr.mxu1 %v2980_v7  ;;  %9737 = vmatpush3.msra.mxu0 %v2994_v5 }
 0x3c0   : > { %9720 = vmatmul.mubr.msk.f32.gmra.mxu0 %vm277_vm1, %v2699_v59  ;;  %9751 = vmatpush3.msra.mxu1 %v2980_v7 }
 0x3c1   : > { %9734 = vmatmul.mubr.msk.f32.gmra.mxu1 %vm277_vm1, %v2699_v59  ;;  %9738 = vmatprep.subr.mxu0 %v2993_v11 }
 0x3c2   : > { %9752 = vmatprep.subr.mxu1 %v2979_v12  ;;  %9739 = vmatpush3.msra.mxu0 %v2993_v11 }
 0x3c3   : > { %9753 = vmatpush3.msra.mxu1 %v2979_v12  ;;  %9740 = vmatprep.subr.mxu0 %v2992_v13 }
 0x3c4   : > { %9754 = vmatprep.subr.mxu1 %v2978_v15  ;;  %9741 = vmatpush3.msra.mxu0 %v2992_v13 }
 0x3c5   : > { %9755 = vmatpush3.msra.mxu1 %v2978_v15  ;;  %9742 = vmatprep.subr.mxu0 %v2991_v6  ;;  %v8569_v15 = vld [vmem:[#allocation11 + $0x3] ss:$0 sm:$0xff] }
 0x3c6   : > { %9756 = vmatprep.subr.mxu1 %v2977_v8  ;;  %9743 = vmatpush3.msra.mxu0 %v2991_v6 }
 0x3c7   : > { %9757 = vmatpush3.msra.mxu1 %v2977_v8  ;;  %9764 = vmatprep.subr.mxu0 %v11333_v20 }
 0x3c8   : > { %9778 = vmatprep.subr.mxu1 %v11335_v21 }
 0x465   : > { %v9662_v23 = vpop.f32.mrf.mxu0 }
 0x466   : > { %v9676_v17 = vpop.f32.mrf.mxu1 }
 0x467   : > { %v2405_v24 = vpop.f32.mrf.mxu0  ;;  %v2508_v29 = vadd.f32 %v9676_v17, %v9662_v23 }
 0x468   : > { %v2502_v16 = vpop.f32.mrf.mxu1 }
 0x469   : > { %v2503_v18 = vadd.f32 %v2502_v16, %v2405_v24 }
 0x46b   : > { %v9665_v9 = vpop.f32.mrf.mxu0  ;;  %v9679_v30 = vpop.f32.mrf.mxu1 }
 0x46c   : > { %v2518_v50 = vadd.f32 %v9679_v30, %v9665_v9 }
 0x46d   : > { %v2415_v26 = vpop.f32.mrf.mxu0  ;;  %v2512_v32 = vpop.f32.mrf.mxu1 }
 0x46e   : > { %v2513_v38 = vadd.f32 %v2512_v32, %v2415_v26 }
 0x471   : > { %v9690_v4 = vpop.f32.mrf.mxu0  ;;  %v9704_v46 = vpop.f32.mrf.mxu1 }
 0x472   : > { %v2683_v7 = vadd.f32 %v9704_v46, %v9690_v4 }
 0x473   : > { %v2592_v0 = vpop.f32.mrf.mxu0  ;;  %v2677_v51 = vpop.f32.mrf.mxu1 }
 0x474   : > { %v2678_v11 = vadd.f32 %v2677_v51, %v2592_v0  ;;  %v3191_v51 = vld [vmem:[#allocation8 + $0x368] sm:$0xff] }
 0x477   : > { %v9693_v27 = vpop.f32.mrf.mxu0  ;;  %v9707_v52 = vpop.f32.mrf.mxu1 }
 0x478   : > { %v2693_v23 = vadd.f32 %v9707_v52, %v9693_v27 }
 0x479   : > { %v2602_v28 = vpop.f32.mrf.mxu0  ;;  %v2687_v54 = vpop.f32.mrf.mxu1 }
 0x47a   : > { %v2688_v16 = vadd.f32 %v2687_v54, %v2602_v28 }
 0x47c   : > { %v9718_v22 = vpop.f32.mrf.mxu0 }
 0x47d   : > { %v2803_v36 = vadd.f32 %v9718_v22, %v2508_v29  ;;  %v9732_v57 = vpop.f32.mrf.mxu1 }
 0x47e   : > { %v2783_v34 = vpop.f32.mrf.mxu0  ;;  %v2897_v12 = vadd.f32 %v9732_v57, %v2683_v7  ;;  %v3371_v57 = vld [vmem:[#allocation8 + $0x350] sm:$0xff] }
 0x47f   : > { %v2909_v33 = vadd.f32 %v8568_v31, %v2803_v36  ;;  %v2802_v49 = vadd.f32 %v2783_v34, %v2503_v18  ;;  %v2877_v5 = vpop.f32.mrf.mxu1 }
 0x480   : > { %v9721_v35 = vpop.f32.mrf.mxu0  ;;  %v2896_v6 = vadd.f32 %v2877_v5, %v2678_v11  ;;  %v2921_v24 = vadd.f32 %v8569_v15, %v2897_v12  ;;  %v3369_v5 = vld [vmem:[#allocation8 + $0x340] sm:$0xff] }
 0x481   : > { %v8571_v37 = vmul.f32 -1.442695, %v2909_v33  ;;  %v2908_v42 = vadd.f32 %v8568_v31, %v2802_v49  ;;  %v2805_v41 = vadd.f32 %v9721_v35, %v2518_v50  ;;  %v9735_v13 = vpop.f32.mrf.mxu1  ;;  %v3475_v11 = vld [vmem:[#allocation8 + $0x3a0] sm:$0xff] }
 0x482   : > { %v2793_v63 = vpop.f32.mrf.mxu0  ;;  %v2899_v29 = vadd.f32 %v9735_v13, %v2693_v23  ;;  %v3661_v23 = vld [vmem:[#allocation8 + $0x3d0] sm:$0xff] }
 0x483   : > { %10541 = vpow2.f32 %v8571_v37  ;;  %v8570_v55 = vmul.f32 -1.442695, %v2908_v42  ;;  %v2911_v43 = vadd.f32 %v8568_v31, %v2805_v41  ;;  %v2804_v44 = vadd.f32 %v2793_v63, %v2513_v38  ;;  %v2887_v26 = vpop.f32.mrf.mxu1 }
 0x484   : > { %v2898_v36 = vadd.f32 %v2887_v26, %v2688_v16  ;;  %v2923_v33 = vadd.f32 %v8569_v15, %v2899_v29  ;;  %v3646_v26 = vld [vmem:[#allocation8 + $0x3e8] sm:$0xff]  ;;  %v3645_v16 = vld [vmem:[#allocation8 + $0x3e0] sm:$0xff]  ;;  %v11393_v29 = vld [vmem:[#allocation8 + $0x438] sm:$0xff] }
 0x485   : > { %10543 = vpow2.f32 %v8570_v55  ;;  %v8573_v47 = vmul.f32 -1.442695, %v2911_v43  ;;  %v2910_v48 = vadd.f32 %v8568_v31, %v2804_v44  ;;  %v2920_v31 = vadd.f32 %v8569_v15, %v2896_v6  ;;  %v3662_v6 = vld [vmem:[#allocation8 + $0x3d8] sm:$0xff] }
 0x486   : > { %v2922_v42 = vadd.f32 %v8569_v15, %v2898_v36 }
 0x487   : > { %10545 = vpow2.f32 %v8573_v47  ;;  %v8572_v19 = vmul.f32 -1.442695, %v2910_v48  ;;  %v3192_v48 = vld [vmem:[#allocation8 + $0x370] sm:$0xff] }
 0x489   : > { %10547 = vpow2.f32 %v8572_v19  ;;  %v2984_v19 = vld [vmem:[#allocation8 + $0x390] sm:$0xff] }
 0x490   : > { %v10542_v53 = vpop.eup %10541 }
 0x491   : > { %v2937_v56 = vadd.f32 1.0, %v10542_v53 }
 0x492   : > { %v10544_v58 = vpop.eup %10543 }
 0x493   : > { %10549 = vrcp.f32 %v2937_v56  ;;  %v2936_v61 = vadd.f32 1.0, %v10544_v58  ;;  %v2983_v56 = vld [vmem:[#allocation8 + $0x388] sm:$0xff]  ;;  %v3190_v58 = vld [vmem:[#allocation8 + $0x360] sm:$0xff] }
 0x494   : > { %v10546_v62 = vpop.eup %10545 }
 0x495   : > { %10551 = vrcp.f32 %v2936_v61  ;;  %v2939_v1 = vadd.f32 1.0, %v10546_v62  ;;  %v3372_v61 = vld [vmem:[#allocation8 + $0x358] sm:$0xff] }
 0x496   : > { %v10548_v2 = vpop.eup %10547  ;;  %v3478_v62 = vld [vmem:[#allocation8 + $0x3b8] sm:$0xff] }
 0x497   : > { %10553 = vrcp.f32 %v2939_v1  ;;  %v2938_v59 = vadd.f32 1.0, %v10548_v2  ;;  %v3477_v1 = vld [vmem:[#allocation8 + $0x3b0] sm:$0xff]  ;;  %v3370_v2 = vld [vmem:[#allocation8 + $0x348] sm:$0xff] }
 0x499   : > { %10555 = vrcp.f32 %v2938_v59  ;;  %v3476_v59 = vld [vmem:[#allocation8 + $0x3a8] sm:$0xff] }
 0x4a0   : > { %v10550_v8 = vpop.eup %10549 }
 0x4a1   : > { %v2953_v9 = vsub.f32 1.0, %v10550_v8  ;;  %v2949_v30 = vmul.f32 %v10550_v8, %v11296_v40  ;;  %v3648_v8 = vld [vmem:[#allocation8 + $0x3f8] sm:$0xff] }
 0x4a2   : > { %v10552_v17 = vpop.eup %10551 }
 0x4a3   : > { %v2957_v22 = vmul.f32 %v2953_v9, %v2921_v24  ;;  %v2952_v18 = vsub.f32 1.0, %v10552_v17  ;;  %v2948_v34 = vmul.f32 %v10552_v17, %v11291_v39  ;;  %v3647_v24 = vld [vmem:[#allocation8 + $0x3f0] sm:$0xff]  ;;  %v3660_v9 = vld [vmem:[#allocation8 + $0x3c8] sm:$0xff]  ;;  %v3659_v17 = vld [vmem:[#allocation8 + $0x3c0] sm:$0xff] }
 0x4a4   : > { %v10554_v4 = vpop.eup %10553 }
 0x4a5   : > { %v2961_v0 = vadd.f32 %v2957_v22, %v2949_v30  ;;  %v2956_v32 = vmul.f32 %v2952_v18, %v2920_v31  ;;  %v2955_v49 = vsub.f32 1.0, %v10554_v4  ;;  %v2951_v28 = vmul.f32 %v10554_v4, %v11309_v10  ;;  %v11395_v30 = vld [vmem:[#allocation8 + $0x458] sm:$0xff] }
 0x4a6   : > { %v10556_v27 = vpop.eup %10555 }
 0x4a7   : > { %v2965_v50 = vmul.f32 %v11149_v3, %v2961_v0  ;;  %v2960_v35 = vadd.f32 %v2956_v32, %v2948_v34  ;;  %v2959_v37 = vmul.f32 %v2955_v49, %v2923_v33  ;;  %v2954_v40 = vsub.f32 1.0, %v10556_v27 }
 0x4a8   : > { %v2950_v63 = vmul.f32 %v10556_v27, %v11303_v45 }
 0x4a9   : > { %2969 = vst.msk [vmem:[#allocation2 + $0xd] sm:$0xff] %vm277_vm1, %v2965_v50  ;;  %v2964_v38 = vmul.f32 %v11153_v60, %v2960_v35  ;;  %v2963_v41 = vadd.f32 %v2959_v37, %v2951_v28  ;;  %v2958_v39 = vmul.f32 %v2954_v40, %v2922_v42  ;;  %v8598_v28 = vld [vmem:[#allocation10 + $0x4] ss:$0 sm:$0xff] }
 0x4ab   : > { %2968 = vst.msk [vmem:[#allocation2 + $0x5] sm:$0xff] %vm277_vm1, %v2964_v38  ;;  %v2967_v55 = vmul.f32 %v11158_v14, %v2963_v41  ;;  %v2962_v43 = vadd.f32 %v2958_v39, %v2950_v63 }
 0x4ad   : > { %2971 = vst.msk [vmem:[#allocation2 + $0x2d] sm:$0xff] %vm277_vm1, %v2967_v55  ;;  %v2966_v10 = vmul.f32 %v11166_v25, %v2962_v43 }
 0x4af   : > { %2970 = vst.msk [vmem:[#allocation2 + $0x25] sm:$0xff] %vm277_vm1, %v2966_v10 }
 0x4b0   : > { %v11356_v45 = vld [vmem:[#allocation2 + $0xd] sm:$0xff] }
 0x4b1   : > { %v3365_v12 = vld [vmem:[#allocation2 + $0xf] sm:$0xff] }
 0x4b2   : > { %v2986_v44 = vld [vmem:[#allocation2 + $0x3] sm:$0xff]  ;;  %v2987_v47 = vld [vmem:[#allocation2 + $0xb] sm:$0xff] }
 0x4b3   : > { %v11351_v46 = vld [vmem:[#allocation2 + $0x5] sm:$0xff]  ;;  %9744 = vmatprep.mubr.msk.f32.mxu0 %vm277_vm1, %v2986_v44 }
 0x4b4   : > { %9758 = vmatprep.mubr.msk.f32.mxu1 %vm277_vm1, %v11351_v46  ;;  %9745 = vmatmul.mubr.msk.f32.vlgmr.msra.gmra.mxu0 %vm277_vm1, %v2987_v47  ;;  %v3364_v7 = vld [vmem:[#allocation2 + $0x7] sm:$0xff]  ;;  %v3367_v15 = vld [vmem:[#allocation2 + $0x2f] sm:$0xff] }
 0x4b5   : > { %9759 = vmatmul.mubr.msk.f32.vlgmr.msra.gmra.mxu1 %vm277_vm1, %v11356_v45  ;;  %9765 = vmatpush3.msra.mxu0 %v11333_v20  ;;  %v11369_v20 = vld [vmem:[#allocation2 + $0x2d] sm:$0xff] }
 0x4b6   : > { %9779 = vmatpush3.msra.mxu1 %v11335_v21  ;;  %9766 = vmatprep.subr.mxu0 %v3192_v48  ;;  %v2988_v52 = vld [vmem:[#allocation2 + $0x23] sm:$0xff]  ;;  %v2989_v54 = vld [vmem:[#allocation2 + $0x2b] sm:$0xff] }
 0x4b7   : > { %9780 = vmatprep.subr.mxu1 %v2984_v19  ;;  %9767 = vmatpush3.msra.mxu0 %v3192_v48  ;;  %v11363_v53 = vld [vmem:[#allocation2 + $0x25] sm:$0xff] }
 0x4b8   : > { %9781 = vmatpush3.msra.mxu1 %v2984_v19  ;;  %9747 = vmatprep.mubr.msk.f32.mxu0 %vm277_vm1, %v2988_v52  ;;  %v2982_v21 = vld [vmem:[#allocation8 + $0x380] sm:$0xff] }
 0x4b9   : > { %9761 = vmatprep.mubr.msk.f32.mxu1 %vm277_vm1, %v11363_v53  ;;  %9768 = vmatprep.subr.mxu0 %v3191_v51  ;;  %v3366_v13 = vld [vmem:[#allocation2 + $0x27] sm:$0xff] }
 0x4ba   : > { %9748 = vmatmul.mubr.msk.f32.gmra.mxu0 %vm277_vm1, %v2989_v54  ;;  %9762 = vmatmul.mubr.msk.f32.gmra.mxu1 %vm277_vm1, %v11369_v20 }
 0x4bb   : > { %9769 = vmatpush3.msra.mxu0 %v3191_v51  ;;  %9782 = vmatprep.subr.mxu1 %v2983_v56 }
 0x4bc   : > { %9770 = vmatprep.subr.mxu0 %v3190_v58  ;;  %9772 = vmatprep.mubr.msk.f32.mxu0 %vm277_vm1, %v2986_v44 }
 0x4bd   : > { %9783 = vmatpush3.msra.mxu1 %v2983_v56  ;;  %9786 = vmatprep.mubr.msk.f32.mxu1 %vm277_vm1, %v11351_v46 }
 0x4be   : > { %9771 = vmatpush3.msra.mxu0 %v3190_v58  ;;  %9784 = vmatprep.subr.mxu1 %v2982_v21 }
 0x4bf   : > { %9792 = vmatprep.subr.mxu0 %v3372_v61  ;;  %9785 = vmatpush3.msra.mxu1 %v2982_v21 }
 0x4c0   : > { %9773 = vmatmul.mubr.msk.f32.vlgmr.msra.gmra.mxu0 %vm277_vm1, %v2987_v47  ;;  %9787 = vmatmul.mubr.msk.f32.vlgmr.msra.gmra.mxu1 %vm277_vm1, %v11356_v45 }
 0x4c1   : > { %9793 = vmatpush3.msra.mxu0 %v3372_v61  ;;  %9806 = vmatprep.subr.mxu1 %v3478_v62 }
 0x4c2   : > { %9775 = vmatprep.mubr.msk.f32.mxu0 %vm277_vm1, %v2988_v52  ;;  %9789 = vmatprep.mubr.msk.f32.mxu1 %vm277_vm1, %v11363_v53 }
 0x4c3   : > { %9794 = vmatprep.subr.mxu0 %v3371_v57  ;;  %9807 = vmatpush3.msra.mxu1 %v3478_v62 }
 0x4c4   : > { %9795 = vmatpush3.msra.mxu0 %v3371_v57  ;;  %9808 = vmatprep.subr.mxu1 %v3477_v1 }
 0x4c5   : > { %9796 = vmatprep.subr.mxu0 %v3370_v2  ;;  %9809 = vmatpush3.msra.mxu1 %v3477_v1 }
 0x4c6   : > { %9776 = vmatmul.mubr.msk.f32.gmra.mxu0 %vm277_vm1, %v2989_v54  ;;  %9790 = vmatmul.mubr.msk.f32.gmra.mxu1 %vm277_vm1, %v11369_v20 }
 0x4c7   : > { %9797 = vmatpush3.msra.mxu0 %v3370_v2  ;;  %9810 = vmatprep.subr.mxu1 %v3476_v59 }
 0x4c8   : > { %9798 = vmatprep.subr.mxu0 %v3369_v5  ;;  %9800 = vmatprep.mubr.msk.f32.mxu0 %vm277_vm1, %v3364_v7 }
 0x4c9   : > { %9811 = vmatpush3.msra.mxu1 %v3476_v59  ;;  %9814 = vmatprep.mubr.msk.f32.mxu1 %vm277_vm1, %v3364_v7 }
 0x4ca   : > { %9799 = vmatpush3.msra.mxu0 %v3369_v5  ;;  %9812 = vmatprep.subr.mxu1 %v3475_v11 }
 0x4cb   : > { %9801 = vmatmul.mubr.msk.f32.vlgmr.msra.gmra.mxu0 %vm277_vm1, %v3365_v12  ;;  %9813 = vmatpush3.msra.mxu1 %v3475_v11 }
 0x4cc   : > { %9803 = vmatprep.mubr.msk.f32.mxu0 %vm277_vm1, %v3366_v13  ;;  %9815 = vmatmul.mubr.msk.f32.vlgmr.msra.gmra.mxu1 %vm277_vm1, %v3365_v12 }
 0x4cd   : > { %9817 = vmatprep.mubr.msk.f32.mxu1 %vm277_vm1, %v3366_v13  ;;  %9820 = vmatprep.subr.mxu0 %v3662_v6 }
 0x4ce   : > { %9834 = vmatprep.subr.mxu1 %v3648_v8  ;;  %9821 = vmatpush3.msra.mxu0 %v3662_v6 }
 0x4cf   : > { %9804 = vmatmul.mubr.msk.f32.gmra.mxu0 %vm277_vm1, %v3367_v15  ;;  %9835 = vmatpush3.msra.mxu1 %v3648_v8 }
 0x4d0   : > { %9818 = vmatmul.mubr.msk.f32.gmra.mxu1 %vm277_vm1, %v3367_v15  ;;  %9822 = vmatprep.subr.mxu0 %v3661_v23 }
 0x4d1   : > { %9836 = vmatprep.subr.mxu1 %v3647_v24  ;;  %9823 = vmatpush3.msra.mxu0 %v3661_v23 }
 0x4d2   : > { %9837 = vmatpush3.msra.mxu1 %v3647_v24  ;;  %9824 = vmatprep.subr.mxu0 %v3660_v9 }
 0x4d3   : > { %9838 = vmatprep.subr.mxu1 %v3646_v26  ;;  %9825 = vmatpush3.msra.mxu0 %v3660_v9 }
 0x4d4   : > { %9839 = vmatpush3.msra.mxu1 %v3646_v26  ;;  %9826 = vmatprep.subr.mxu0 %v3659_v17  ;;  %v8599_v26 = vld [vmem:[#allocation11 + $0x4] ss:$0 sm:$0xff] }
 0x4d5   : > { %9840 = vmatprep.subr.mxu1 %v3645_v16  ;;  %9827 = vmatpush3.msra.mxu0 %v3659_v17 }
 0x4d6   : > { %9841 = vmatpush3.msra.mxu1 %v3645_v16  ;;  %9848 = vmatprep.subr.mxu0 %v11393_v29 }
 0x4d7   : > { %9862 = vmatprep.subr.mxu1 %v11395_v30 }
 0x574   : > { %v9746_v22 = vpop.f32.mrf.mxu0 }
 0x575   : > { %v9760_v0 = vpop.f32.mrf.mxu1 }
 0x576   : > { %v3073_v31 = vpop.f32.mrf.mxu0  ;;  %v3176_v27 = vadd.f32 %v9760_v0, %v9746_v22 }
 0x577   : > { %v3170_v32 = vpop.f32.mrf.mxu1 }
 0x578   : > { %v3171_v37 = vadd.f32 %v3170_v32, %v3073_v31 }
 0x57a   : > { %v9749_v18 = vpop.f32.mrf.mxu0  ;;  %v9763_v50 = vpop.f32.mrf.mxu1 }
 0x57b   : > { %v3186_v39 = vadd.f32 %v9763_v50, %v9749_v18 }
 0x57c   : > { %v3083_v36 = vpop.f32.mrf.mxu0  ;;  %v3180_v38 = vpop.f32.mrf.mxu1 }
 0x57d   : > { %v3181_v44 = vadd.f32 %v3180_v38, %v3083_v36 }
 0x580   : > { %v9774_v4 = vpop.f32.mrf.mxu0  ;;  %v9788_v54 = vpop.f32.mrf.mxu1 }
 0x581   : > { %v3351_v8 = vadd.f32 %v9788_v54, %v9774_v4 }
 0x582   : > { %v3260_v34 = vpop.f32.mrf.mxu0  ;;  %v3345_v61 = vpop.f32.mrf.mxu1 }
 0x583   : > { %v3346_v23 = vadd.f32 %v3345_v61, %v3260_v34  ;;  %v3859_v61 = vld [vmem:[#allocation8 + $0x428] sm:$0xff] }
 0x586   : > { %v9777_v33 = vpop.f32.mrf.mxu0  ;;  %v9791_v62 = vpop.f32.mrf.mxu1 }
 0x587   : > { %v3361_v22 = vadd.f32 %v9791_v62, %v9777_v33 }
 0x588   : > { %v3270_v49 = vpop.f32.mrf.mxu0  ;;  %v3355_v1 = vpop.f32.mrf.mxu1 }
 0x589   : > { %v3356_v32 = vadd.f32 %v3355_v1, %v3270_v49 }
 0x58b   : > { %v9802_v35 = vpop.f32.mrf.mxu0 }
 0x58c   : > { %v3471_v42 = vadd.f32 %v9802_v35, %v3176_v27  ;;  %v9816_v11 = vpop.f32.mrf.mxu1 }
 0x58d   : > { %v3451_v40 = vpop.f32.mrf.mxu0  ;;  %v3565_v24 = vadd.f32 %v9816_v11, %v3351_v8  ;;  %v4039_v11 = vld [vmem:[#allocation8 + $0x410] sm:$0xff] }
 0x58e   : > { %v3577_v41 = vadd.f32 %v8598_v28, %v3471_v42  ;;  %v3470_v63 = vadd.f32 %v3451_v40, %v3171_v37  ;;  %v3545_v6 = vpop.f32.mrf.mxu1 }
 0x58f   : > { %v9805_v55 = vpop.f32.mrf.mxu0  ;;  %v3564_v17 = vadd.f32 %v3545_v6, %v3346_v23  ;;  %v3589_v31 = vadd.f32 %v8599_v26, %v3565_v24  ;;  %v4037_v6 = vld [vmem:[#allocation8 + $0x400] sm:$0xff] }
 0x590   : > { %v8601_v43 = vmul.f32 -1.442695, %v3577_v41  ;;  %v3576_v10 = vadd.f32 %v8598_v28, %v3470_v63  ;;  %v3473_v47 = vadd.f32 %v9805_v55, %v3186_v39  ;;  %v9819_v9 = vpop.f32.mrf.mxu1  ;;  %v4143_v23 = vld [vmem:[#allocation8 + $0x460] sm:$0xff] }
 0x591   : > { %v3461_v48 = vpop.f32.mrf.mxu0  ;;  %v3567_v27 = vadd.f32 %v9819_v9, %v3361_v22  ;;  %v4329_v22 = vld [vmem:[#allocation8 + $0x490] sm:$0xff] }
 0x592   : > { %10557 = vpow2.f32 %v8601_v43  ;;  %v8600_v19 = vmul.f32 -1.442695, %v3576_v10  ;;  %v3579_v51 = vadd.f32 %v8598_v28, %v3473_v47  ;;  %v3472_v52 = vadd.f32 %v3461_v48, %v3181_v44  ;;  %v3555_v36 = vpop.f32.mrf.mxu1 }
 0x593   : > { %v3566_v42 = vadd.f32 %v3555_v36, %v3356_v32  ;;  %v3591_v41 = vadd.f32 %v8599_v26, %v3567_v27  ;;  %v4314_v36 = vld [vmem:[#allocation8 + $0x4a8] sm:$0xff]  ;;  %v4313_v32 = vld [vmem:[#allocation8 + $0x4a0] sm:$0xff]  ;;  %v11453_v27 = vld [vmem:[#allocation8 + $0x4f8] sm:$0xff] }
 0x594   : > { %10559 = vpow2.f32 %v8600_v19  ;;  %v8603_v56 = vmul.f32 -1.442695, %v3579_v51  ;;  %v3578_v58 = vadd.f32 %v8598_v28, %v3472_v52  ;;  %v3588_v28 = vadd.f32 %v8599_v26, %v3564_v17  ;;  %v4330_v17 = vld [vmem:[#allocation8 + $0x498] sm:$0xff] }
 0x595   : > { %v3590_v10 = vadd.f32 %v8599_v26, %v3566_v42 }
 0x596   : > { %10561 = vpow2.f32 %v8603_v56  ;;  %v8602_v21 = vmul.f32 -1.442695, %v3578_v58  ;;  %v3860_v58 = vld [vmem:[#allocation8 + $0x430] sm:$0xff] }
 0x598   : > { %10563 = vpow2.f32 %v8602_v21  ;;  %v3652_v21 = vld [vmem:[#allocation8 + $0x450] sm:$0xff] }
 0x59f   : > { %v10558_v57 = vpop.eup %10557 }
 0x5a0   : > { %v3605_v2 = vadd.f32 1.0, %v10558_v57 }
 0x5a1   : > { %v10560_v59 = vpop.eup %10559 }
 0x5a2   : > { %10565 = vrcp.f32 %v3605_v2  ;;  %v3604_v5 = vadd.f32 1.0, %v10560_v59  ;;  %v3651_v2 = vld [vmem:[#allocation8 + $0x448] sm:$0xff]  ;;  %v3858_v59 = vld [vmem:[#allocation8 + $0x420] sm:$0xff] }
 0x5a3   : > { %v10562_v7 = vpop.eup %10561 }
 0x5a4   : > { %10567 = vrcp.f32 %v3604_v5  ;;  %v3607_v12 = vadd.f32 1.0, %v10562_v7  ;;  %v4040_v5 = vld [vmem:[#allocation8 + $0x418] sm:$0xff] }
 0x5a5   : > { %v10564_v13 = vpop.eup %10563  ;;  %v4146_v7 = vld [vmem:[#allocation8 + $0x478] sm:$0xff] }
 0x5a6   : > { %10569 = vrcp.f32 %v3607_v12  ;;  %v3606_v15 = vadd.f32 1.0, %v10564_v13  ;;  %v4145_v12 = vld [vmem:[#allocation8 + $0x470] sm:$0xff]  ;;  %v4038_v13 = vld [vmem:[#allocation8 + $0x408] sm:$0xff] }
 0x5a8   : > { %10571 = vrcp.f32 %v3606_v15  ;;  %v4144_v15 = vld [vmem:[#allocation8 + $0x468] sm:$0xff] }
 0x5af   : > { %v10566_v16 = vpop.eup %10565 }
 0x5b0   : > { %v3621_v18 = vsub.f32 1.0, %v10566_v16  ;;  %v3617_v50 = vmul.f32 %v10566_v16, %v11356_v45  ;;  %v4316_v16 = vld [vmem:[#allocation8 + $0x4b8] sm:$0xff] }
 0x5b1   : > { %v10568_v0 = vpop.eup %10567 }
 0x5b2   : > { %v3625_v35 = vmul.f32 %v3621_v18, %v3589_v31  ;;  %v3620_v37 = vsub.f32 1.0, %v10568_v0  ;;  %v3616_v40 = vmul.f32 %v10568_v0, %v11351_v46  ;;  %v4315_v31 = vld [vmem:[#allocation8 + $0x4b0] sm:$0xff]  ;;  %v4328_v18 = vld [vmem:[#allocation8 + $0x488] sm:$0xff]  ;;  %v4327_v0 = vld [vmem:[#allocation8 + $0x480] sm:$0xff] }
 0x5b3   : > { %v10570_v4 = vpop.eup %10569 }
 0x5b4   : > { %v3629_v34 = vadd.f32 %v3625_v35, %v3617_v50  ;;  %v3624_v38 = vmul.f32 %v3620_v37, %v3588_v28  ;;  %v3623_v63 = vsub.f32 1.0, %v10570_v4  ;;  %v3619_v49 = vmul.f32 %v10570_v4, %v11369_v20  ;;  %v11455_v50 = vld [vmem:[#allocation8 + $0x518] sm:$0xff] }
 0x5b5   : > { %v10572_v33 = vpop.eup %10571 }
 0x5b6   : > { %v3633_v39 = vmul.f32 %v11149_v3, %v3629_v34  ;;  %v3628_v55 = vadd.f32 %v3624_v38, %v3616_v40  ;;  %v3627_v43 = vmul.f32 %v3623_v63, %v3591_v41  ;;  %v3622_v45 = vsub.f32 1.0, %v10572_v33 }
 0x5b7   : > { %v3618_v48 = vmul.f32 %v10572_v33, %v11363_v53 }
 0x5b8   : > { %3637 = vst.msk [vmem:[#allocation2 + $0xd] sm:$0xff] %vm277_vm1, %v3633_v39  ;;  %v3632_v44 = vmul.f32 %v11153_v60, %v3628_v55  ;;  %v3631_v47 = vadd.f32 %v3627_v43, %v3619_v49  ;;  %v3626_v46 = vmul.f32 %v3622_v45, %v3590_v10  ;;  %v8628_v49 = vld [vmem:[#allocation10 + $0x5] ss:$0 sm:$0xff] }
 0x5ba   : > { %3636 = vst.msk [vmem:[#allocation2 + $0x5] sm:$0xff] %vm277_vm1, %v3632_v44  ;;  %v3635_v19 = vmul.f32 %v11158_v14, %v3631_v47  ;;  %v3630_v51 = vadd.f32 %v3626_v46, %v3618_v48 }
 0x5bc   : > { %3639 = vst.msk [vmem:[#allocation2 + $0x2d] sm:$0xff] %vm277_vm1, %v3635_v19  ;;  %v3634_v20 = vmul.f32 %v11166_v25, %v3630_v51 }
 0x5be   : > { %3638 = vst.msk [vmem:[#allocation2 + $0x25] sm:$0xff] %vm277_vm1, %v3634_v20 }
 0x5bf   : > { %v11416_v53 = vld [vmem:[#allocation2 + $0xd] sm:$0xff] }
 0x5c0   : > { %v4033_v24 = vld [vmem:[#allocation2 + $0x12] sm:$0xff] }
 0x5c1   : > { %v3654_v52 = vld [vmem:[#allocation2] sm:$0xff]  ;;  %v3655_v56 = vld [vmem:[#allocation2 + $0x8] sm:$0xff] }
 0x5c2   : > { %v11411_v54 = vld [vmem:[#allocation2 + $0x5] sm:$0xff]  ;;  %9828 = vmatprep.mubr.msk.f32.mxu0 %vm277_vm1, %v3654_v52 }
 0x5c3   : > { %9842 = vmatprep.mubr.msk.f32.mxu1 %vm277_vm1, %v11411_v54  ;;  %9829 = vmatmul.mubr.msk.f32.vlgmr.msra.gmra.mxu0 %vm277_vm1, %v3655_v56  ;;  %v4032_v8 = vld [vmem:[#allocation2 + $0xa] sm:$0xff]  ;;  %v4035_v26 = vld [vmem:[#allocation2 + $0x32] sm:$0xff] }
 0x5c4   : > { %9843 = vmatmul.mubr.msk.f32.vlgmr.msra.gmra.mxu1 %vm277_vm1, %v11416_v53  ;;  %9849 = vmatpush3.msra.mxu0 %v11393_v29  ;;  %v11429_v29 = vld [vmem:[#allocation2 + $0x2d] sm:$0xff] }
 0x5c5   : > { %9863 = vmatpush3.msra.mxu1 %v11395_v30  ;;  %9850 = vmatprep.subr.mxu0 %v3860_v58  ;;  %v3656_v62 = vld [vmem:[#allocation2 + $0x20] sm:$0xff]  ;;  %v3657_v1 = vld [vmem:[#allocation2 + $0x28] sm:$0xff] }
 0x5c6   : > { %9864 = vmatprep.subr.mxu1 %v3652_v21  ;;  %9851 = vmatpush3.msra.mxu0 %v3860_v58  ;;  %v11423_v57 = vld [vmem:[#allocation2 + $0x25] sm:$0xff] }
 0x5c7   : > { %9865 = vmatpush3.msra.mxu1 %v3652_v21  ;;  %9831 = vmatprep.mubr.msk.f32.mxu0 %vm277_vm1, %v3656_v62  ;;  %v3650_v30 = vld [vmem:[#allocation8 + $0x440] sm:$0xff]  ;;  %v4034_v9 = vld [vmem:[#allocation2 + $0x2a] sm:$0xff] }
 0x5c8   : > { %9845 = vmatprep.mubr.msk.f32.mxu1 %vm277_vm1, %v11423_v57  ;;  %9852 = vmatprep.subr.mxu0 %v3859_v61 }
 0x5c9   : > { %9832 = vmatmul.mubr.msk.f32.gmra.mxu0 %vm277_vm1, %v3657_v1  ;;  %9846 = vmatmul.mubr.msk.f32.gmra.mxu1 %vm277_vm1, %v11429_v29 }
 0x5ca   : > { %9853 = vmatpush3.msra.mxu0 %v3859_v61  ;;  %9866 = vmatprep.subr.mxu1 %v3651_v2 }
 0x5cb   : > { %9854 = vmatprep.subr.mxu0 %v3858_v59  ;;  %9856 = vmatprep.mubr.msk.f32.mxu0 %vm277_vm1, %v3654_v52 }
 0x5cc   : > { %9867 = vmatpush3.msra.mxu1 %v3651_v2  ;;  %9870 = vmatprep.mubr.msk.f32.mxu1 %vm277_vm1, %v11411_v54 }
 0x5cd   : > { %9855 = vmatpush3.msra.mxu0 %v3858_v59  ;;  %9868 = vmatprep.subr.mxu1 %v3650_v30 }
 0x5ce   : > { %9876 = vmatprep.subr.mxu0 %v4040_v5  ;;  %9869 = vmatpush3.msra.mxu1 %v3650_v30 }
 0x5cf   : > { %9857 = vmatmul.mubr.msk.f32.vlgmr.msra.gmra.mxu0 %vm277_vm1, %v3655_v56  ;;  %9871 = vmatmul.mubr.msk.f32.vlgmr.msra.gmra.mxu1 %vm277_vm1, %v11416_v53 }
 0x5d0   : > { %9877 = vmatpush3.msra.mxu0 %v4040_v5  ;;  %9890 = vmatprep.subr.mxu1 %v4146_v7 }
 0x5d1   : > { %9859 = vmatprep.mubr.msk.f32.mxu0 %vm277_vm1, %v3656_v62  ;;  %9873 = vmatprep.mubr.msk.f32.mxu1 %vm277_vm1, %v11423_v57 }
 0x5d2   : > { %9878 = vmatprep.subr.mxu0 %v4039_v11  ;;  %9891 = vmatpush3.msra.mxu1 %v4146_v7 }
 0x5d3   : > { %9879 = vmatpush3.msra.mxu0 %v4039_v11  ;;  %9892 = vmatprep.subr.mxu1 %v4145_v12 }
 0x5d4   : > { %9880 = vmatprep.subr.mxu0 %v4038_v13  ;;  %9893 = vmatpush3.msra.mxu1 %v4145_v12 }
 0x5d5   : > { %9860 = vmatmul.mubr.msk.f32.gmra.mxu0 %vm277_vm1, %v3657_v1  ;;  %9874 = vmatmul.mubr.msk.f32.gmra.mxu1 %vm277_vm1, %v11429_v29 }
 0x5d6   : > { %9881 = vmatpush3.msra.mxu0 %v4038_v13  ;;  %9894 = vmatprep.subr.mxu1 %v4144_v15 }
 0x5d7   : > { %9882 = vmatprep.subr.mxu0 %v4037_v6  ;;  %9884 = vmatprep.mubr.msk.f32.mxu0 %vm277_vm1, %v4032_v8 }
 0x5d8   : > { %9895 = vmatpush3.msra.mxu1 %v4144_v15  ;;  %9898 = vmatprep.mubr.msk.f32.mxu1 %vm277_vm1, %v4032_v8 }
 0x5d9   : > { %9883 = vmatpush3.msra.mxu0 %v4037_v6  ;;  %9896 = vmatprep.subr.mxu1 %v4143_v23 }
 0x5da   : > { %9885 = vmatmul.mubr.msk.f32.vlgmr.msra.gmra.mxu0 %vm277_vm1, %v4033_v24  ;;  %9897 = vmatpush3.msra.mxu1 %v4143_v23 }
 0x5db   : > { %9887 = vmatprep.mubr.msk.f32.mxu0 %vm277_vm1, %v4034_v9  ;;  %9899 = vmatmul.mubr.msk.f32.vlgmr.msra.gmra.mxu1 %vm277_vm1, %v4033_v24 }
 0x5dc   : > { %9901 = vmatprep.mubr.msk.f32.mxu1 %vm277_vm1, %v4034_v9  ;;  %9904 = vmatprep.subr.mxu0 %v4330_v17 }
 0x5dd   : > { %9918 = vmatprep.subr.mxu1 %v4316_v16  ;;  %9905 = vmatpush3.msra.mxu0 %v4330_v17 }
 0x5de   : > { %9888 = vmatmul.mubr.msk.f32.gmra.mxu0 %vm277_vm1, %v4035_v26  ;;  %9919 = vmatpush3.msra.mxu1 %v4316_v16 }
 0x5df   : > { %9902 = vmatmul.mubr.msk.f32.gmra.mxu1 %vm277_vm1, %v4035_v26  ;;  %9906 = vmatprep.subr.mxu0 %v4329_v22 }
 0x5e0   : > { %9920 = vmatprep.subr.mxu1 %v4315_v31  ;;  %9907 = vmatpush3.msra.mxu0 %v4329_v22 }
 0x5e1   : > { %9921 = vmatpush3.msra.mxu1 %v4315_v31  ;;  %9908 = vmatprep.subr.mxu0 %v4328_v18 }
 0x5e2   : > { %9922 = vmatprep.subr.mxu1 %v4314_v36  ;;  %9909 = vmatpush3.msra.mxu0 %v4328_v18 }
 0x5e3   : > { %9923 = vmatpush3.msra.mxu1 %v4314_v36  ;;  %9910 = vmatprep.subr.mxu0 %v4327_v0  ;;  %v8629_v36 = vld [vmem:[#allocation11 + $0x5] ss:$0 sm:$0xff] }
 0x5e4   : > { %9924 = vmatprep.subr.mxu1 %v4313_v32  ;;  %9911 = vmatpush3.msra.mxu0 %v4327_v0 }
 0x5e5   : > { %9925 = vmatpush3.msra.mxu1 %v4313_v32  ;;  %9932 = vmatprep.subr.mxu0 %v11453_v27 }
 0x5e6   : > { %9946 = vmatprep.subr.mxu1 %v11455_v50 }
 0x683   : > { %v9830_v35 = vpop.f32.mrf.mxu0 }
 0x684   : > { %v9844_v34 = vpop.f32.mrf.mxu1 }
 0x685   : > { %v3741_v28 = vpop.f32.mrf.mxu0  ;;  %v3844_v33 = vadd.f32 %v9844_v34, %v9830_v35 }
 0x686   : > { %v3838_v38 = vpop.f32.mrf.mxu1 }
 0x687   : > { %v3839_v43 = vadd.f32 %v3838_v38, %v3741_v28 }
 0x689   : > { %v9833_v37 = vpop.f32.mrf.mxu0  ;;  %v9847_v39 = vpop.f32.mrf.mxu1 }
 0x68a   : > { %v3854_v46 = vadd.f32 %v9847_v39, %v9833_v37 }
 0x68b   : > { %v3751_v42 = vpop.f32.mrf.mxu0  ;;  %v3848_v44 = vpop.f32.mrf.mxu1 }
 0x68c   : > { %v3849_v52 = vadd.f32 %v3848_v44, %v3751_v42 }
 0x68f   : > { %v9858_v4 = vpop.f32.mrf.mxu0  ;;  %v9872_v1 = vpop.f32.mrf.mxu1 }
 0x690   : > { %v4019_v16 = vadd.f32 %v9872_v1, %v9858_v4 }
 0x691   : > { %v3928_v40 = vpop.f32.mrf.mxu0  ;;  %v4013_v5 = vpop.f32.mrf.mxu1 }
 0x692   : > { %v4014_v22 = vadd.f32 %v4013_v5, %v3928_v40  ;;  %v4527_v5 = vld [vmem:[#allocation8 + $0x4e8] sm:$0xff] }
 0x695   : > { %v9861_v41 = vpop.f32.mrf.mxu0  ;;  %v9875_v7 = vpop.f32.mrf.mxu1 }
 0x696   : > { %v4029_v35 = vadd.f32 %v9875_v7, %v9861_v41 }
 0x697   : > { %v3938_v63 = vpop.f32.mrf.mxu0  ;;  %v4023_v12 = vpop.f32.mrf.mxu1 }
 0x698   : > { %v4024_v38 = vadd.f32 %v4023_v12, %v3938_v63 }
 0x69a   : > { %v9886_v55 = vpop.f32.mrf.mxu0 }
 0x69b   : > { %v4139_v10 = vadd.f32 %v9886_v55, %v3844_v33  ;;  %v9900_v23 = vpop.f32.mrf.mxu1 }
 0x69c   : > { %v4119_v45 = vpop.f32.mrf.mxu0  ;;  %v4233_v31 = vadd.f32 %v9900_v23, %v4019_v16  ;;  %v4707_v23 = vld [vmem:[#allocation8 + $0x4d0] sm:$0xff] }
 0x69d   : > { %v4245_v47 = vadd.f32 %v8628_v49, %v4139_v10  ;;  %v4138_v48 = vadd.f32 %v4119_v45, %v3839_v43  ;;  %v4213_v17 = vpop.f32.mrf.mxu1 }
 0x69e   : > { %v9889_v19 = vpop.f32.mrf.mxu0  ;;  %v4232_v0 = vadd.f32 %v4213_v17, %v4014_v22  ;;  %v4257_v28 = vadd.f32 %v8629_v36, %v4233_v31  ;;  %v4705_v17 = vld [vmem:[#allocation8 + $0x4c0] sm:$0xff] }
 0x69f   : > { %v8631_v51 = vmul.f32 -1.442695, %v4245_v47  ;;  %v4244_v20 = vadd.f32 %v8628_v49, %v4138_v48  ;;  %v4141_v56 = vadd.f32 %v9889_v19, %v3854_v46  ;;  %v9903_v18 = vpop.f32.mrf.mxu1  ;;  %v4811_v22 = vld [vmem:[#allocation8 + $0x520] sm:$0xff] }
 0x6a0   : > { %v4129_v58 = vpop.f32.mrf.mxu0  ;;  %v4235_v33 = vadd.f32 %v9903_v18, %v4029_v35  ;;  %v4997_v35 = vld [vmem:[#allocation8 + $0x550] sm:$0xff] }
 0x6a1   : > { %10573 = vpow2.f32 %v8631_v51  ;;  %v8630_v21 = vmul.f32 -1.442695, %v4244_v20  ;;  %v4247_v61 = vadd.f32 %v8628_v49, %v4141_v56  ;;  %v4140_v62 = vadd.f32 %v4129_v58, %v3849_v52  ;;  %v4223_v42 = vpop.f32.mrf.mxu1 }
 0x6a2   : > { %v4234_v10 = vadd.f32 %v4223_v42, %v4024_v38  ;;  %v4259_v47 = vadd.f32 %v8629_v36, %v4235_v33  ;;  %v4982_v42 = vld [vmem:[#allocation8 + $0x568] sm:$0xff]  ;;  %v4981_v38 = vld [vmem:[#allocation8 + $0x560] sm:$0xff]  ;;  %v11513_v33 = vld [vmem:[#allocation8 + $0x5b8] sm:$0xff] }
 0x6a3   : > { %10575 = vpow2.f32 %v8630_v21  ;;  %v8633_v2 = vmul.f32 -1.442695, %v4247_v61  ;;  %v4246_v59 = vadd.f32 %v8628_v49, %v4140_v62  ;;  %v4256_v49 = vadd.f32 %v8629_v36, %v4232_v0  ;;  %v4998_v0 = vld [vmem:[#allocation8 + $0x558] sm:$0xff] }
 0x6a4   : > { %v4258_v20 = vadd.f32 %v8629_v36, %v4234_v10 }
 0x6a5   : > { %10577 = vpow2.f32 %v8633_v2  ;;  %v8632_v30 = vmul.f32 -1.442695, %v4246_v59  ;;  %v4528_v59 = vld [vmem:[#allocation8 + $0x4f0] sm:$0xff] }
 0x6a7   : > { %10579 = vpow2.f32 %v8632_v30  ;;  %v4320_v30 = vld [vmem:[#allocation8 + $0x510] sm:$0xff] }
 0x6ae   : > { %v10574_v11 = vpop.eup %10573 }
 0x6af   : > { %v4273_v13 = vadd.f32 1.0, %v10574_v11 }
 0x6b0   : > { %v10576_v15 = vpop.eup %10575 }
 0x6b1   : > { %10581 = vrcp.f32 %v4273_v13  ;;  %v4272_v6 = vadd.f32 1.0, %v10576_v15  ;;  %v4319_v13 = vld [vmem:[#allocation8 + $0x508] sm:$0xff]  ;;  %v4526_v15 = vld [vmem:[#allocation8 + $0x4e0] sm:$0xff] }
 0x6b2   : > { %v10578_v8 = vpop.eup %10577 }
 0x6b3   : > { %10583 = vrcp.f32 %v4272_v6  ;;  %v4275_v24 = vadd.f32 1.0, %v10578_v8  ;;  %v4708_v6 = vld [vmem:[#allocation8 + $0x4d8] sm:$0xff] }
 0x6b4   : > { %v10580_v9 = vpop.eup %10579  ;;  %v4814_v8 = vld [vmem:[#allocation8 + $0x538] sm:$0xff] }
 0x6b5   : > { %10585 = vrcp.f32 %v4275_v24  ;;  %v4274_v26 = vadd.f32 1.0, %v10580_v9  ;;  %v4813_v24 = vld [vmem:[#allocation8 + $0x530] sm:$0xff]  ;;  %v4706_v9 = vld [vmem:[#allocation8 + $0x4c8] sm:$0xff] }
 0x6b7   : > { %10587 = vrcp.f32 %v4274_v26  ;;  %v4812_v26 = vld [vmem:[#allocation8 + $0x528] sm:$0xff] }
 0x6be   : > { %v10582_v32 = vpop.eup %10581 }
 0x6bf   : > { %v4289_v37 = vsub.f32 1.0, %v10582_v32  ;;  %v4285_v39 = vmul.f32 %v10582_v32, %v11416_v53  ;;  %v4984_v32 = vld [vmem:[#allocation8 + $0x578] sm:$0xff] }
 0x6c0   : > { %v10584_v34 = vpop.eup %10583 }
 0x6c1   : > { %v4293_v55 = vmul.f32 %v4289_v37, %v4257_v28  ;;  %v4288_v43 = vsub.f32 1.0, %v10584_v34  ;;  %v4284_v45 = vmul.f32 %v10584_v34, %v11411_v54  ;;  %v4983_v28 = vld [vmem:[#allocation8 + $0x570] sm:$0xff]  ;;  %v4996_v37 = vld [vmem:[#allocation8 + $0x548] sm:$0xff]  ;;  %v4995_v34 = vld [vmem:[#allocation8 + $0x540] sm:$0xff] }
 0x6c2   : > { %v10586_v4 = vpop.eup %10585 }
 0x6c3   : > { %v4297_v40 = vadd.f32 %v4293_v55, %v4285_v39  ;;  %v4292_v44 = vmul.f32 %v4288_v43, %v4256_v49  ;;  %v4291_v48 = vsub.f32 1.0, %v10586_v4  ;;  %v4287_v63 = vmul.f32 %v10586_v4, %v11429_v29  ;;  %v11515_v39 = vld [vmem:[#allocation8 + $0x5d8] sm:$0xff] }
 0x6c4   : > { %v10588_v41 = vpop.eup %10587 }
 0x6c5   : > { %v4301_v46 = vmul.f32 %v11149_v3, %v4297_v40  ;;  %v4296_v19 = vadd.f32 %v4292_v44, %v4284_v45  ;;  %v4295_v51 = vmul.f32 %v4291_v48, %v4259_v47  ;;  %v4290_v53 = vsub.f32 1.0, %v10588_v41 }
 0x6c6   : > { %v4286_v58 = vmul.f32 %v10588_v41, %v11423_v57 }
 0x6c7   : > { %4305 = vst.msk [vmem:[#allocation2 + $0xd] sm:$0xff] %vm277_vm1, %v4301_v46  ;;  %v4300_v52 = vmul.f32 %v11153_v60, %v4296_v19  ;;  %v4299_v56 = vadd.f32 %v4295_v51, %v4287_v63  ;;  %v4294_v54 = vmul.f32 %v4290_v53, %v4258_v20  ;;  %v8658_v63 = vld [vmem:[#allocation10 + $0x6] ss:$0 sm:$0xff] }
 0x6c9   : > { %4304 = vst.msk [vmem:[#allocation2 + $0x5] sm:$0xff] %vm277_vm1, %v4300_v52  ;;  %v4303_v21 = vmul.f32 %v11158_v14, %v4299_v56  ;;  %v4298_v61 = vadd.f32 %v4294_v54, %v4286_v58 }
 0x6cb   : > { %4307 = vst.msk [vmem:[#allocation2 + $0x2d] sm:$0xff] %vm277_vm1, %v4303_v21  ;;  %v4302_v29 = vmul.f32 %v11166_v25, %v4298_v61 }
 0x6cd   : > { %4306 = vst.msk [vmem:[#allocation2 + $0x25] sm:$0xff] %vm277_vm1, %v4302_v29 }
 0x6ce   : > { %v11476_v57 = vld [vmem:[#allocation2 + $0xd] sm:$0xff] }
 0x6cf   : > { %v4701_v31 = vld [vmem:[#allocation2 + $0xe] sm:$0xff] }
 0x6d0   : > { %v4322_v62 = vld [vmem:[#allocation2 + $0x4] sm:$0xff]  ;;  %v4323_v2 = vld [vmem:[#allocation2 + $0xc] sm:$0xff] }
 0x6d1   : > { %v11471_v1 = vld [vmem:[#allocation2 + $0x5] sm:$0xff]  ;;  %9912 = vmatprep.mubr.msk.f32.mxu0 %vm277_vm1, %v4322_v62 }
 0x6d2   : > { %9926 = vmatprep.mubr.msk.f32.mxu1 %vm277_vm1, %v11471_v1  ;;  %9913 = vmatmul.mubr.msk.f32.vlgmr.msra.gmra.mxu0 %vm277_vm1, %v4323_v2  ;;  %v4700_v16 = vld [vmem:[#allocation2 + $0x6] sm:$0xff]  ;;  %v4703_v36 = vld [vmem:[#allocation2 + $0x2e] sm:$0xff] }
 0x6d3   : > { %9927 = vmatmul.mubr.msk.f32.vlgmr.msra.gmra.mxu1 %vm277_vm1, %v11476_v57  ;;  %9933 = vmatpush3.msra.mxu0 %v11453_v27  ;;  %v11489_v27 = vld [vmem:[#allocation2 + $0x2d] sm:$0xff] }
 0x6d4   : > { %9947 = vmatpush3.msra.mxu1 %v11455_v50  ;;  %9934 = vmatprep.subr.mxu0 %v4528_v59  ;;  %v4324_v7 = vld [vmem:[#allocation2 + $0x24] sm:$0xff]  ;;  %v4325_v12 = vld [vmem:[#allocation2 + $0x2c] sm:$0xff] }
 0x6d5   : > { %9948 = vmatprep.subr.mxu1 %v4320_v30  ;;  %9935 = vmatpush3.msra.mxu0 %v4528_v59  ;;  %v11483_v11 = vld [vmem:[#allocation2 + $0x25] sm:$0xff] }
 0x6d6   : > { %9949 = vmatpush3.msra.mxu1 %v4320_v30  ;;  %9915 = vmatprep.mubr.msk.f32.mxu0 %vm277_vm1, %v4324_v7  ;;  %v4318_v50 = vld [vmem:[#allocation8 + $0x500] sm:$0xff] }
 0x6d7   : > { %9929 = vmatprep.mubr.msk.f32.mxu1 %vm277_vm1, %v11483_v11  ;;  %9936 = vmatprep.subr.mxu0 %v4527_v5  ;;  %v4702_v18 = vld [vmem:[#allocation2 + $0x26] sm:$0xff] }
 0x6d8   : > { %9916 = vmatmul.mubr.msk.f32.gmra.mxu0 %vm277_vm1, %v4325_v12  ;;  %9930 = vmatmul.mubr.msk.f32.gmra.mxu1 %vm277_vm1, %v11489_v27 }
 0x6d9   : > { %9937 = vmatpush3.msra.mxu0 %v4527_v5  ;;  %9950 = vmatprep.subr.mxu1 %v4319_v13 }
 0x6da   : > { %9938 = vmatprep.subr.mxu0 %v4526_v15  ;;  %9940 = vmatprep.mubr.msk.f32.mxu0 %vm277_vm1, %v4322_v62 }
 0x6db   : > { %9951 = vmatpush3.msra.mxu1 %v4319_v13  ;;  %9954 = vmatprep.mubr.msk.f32.mxu1 %vm277_vm1, %v11471_v1 }
 0x6dc   : > { %9939 = vmatpush3.msra.mxu0 %v4526_v15  ;;  %9952 = vmatprep.subr.mxu1 %v4318_v50 }
 0x6dd   : > { %9960 = vmatprep.subr.mxu0 %v4708_v6  ;;  %9953 = vmatpush3.msra.mxu1 %v4318_v50 }
 0x6de   : > { %9941 = vmatmul.mubr.msk.f32.vlgmr.msra.gmra.mxu0 %vm277_vm1, %v4323_v2  ;;  %9955 = vmatmul.mubr.msk.f32.vlgmr.msra.gmra.mxu1 %vm277_vm1, %v11476_v57 }
 0x6df   : > { %9961 = vmatpush3.msra.mxu0 %v4708_v6  ;;  %9974 = vmatprep.subr.mxu1 %v4814_v8 }
 0x6e0   : > { %9943 = vmatprep.mubr.msk.f32.mxu0 %vm277_vm1, %v4324_v7  ;;  %9957 = vmatprep.mubr.msk.f32.mxu1 %vm277_vm1, %v11483_v11 }
 0x6e1   : > { %9962 = vmatprep.subr.mxu0 %v4707_v23  ;;  %9975 = vmatpush3.msra.mxu1 %v4814_v8 }
 0x6e2   : > { %9963 = vmatpush3.msra.mxu0 %v4707_v23  ;;  %9976 = vmatprep.subr.mxu1 %v4813_v24 }
 0x6e3   : > { %9964 = vmatprep.subr.mxu0 %v4706_v9  ;;  %9977 = vmatpush3.msra.mxu1 %v4813_v24 }
 0x6e4   : > { %9944 = vmatmul.mubr.msk.f32.gmra.mxu0 %vm277_vm1, %v4325_v12  ;;  %9958 = vmatmul.mubr.msk.f32.gmra.mxu1 %vm277_vm1, %v11489_v27 }
 0x6e5   : > { %9965 = vmatpush3.msra.mxu0 %v4706_v9  ;;  %9978 = vmatprep.subr.mxu1 %v4812_v26 }
 0x6e6   : > { %9966 = vmatprep.subr.mxu0 %v4705_v17  ;;  %9968 = vmatprep.mubr.msk.f32.mxu0 %vm277_vm1, %v4700_v16 }
 0x6e7   : > { %9979 = vmatpush3.msra.mxu1 %v4812_v26  ;;  %9982 = vmatprep.mubr.msk.f32.mxu1 %vm277_vm1, %v4700_v16 }
 0x6e8   : > { %9967 = vmatpush3.msra.mxu0 %v4705_v17  ;;  %9980 = vmatprep.subr.mxu1 %v4811_v22 }
 0x6e9   : > { %9969 = vmatmul.mubr.msk.f32.vlgmr.msra.gmra.mxu0 %vm277_vm1, %v4701_v31  ;;  %9981 = vmatpush3.msra.mxu1 %v4811_v22 }
 0x6ea   : > { %9971 = vmatprep.mubr.msk.f32.mxu0 %vm277_vm1, %v4702_v18  ;;  %9983 = vmatmul.mubr.msk.f32.vlgmr.msra.gmra.mxu1 %vm277_vm1, %v4701_v31 }
 0x6eb   : > { %9985 = vmatprep.mubr.msk.f32.mxu1 %vm277_vm1, %v4702_v18  ;;  %9988 = vmatprep.subr.mxu0 %v4998_v0 }
 0x6ec   : > { %10002 = vmatprep.subr.mxu1 %v4984_v32  ;;  %9989 = vmatpush3.msra.mxu0 %v4998_v0 }
 0x6ed   : > { %9972 = vmatmul.mubr.msk.f32.gmra.mxu0 %vm277_vm1, %v4703_v36  ;;  %10003 = vmatpush3.msra.mxu1 %v4984_v32 }
 0x6ee   : > { %9986 = vmatmul.mubr.msk.f32.gmra.mxu1 %vm277_vm1, %v4703_v36  ;;  %9990 = vmatprep.subr.mxu0 %v4997_v35 }
 0x6ef   : > { %10004 = vmatprep.subr.mxu1 %v4983_v28  ;;  %9991 = vmatpush3.msra.mxu0 %v4997_v35 }
 0x6f0   : > { %10005 = vmatpush3.msra.mxu1 %v4983_v28  ;;  %9992 = vmatprep.subr.mxu0 %v4996_v37 }
 0x6f1   : > { %10006 = vmatprep.subr.mxu1 %v4982_v42  ;;  %9993 = vmatpush3.msra.mxu0 %v4996_v37 }
 0x6f2   : > { %10007 = vmatpush3.msra.mxu1 %v4982_v42  ;;  %9994 = vmatprep.subr.mxu0 %v4995_v34  ;;  %v8659_v42 = vld [vmem:[#allocation11 + $0x6] ss:$0 sm:$0xff] }
 0x6f3   : > { %10008 = vmatprep.subr.mxu1 %v4981_v38  ;;  %9995 = vmatpush3.msra.mxu0 %v4995_v34 }
 0x6f4   : > { %10009 = vmatpush3.msra.mxu1 %v4981_v38  ;;  %10016 = vmatprep.subr.mxu0 %v11513_v33 }
 0x6f5   : > { %10030 = vmatprep.subr.mxu1 %v11515_v39 }
 0x792   : > { %v9914_v55 = vpop.f32.mrf.mxu0 }
 0x793   : > { %v9928_v40 = vpop.f32.mrf.mxu1 }
 0x794   : > { %v4409_v49 = vpop.f32.mrf.mxu0  ;;  %v4512_v41 = vadd.f32 %v9928_v40, %v9914_v55 }
 0x795   : > { %v4506_v44 = vpop.f32.mrf.mxu1 }
 0x796   : > { %v4507_v51 = vadd.f32 %v4506_v44, %v4409_v49 }
 0x798   : > { %v9917_v43 = vpop.f32.mrf.mxu0  ;;  %v9931_v46 = vpop.f32.mrf.mxu1 }
 0x799   : > { %v4522_v54 = vadd.f32 %v9931_v46, %v9917_v43 }
 0x79a   : > { %v4419_v10 = vpop.f32.mrf.mxu0  ;;  %v4516_v52 = vpop.f32.mrf.mxu1 }
 0x79b   : > { %v4517_v62 = vadd.f32 %v4516_v52, %v4419_v10 }
 0x79e   : > { %v9942_v4 = vpop.f32.mrf.mxu0  ;;  %v9956_v12 = vpop.f32.mrf.mxu1 }
 0x79f   : > { %v4687_v32 = vadd.f32 %v9956_v12, %v9942_v4 }
 0x7a0   : > { %v4596_v45 = vpop.f32.mrf.mxu0  ;;  %v4681_v6 = vpop.f32.mrf.mxu1 }
 0x7a1   : > { %v4682_v35 = vadd.f32 %v4681_v6, %v4596_v45  ;;  %v5195_v6 = vld [vmem:[#allocation8 + $0x5a8] sm:$0xff] }
 0x7a4   : > { %v9945_v47 = vpop.f32.mrf.mxu0  ;;  %v9959_v8 = vpop.f32.mrf.mxu1 }
 0x7a5   : > { %v4697_v55 = vadd.f32 %v9959_v8, %v9945_v47 }
 0x7a6   : > { %v4606_v48 = vpop.f32.mrf.mxu0  ;;  %v4691_v24 = vpop.f32.mrf.mxu1 }
 0x7a7   : > { %v4692_v44 = vadd.f32 %v4691_v24, %v4606_v48 }
 0x7a9   : > { %v9970_v19 = vpop.f32.mrf.mxu0 }
 0x7aa   : > { %v4807_v20 = vadd.f32 %v9970_v19, %v4512_v41  ;;  %v9984_v22 = vpop.f32.mrf.mxu1 }
 0x7ab   : > { %v4787_v53 = vpop.f32.mrf.mxu0  ;;  %v4901_v28 = vadd.f32 %v9984_v22, %v4687_v32  ;;  %v5375_v22 = vld [vmem:[#allocation8 + $0x590] sm:$0xff] }
 0x7ac   : > { %v4913_v56 = vadd.f32 %v8658_v63, %v4807_v20  ;;  %v4806_v58 = vadd.f32 %v4787_v53, %v4507_v51  ;;  %v4881_v0 = vpop.f32.mrf.mxu1 }
 0x7ad   : > { %v9973_v21 = vpop.f32.mrf.mxu0  ;;  %v4900_v34 = vadd.f32 %v4881_v0, %v4682_v35  ;;  %v4925_v49 = vadd.f32 %v8659_v42, %v4901_v28  ;;  %v5373_v0 = vld [vmem:[#allocation8 + $0x580] sm:$0xff] }
 0x7ae   : > { %v8661_v61 = vmul.f32 -1.442695, %v4913_v56  ;;  %v4912_v29 = vadd.f32 %v8658_v63, %v4806_v58  ;;  %v4809_v2 = vadd.f32 %v9973_v21, %v4522_v54  ;;  %v9987_v37 = vpop.f32.mrf.mxu1  ;;  %v5479_v35 = vld [vmem:[#allocation8 + $0x5e0] sm:$0xff] }
 0x7af   : > { %v4797_v59 = vpop.f32.mrf.mxu0  ;;  %v4903_v41 = vadd.f32 %v9987_v37, %v4697_v55  ;;  %v5665_v55 = vld [vmem:[#allocation8 + $0x610] sm:$0xff] }
 0x7b0   : > { %10589 = vpow2.f32 %v8661_v61  ;;  %v8660_v30 = vmul.f32 -1.442695, %v4912_v29  ;;  %v4915_v5 = vadd.f32 %v8658_v63, %v4809_v2  ;;  %v4808_v7 = vadd.f32 %v4797_v59, %v4517_v62  ;;  %v4891_v10 = vpop.f32.mrf.mxu1 }
 0x7b1   : > { %v4902_v20 = vadd.f32 %v4891_v10, %v4692_v44  ;;  %v4927_v56 = vadd.f32 %v8659_v42, %v4903_v41  ;;  %v5650_v10 = vld [vmem:[#allocation8 + $0x628] sm:$0xff]  ;;  %v5649_v44 = vld [vmem:[#allocation8 + $0x620] sm:$0xff]  ;;  %v11573_v41 = vld [vmem:[#allocation8 + $0x678] sm:$0xff] }
 0x7b2   : > { %10591 = vpow2.f32 %v8660_v30  ;;  %v8663_v13 = vmul.f32 -1.442695, %v4915_v5  ;;  %v4914_v15 = vadd.f32 %v8658_v63, %v4808_v7  ;;  %v4924_v63 = vadd.f32 %v8659_v42, %v4900_v34  ;;  %v5666_v34 = vld [vmem:[#allocation8 + $0x618] sm:$0xff] }
 0x7b3   : > { %v4926_v29 = vadd.f32 %v8659_v42, %v4902_v20 }
 0x7b4   : > { %10593 = vpow2.f32 %v8663_v13  ;;  %v8662_v50 = vmul.f32 -1.442695, %v4914_v15  ;;  %v5196_v15 = vld [vmem:[#allocation8 + $0x5b0] sm:$0xff] }
 0x7b6   : > { %10595 = vpow2.f32 %v8662_v50  ;;  %v4988_v50 = vld [vmem:[#allocation8 + $0x5d0] sm:$0xff] }
 0x7bd   : > { %v10590_v23 = vpop.eup %10589 }
 0x7be   : > { %v4941_v9 = vadd.f32 1.0, %v10590_v23 }
 0x7bf   : > { %v10592_v26 = vpop.eup %10591 }
 0x7c0   : > { %10597 = vrcp.f32 %v4941_v9  ;;  %v4940_v17 = vadd.f32 1.0, %v10592_v26  ;;  %v4987_v9 = vld [vmem:[#allocation8 + $0x5c8] sm:$0xff]  ;;  %v5194_v26 = vld [vmem:[#allocation8 + $0x5a0] sm:$0xff] }
 0x7c1   : > { %v10594_v16 = vpop.eup %10593 }
 0x7c2   : > { %10599 = vrcp.f32 %v4940_v17  ;;  %v4943_v31 = vadd.f32 1.0, %v10594_v16  ;;  %v5376_v17 = vld [vmem:[#allocation8 + $0x598] sm:$0xff] }
 0x7c3   : > { %v10596_v18 = vpop.eup %10595  ;;  %v5482_v16 = vld [vmem:[#allocation8 + $0x5f8] sm:$0xff] }
 0x7c4   : > { %10601 = vrcp.f32 %v4943_v31  ;;  %v4942_v36 = vadd.f32 1.0, %v10596_v18  ;;  %v5481_v31 = vld [vmem:[#allocation8 + $0x5f0] sm:$0xff]  ;;  %v5374_v18 = vld [vmem:[#allocation8 + $0x588] sm:$0xff] }
 0x7c6   : > { %10603 = vrcp.f32 %v4942_v36  ;;  %v5480_v36 = vld [vmem:[#allocation8 + $0x5e8] sm:$0xff] }
 0x7cd   : > { %v10598_v38 = vpop.eup %10597 }
 0x7ce   : > { %v4957_v43 = vsub.f32 1.0, %v10598_v38  ;;  %v4953_v46 = vmul.f32 %v10598_v38, %v11476_v57  ;;  %v5652_v38 = vld [vmem:[#allocation8 + $0x638] sm:$0xff] }
 0x7cf   : > { %v10600_v40 = vpop.eup %10599 }
 0x7d0   : > { %v4961_v19 = vmul.f32 %v4957_v43, %v4925_v49  ;;  %v4956_v51 = vsub.f32 1.0, %v10600_v40  ;;  %v4952_v53 = vmul.f32 %v10600_v40, %v11471_v1  ;;  %v5651_v49 = vld [vmem:[#allocation8 + $0x630] sm:$0xff]  ;;  %v5664_v43 = vld [vmem:[#allocation8 + $0x608] sm:$0xff]  ;;  %v5663_v40 = vld [vmem:[#allocation8 + $0x600] sm:$0xff] }
 0x7d1   : > { %v10602_v4 = vpop.eup %10601 }
 0x7d2   : > { %v4965_v45 = vadd.f32 %v4961_v19, %v4953_v46  ;;  %v4960_v52 = vmul.f32 %v4956_v51, %v4924_v63  ;;  %v4959_v58 = vsub.f32 1.0, %v10602_v4  ;;  %v4955_v48 = vmul.f32 %v10602_v4, %v11489_v27  ;;  %v11575_v46 = vld [vmem:[#allocation8 + $0x698] sm:$0xff] }
 0x7d3   : > { %v10604_v47 = vpop.eup %10603 }
 0x7d4   : > { %v4969_v54 = vmul.f32 %v11149_v3, %v4965_v45  ;;  %v4964_v21 = vadd.f32 %v4960_v52, %v4952_v53  ;;  %v4963_v61 = vmul.f32 %v4959_v58, %v4927_v56  ;;  %v4958_v57 = vsub.f32 1.0, %v10604_v47 }
 0x7d5   : > { %v4954_v59 = vmul.f32 %v10604_v47, %v11483_v11 }
 0x7d6   : > { %4973 = vst.msk [vmem:[#allocation2 + $0xd] sm:$0xff] %vm277_vm1, %v4969_v54  ;;  %v4968_v62 = vmul.f32 %v11153_v60, %v4964_v21  ;;  %v4967_v2 = vadd.f32 %v4963_v61, %v4955_v48  ;;  %v4962_v1 = vmul.f32 %v4958_v57, %v4926_v29  ;;  %v8688_v48 = vld [vmem:[#allocation10 + $0x7] ss:$0 sm:$0xff] }
 0x7d8   : > { %4972 = vst.msk [vmem:[#allocation2 + $0x5] sm:$0xff] %vm277_vm1, %v4968_v62  ;;  %v4971_v30 = vmul.f32 %v11158_v14, %v4967_v2  ;;  %v4966_v5 = vadd.f32 %v4962_v1, %v4954_v59 }
 0x7da   : > { %4975 = vst.msk [vmem:[#allocation2 + $0x2d] sm:$0xff] %vm277_vm1, %v4971_v30  ;;  %v4970_v27 = vmul.f32 %v11166_v25, %v4966_v5 }
 0x7dc   : > { %4974 = vst.msk [vmem:[#allocation2 + $0x25] sm:$0xff] %vm277_vm1, %v4970_v27 }
 0x7dd   : > { %v11536_v11 = vld [vmem:[#allocation2 + $0xd] sm:$0xff] }
 0x7de   : > { %v5369_v28 = vld [vmem:[#allocation2 + $0xf] sm:$0xff] }
 0x7df   : > { %v4990_v7 = vld [vmem:[#allocation2 + $0x3] sm:$0xff]  ;;  %v4991_v13 = vld [vmem:[#allocation2 + $0xb] sm:$0xff] }
 0x7e0   : > { %v11531_v12 = vld [vmem:[#allocation2 + $0x5] sm:$0xff]  ;;  %9996 = vmatprep.mubr.msk.f32.mxu0 %vm277_vm1, %v4990_v7 }
 0x7e1   : > { %10010 = vmatprep.mubr.msk.f32.mxu1 %vm277_vm1, %v11531_v12  ;;  %9997 = vmatmul.mubr.msk.f32.vlgmr.msra.gmra.mxu0 %vm277_vm1, %v4991_v13  ;;  %v5368_v32 = vld [vmem:[#allocation2 + $0x7] sm:$0xff]  ;;  %v5371_v42 = vld [vmem:[#allocation2 + $0x2f] sm:$0xff] }
 0x7e2   : > { %10011 = vmatmul.mubr.msk.f32.vlgmr.msra.gmra.mxu1 %vm277_vm1, %v11536_v11  ;;  %10017 = vmatpush3.msra.mxu0 %v11513_v33  ;;  %v11549_v33 = vld [vmem:[#allocation2 + $0x2d] sm:$0xff] }
 0x7e3   : > { %10031 = vmatpush3.msra.mxu1 %v11515_v39  ;;  %10018 = vmatprep.subr.mxu0 %v5196_v15  ;;  %v4992_v8 = vld [vmem:[#allocation2 + $0x23] sm:$0xff]  ;;  %v4993_v24 = vld [vmem:[#allocation2 + $0x2b] sm:$0xff] }
 0x7e4   : > { %10032 = vmatprep.subr.mxu1 %v4988_v50  ;;  %10019 = vmatpush3.msra.mxu0 %v5196_v15  ;;  %v11543_v23 = vld [vmem:[#allocation2 + $0x25] sm:$0xff] }
 0x7e5   : > { %10033 = vmatpush3.msra.mxu1 %v4988_v50  ;;  %9999 = vmatprep.mubr.msk.f32.mxu0 %vm277_vm1, %v4992_v8  ;;  %v4986_v39 = vld [vmem:[#allocation8 + $0x5c0] sm:$0xff] }
 0x7e6   : > { %10013 = vmatprep.mubr.msk.f32.mxu1 %vm277_vm1, %v11543_v23  ;;  %10020 = vmatprep.subr.mxu0 %v5195_v6  ;;  %v5370_v37 = vld [vmem:[#allocation2 + $0x27] sm:$0xff] }
 0x7e7   : > { %10000 = vmatmul.mubr.msk.f32.gmra.mxu0 %vm277_vm1, %v4993_v24  ;;  %10014 = vmatmul.mubr.msk.f32.gmra.mxu1 %vm277_vm1, %v11549_v33 }
 0x7e8   : > { %10021 = vmatpush3.msra.mxu0 %v5195_v6  ;;  %10034 = vmatprep.subr.mxu1 %v4987_v9 }
 0x7e9   : > { %10022 = vmatprep.subr.mxu0 %v5194_v26  ;;  %10024 = vmatprep.mubr.msk.f32.mxu0 %vm277_vm1, %v4990_v7 }
 0x7ea   : > { %10035 = vmatpush3.msra.mxu1 %v4987_v9  ;;  %10038 = vmatprep.mubr.msk.f32.mxu1 %vm277_vm1, %v11531_v12 }
 0x7eb   : > { %10023 = vmatpush3.msra.mxu0 %v5194_v26  ;;  %10036 = vmatprep.subr.mxu1 %v4986_v39 }
 0x7ec   : > { %10044 = vmatprep.subr.mxu0 %v5376_v17  ;;  %10037 = vmatpush3.msra.mxu1 %v4986_v39 }
 0x7ed   : > { %10025 = vmatmul.mubr.msk.f32.vlgmr.msra.gmra.mxu0 %vm277_vm1, %v4991_v13  ;;  %10039 = vmatmul.mubr.msk.f32.vlgmr.msra.gmra.mxu1 %vm277_vm1, %v11536_v11 }
 0x7ee   : > { %10045 = vmatpush3.msra.mxu0 %v5376_v17  ;;  %10058 = vmatprep.subr.mxu1 %v5482_v16 }
 0x7ef   : > { %10027 = vmatprep.mubr.msk.f32.mxu0 %vm277_vm1, %v4992_v8  ;;  %10041 = vmatprep.mubr.msk.f32.mxu1 %vm277_vm1, %v11543_v23 }
 0x7f0   : > { %10046 = vmatprep.subr.mxu0 %v5375_v22  ;;  %10059 = vmatpush3.msra.mxu1 %v5482_v16 }
 0x7f1   : > { %10047 = vmatpush3.msra.mxu0 %v5375_v22  ;;  %10060 = vmatprep.subr.mxu1 %v5481_v31 }
 0x7f2   : > { %10048 = vmatprep.subr.mxu0 %v5374_v18  ;;  %10061 = vmatpush3.msra.mxu1 %v5481_v31 }
 0x7f3   : > { %10028 = vmatmul.mubr.msk.f32.gmra.mxu0 %vm277_vm1, %v4993_v24  ;;  %10042 = vmatmul.mubr.msk.f32.gmra.mxu1 %vm277_vm1, %v11549_v33 }
 0x7f4   : > { %10049 = vmatpush3.msra.mxu0 %v5374_v18  ;;  %10062 = vmatprep.subr.mxu1 %v5480_v36 }
 0x7f5   : > { %10050 = vmatprep.subr.mxu0 %v5373_v0  ;;  %10052 = vmatprep.mubr.msk.f32.mxu0 %vm277_vm1, %v5368_v32 }
 0x7f6   : > { %10063 = vmatpush3.msra.mxu1 %v5480_v36  ;;  %10066 = vmatprep.mubr.msk.f32.mxu1 %vm277_vm1, %v5368_v32 }
 0x7f7   : > { %10051 = vmatpush3.msra.mxu0 %v5373_v0  ;;  %10064 = vmatprep.subr.mxu1 %v5479_v35 }
 0x7f8   : > { %10053 = vmatmul.mubr.msk.f32.vlgmr.msra.gmra.mxu0 %vm277_vm1, %v5369_v28  ;;  %10065 = vmatpush3.msra.mxu1 %v5479_v35 }
 0x7f9   : > { %10055 = vmatprep.mubr.msk.f32.mxu0 %vm277_vm1, %v5370_v37  ;;  %10067 = vmatmul.mubr.msk.f32.vlgmr.msra.gmra.mxu1 %vm277_vm1, %v5369_v28 }
 0x7fa   : > { %10069 = vmatprep.mubr.msk.f32.mxu1 %vm277_vm1, %v5370_v37  ;;  %10072 = vmatprep.subr.mxu0 %v5666_v34 }
 0x7fb   : > { %10086 = vmatprep.subr.mxu1 %v5652_v38  ;;  %10073 = vmatpush3.msra.mxu0 %v5666_v34 }
 0x7fc   : > { %10056 = vmatmul.mubr.msk.f32.gmra.mxu0 %vm277_vm1, %v5371_v42  ;;  %10087 = vmatpush3.msra.mxu1 %v5652_v38 }
 0x7fd   : > { %10070 = vmatmul.mubr.msk.f32.gmra.mxu1 %vm277_vm1, %v5371_v42  ;;  %10074 = vmatprep.subr.mxu0 %v5665_v55 }
 0x7fe   : > { %10088 = vmatprep.subr.mxu1 %v5651_v49  ;;  %10075 = vmatpush3.msra.mxu0 %v5665_v55 }
 0x7ff   : > { %10089 = vmatpush3.msra.mxu1 %v5651_v49  ;;  %10076 = vmatprep.subr.mxu0 %v5664_v43 }
 0x800   : > { %10090 = vmatprep.subr.mxu1 %v5650_v10  ;;  %10077 = vmatpush3.msra.mxu0 %v5664_v43 }
 0x801   : > { %10091 = vmatpush3.msra.mxu1 %v5650_v10  ;;  %10078 = vmatprep.subr.mxu0 %v5663_v40  ;;  %v8689_v10 = vld [vmem:[#allocation11 + $0x7] ss:$0 sm:$0xff] }
 0x802   : > { %10092 = vmatprep.subr.mxu1 %v5649_v44  ;;  %10079 = vmatpush3.msra.mxu0 %v5663_v40 }
 0x803   : > { %10093 = vmatpush3.msra.mxu1 %v5649_v44  ;;  %10100 = vmatprep.subr.mxu0 %v11573_v41 }
 0x804   : > { %10114 = vmatprep.subr.mxu1 %v11575_v46 }
 0x8a1   : > { %v9998_v19 = vpop.f32.mrf.mxu0 }
 0x8a2   : > { %v10012_v45 = vpop.f32.mrf.mxu1 }
 0x8a3   : > { %v5077_v63 = vpop.f32.mrf.mxu0  ;;  %v5180_v47 = vadd.f32 %v10012_v45, %v9998_v19 }
 0x8a4   : > { %v5174_v52 = vpop.f32.mrf.mxu1 }
 0x8a5   : > { %v5175_v61 = vadd.f32 %v5174_v52, %v5077_v63 }
 0x8a7   : > { %v10001_v51 = vpop.f32.mrf.mxu0  ;;  %v10015_v54 = vpop.f32.mrf.mxu1 }
 0x8a8   : > { %v5190_v1 = vadd.f32 %v10015_v54, %v10001_v51 }
 0x8a9   : > { %v5087_v20 = vpop.f32.mrf.mxu0  ;;  %v5184_v62 = vpop.f32.mrf.mxu1 }
 0x8aa   : > { %v5185_v7 = vadd.f32 %v5184_v62, %v5087_v20 }
 0x8ad   : > { %v10026_v4 = vpop.f32.mrf.mxu0  ;;  %v10040_v24 = vpop.f32.mrf.mxu1 }
 0x8ae   : > { %v5355_v38 = vadd.f32 %v10040_v24, %v10026_v4 }
 0x8af   : > { %v5264_v53 = vpop.f32.mrf.mxu0  ;;  %v5349_v17 = vpop.f32.mrf.mxu1 }
 0x8b0   : > { %v5350_v55 = vadd.f32 %v5349_v17, %v5264_v53  ;;  %v5863_v17 = vld [vmem:[#allocation8 + $0x668] sm:$0xff] }
 0x8b3   : > { %v10029_v56 = vpop.f32.mrf.mxu0  ;;  %v10043_v16 = vpop.f32.mrf.mxu1 }
 0x8b4   : > { %v5365_v19 = vadd.f32 %v10043_v16, %v10029_v56 }
 0x8b5   : > { %v5274_v58 = vpop.f32.mrf.mxu0  ;;  %v5359_v31 = vpop.f32.mrf.mxu1 }
 0x8b6   : > { %v5360_v52 = vadd.f32 %v5359_v31, %v5274_v58 }
 0x8b8   : > { %v10054_v21 = vpop.f32.mrf.mxu0 }
 0x8b9   : > { %v5475_v29 = vadd.f32 %v10054_v21, %v5180_v47  ;;  %v10068_v35 = vpop.f32.mrf.mxu1 }
 0x8ba   : > { %v5455_v57 = vpop.f32.mrf.mxu0  ;;  %v5569_v49 = vadd.f32 %v10068_v35, %v5355_v38  ;;  %v6043_v35 = vld [vmem:[#allocation8 + $0x650] sm:$0xff] }
 0x8bb   : > { %v5581_v2 = vadd.f32 %v8688_v48, %v5475_v29  ;;  %v5474_v59 = vadd.f32 %v5455_v57, %v5175_v61  ;;  %v5549_v34 = vpop.f32.mrf.mxu1 }
 0x8bc   : > { %v10057_v30 = vpop.f32.mrf.mxu0  ;;  %v5568_v40 = vadd.f32 %v5549_v34, %v5350_v55  ;;  %v5593_v63 = vadd.f32 %v8689_v10, %v5569_v49  ;;  %v6041_v34 = vld [vmem:[#allocation8 + $0x640] sm:$0xff] }
 0x8bd   : > { %v8691_v5 = vmul.f32 -1.442695, %v5581_v2  ;;  %v5580_v27 = vadd.f32 %v8688_v48, %v5474_v59  ;;  %v5477_v13 = vadd.f32 %v10057_v30, %v5190_v1  ;;  %v10071_v43 = vpop.f32.mrf.mxu1  ;;  %v6147_v55 = vld [vmem:[#allocation8 + $0x6a0] sm:$0xff] }
 0x8be   : > { %v5465_v15 = vpop.f32.mrf.mxu0  ;;  %v5571_v47 = vadd.f32 %v10071_v43, %v5365_v19  ;;  %v6333_v19 = vld [vmem:[#allocation8 + $0x6d0] sm:$0xff] }
 0x8bf   : > { %10605 = vpow2.f32 %v8691_v5  ;;  %v8690_v50 = vmul.f32 -1.442695, %v5580_v27  ;;  %v5583_v6 = vadd.f32 %v8688_v48, %v5477_v13  ;;  %v5476_v8 = vadd.f32 %v5465_v15, %v5185_v7  ;;  %v5559_v20 = vpop.f32.mrf.mxu1 }
 0x8c0   : > { %v5570_v29 = vadd.f32 %v5559_v20, %v5360_v52  ;;  %v5595_v2 = vadd.f32 %v8689_v10, %v5571_v47  ;;  %v6318_v20 = vld [vmem:[#allocation8 + $0x6e8] sm:$0xff]  ;;  %v6317_v52 = vld [vmem:[#allocation8 + $0x6e0] sm:$0xff]  ;;  %v11633_v47 = vld [vmem:[#allocation8 + $0x738] sm:$0xff] }
 0x8c1   : > { %10607 = vpow2.f32 %v8690_v50  ;;  %v8693_v9 = vmul.f32 -1.442695, %v5583_v6  ;;  %v5582_v26 = vadd.f32 %v8688_v48, %v5476_v8  ;;  %v5592_v48 = vadd.f32 %v8689_v10, %v5568_v40  ;;  %v6334_v40 = vld [vmem:[#allocation8 + $0x6d8] sm:$0xff] }
 0x8c2   : > { %v5594_v27 = vadd.f32 %v8689_v10, %v5570_v29 }
 0x8c3   : > { %10609 = vpow2.f32 %v8693_v9  ;;  %v8692_v39 = vmul.f32 -1.442695, %v5582_v26  ;;  %v5864_v26 = vld [vmem:[#allocation8 + $0x670] sm:$0xff] }
 0x8c5   : > { %10611 = vpow2.f32 %v8692_v39  ;;  %v5656_v39 = vld [vmem:[#allocation8 + $0x690] sm:$0xff] }
 0x8cc   : > { %v10606_v22 = vpop.eup %10605 }
 0x8cd   : > { %v5609_v18 = vadd.f32 1.0, %v10606_v22 }
 0x8ce   : > { %v10608_v36 = vpop.eup %10607 }
 0x8cf   : > { %10613 = vrcp.f32 %v5609_v18  ;;  %v5608_v0 = vadd.f32 1.0, %v10608_v36  ;;  %v5655_v18 = vld [vmem:[#allocation8 + $0x688] sm:$0xff]  ;;  %v5862_v36 = vld [vmem:[#allocation8 + $0x660] sm:$0xff] }
 0x8d0   : > { %v10610_v32 = vpop.eup %10609 }
 0x8d1   : > { %10615 = vrcp.f32 %v5608_v0  ;;  %v5611_v28 = vadd.f32 1.0, %v10610_v32  ;;  %v6044_v0 = vld [vmem:[#allocation8 + $0x658] sm:$0xff] }
 0x8d2   : > { %v10612_v37 = vpop.eup %10611  ;;  %v6150_v32 = vld [vmem:[#allocation8 + $0x6b8] sm:$0xff] }
 0x8d3   : > { %10617 = vrcp.f32 %v5611_v28  ;;  %v5610_v42 = vadd.f32 1.0, %v10612_v37  ;;  %v6149_v28 = vld [vmem:[#allocation8 + $0x6b0] sm:$0xff]  ;;  %v6042_v37 = vld [vmem:[#allocation8 + $0x648] sm:$0xff] }
 0x8d5   : > { %10619 = vrcp.f32 %v5610_v42  ;;  %v6148_v42 = vld [vmem:[#allocation8 + $0x6a8] sm:$0xff] }
 0x8dc   : > { %v10614_v44 = vpop.eup %10613 }
 0x8dd   : > { %v5625_v51 = vsub.f32 1.0, %v10614_v44  ;;  %v5621_v54 = vmul.f32 %v10614_v44, %v11536_v11  ;;  %v6320_v44 = vld [vmem:[#allocation8 + $0x6f8] sm:$0xff] }
 0x8de   : > { %v10616_v45 = vpop.eup %10615 }
 0x8df   : > { %v5629_v21 = vmul.f32 %v5625_v51, %v5593_v63  ;;  %v5624_v61 = vsub.f32 1.0, %v10616_v45  ;;  %v5620_v57 = vmul.f32 %v10616_v45, %v11531_v12  ;;  %v6319_v63 = vld [vmem:[#allocation8 + $0x6f0] sm:$0xff]  ;;  %v6332_v51 = vld [vmem:[#allocation8 + $0x6c8] sm:$0xff]  ;;  %v6331_v45 = vld [vmem:[#allocation8 + $0x6c0] sm:$0xff] }
 0x8e0   : > { %v10618_v4 = vpop.eup %10617 }
 0x8e1   : > { %v5633_v53 = vadd.f32 %v5629_v21, %v5621_v54  ;;  %v5628_v62 = vmul.f32 %v5624_v61, %v5592_v48  ;;  %v5627_v59 = vsub.f32 1.0, %v10618_v4  ;;  %v5623_v58 = vmul.f32 %v10618_v4, %v11549_v33  ;;  %v11635_v54 = vld [vmem:[#allocation8 + $0x758] sm:$0xff] }
 0x8e2   : > { %v10620_v56 = vpop.eup %10619 }
 0x8e3   : > { %v5637_v1 = vmul.f32 %v11149_v3, %v5633_v53  ;;  %v5632_v30 = vadd.f32 %v5628_v62, %v5620_v57  ;;  %v5631_v5 = vmul.f32 %v5627_v59, %v5595_v2  ;;  %v5626_v11 = vsub.f32 1.0, %v10620_v56 }
 0x8e4   : > { %v5622_v15 = vmul.f32 %v10620_v56, %v11543_v23 }
 0x8e5   : > { %5641 = vst.msk [vmem:[#allocation2 + $0xd] sm:$0xff] %vm277_vm1, %v5637_v1  ;;  %v5636_v7 = vmul.f32 %v11153_v60, %v5632_v30  ;;  %v5635_v13 = vadd.f32 %v5631_v5, %v5623_v58  ;;  %v5630_v12 = vmul.f32 %v5626_v11, %v5594_v27  ;;  %v8718_v58 = vld [vmem:[#allocation10 + $0x8] ss:$0 sm:$0xff] }
 0x8e7   : > { %5640 = vst.msk [vmem:[#allocation2 + $0x5] sm:$0xff] %vm277_vm1, %v5636_v7  ;;  %v5639_v50 = vmul.f32 %v11158_v14, %v5635_v13  ;;  %v5634_v6 = vadd.f32 %v5630_v12, %v5622_v15 }
 0x8e9   : > { %5643 = vst.msk [vmem:[#allocation2 + $0x2d] sm:$0xff] %vm277_vm1, %v5639_v50  ;;  %v5638_v33 = vmul.f32 %v11166_v25, %v5634_v6 }
 0x8eb   : > { %5642 = vst.msk [vmem:[#allocation2 + $0x25] sm:$0xff] %vm277_vm1, %v5638_v33 }
 0x8ec   : > { %v11596_v23 = vld [vmem:[#allocation2 + $0xd] sm:$0xff] }
 0x8ed   : > { %v6037_v49 = vld [vmem:[#allocation2 + $0x12] sm:$0xff] }
 0x8ee   : > { %v5658_v8 = vld [vmem:[#allocation2] sm:$0xff]  ;;  %v5659_v9 = vld [vmem:[#allocation2 + $0x8] sm:$0xff] }
 0x8ef   : > { %v11591_v24 = vld [vmem:[#allocation2 + $0x5] sm:$0xff]  ;;  %10080 = vmatprep.mubr.msk.f32.mxu0 %vm277_vm1, %v5658_v8 }
 0x8f0   : > { %10094 = vmatprep.mubr.msk.f32.mxu1 %vm277_vm1, %v11591_v24  ;;  %10081 = vmatmul.mubr.msk.f32.vlgmr.msra.gmra.mxu0 %vm277_vm1, %v5659_v9  ;;  %v6036_v38 = vld [vmem:[#allocation2 + $0xa] sm:$0xff]  ;;  %v6039_v10 = vld [vmem:[#allocation2 + $0x32] sm:$0xff] }
 0x8f1   : > { %10095 = vmatmul.mubr.msk.f32.vlgmr.msra.gmra.mxu1 %vm277_vm1, %v11596_v23  ;;  %10101 = vmatpush3.msra.mxu0 %v11573_v41  ;;  %v11609_v41 = vld [vmem:[#allocation2 + $0x2d] sm:$0xff] }
 0x8f2   : > { %10115 = vmatpush3.msra.mxu1 %v11575_v46  ;;  %10102 = vmatprep.subr.mxu0 %v5864_v26  ;;  %v5660_v16 = vld [vmem:[#allocation2 + $0x20] sm:$0xff]  ;;  %v5661_v31 = vld [vmem:[#allocation2 + $0x28] sm:$0xff] }
 0x8f3   : > { %10116 = vmatprep.subr.mxu1 %v5656_v39  ;;  %10103 = vmatpush3.msra.mxu0 %v5864_v26  ;;  %v11603_v22 = vld [vmem:[#allocation2 + $0x25] sm:$0xff] }
 0x8f4   : > { %10117 = vmatpush3.msra.mxu1 %v5656_v39  ;;  %10083 = vmatprep.mubr.msk.f32.mxu0 %vm277_vm1, %v5660_v16  ;;  %v5654_v46 = vld [vmem:[#allocation8 + $0x680] sm:$0xff]  ;;  %v6038_v43 = vld [vmem:[#allocation2 + $0x2a] sm:$0xff] }
 0x8f5   : > { %10097 = vmatprep.mubr.msk.f32.mxu1 %vm277_vm1, %v11603_v22  ;;  %10104 = vmatprep.subr.mxu0 %v5863_v17 }
 0x8f6   : > { %10084 = vmatmul.mubr.msk.f32.gmra.mxu0 %vm277_vm1, %v5661_v31  ;;  %10098 = vmatmul.mubr.msk.f32.gmra.mxu1 %vm277_vm1, %v11609_v41 }
 0x8f7   : > { %10105 = vmatpush3.msra.mxu0 %v5863_v17  ;;  %10118 = vmatprep.subr.mxu1 %v5655_v18 }
 0x8f8   : > { %10106 = vmatprep.subr.mxu0 %v5862_v36  ;;  %10108 = vmatprep.mubr.msk.f32.mxu0 %vm277_vm1, %v5658_v8 }
 0x8f9   : > { %10119 = vmatpush3.msra.mxu1 %v5655_v18  ;;  %10122 = vmatprep.mubr.msk.f32.mxu1 %vm277_vm1, %v11591_v24 }
 0x8fa   : > { %10107 = vmatpush3.msra.mxu0 %v5862_v36  ;;  %10120 = vmatprep.subr.mxu1 %v5654_v46 }
 0x8fb   : > { %10128 = vmatprep.subr.mxu0 %v6044_v0  ;;  %10121 = vmatpush3.msra.mxu1 %v5654_v46 }
 0x8fc   : > { %10109 = vmatmul.mubr.msk.f32.vlgmr.msra.gmra.mxu0 %vm277_vm1, %v5659_v9  ;;  %10123 = vmatmul.mubr.msk.f32.vlgmr.msra.gmra.mxu1 %vm277_vm1, %v11596_v23 }
 0x8fd   : > { %10129 = vmatpush3.msra.mxu0 %v6044_v0  ;;  %10142 = vmatprep.subr.mxu1 %v6150_v32 }
 0x8fe   : > { %10111 = vmatprep.mubr.msk.f32.mxu0 %vm277_vm1, %v5660_v16  ;;  %10125 = vmatprep.mubr.msk.f32.mxu1 %vm277_vm1, %v11603_v22 }
 0x8ff   : > { %10130 = vmatprep.subr.mxu0 %v6043_v35  ;;  %10143 = vmatpush3.msra.mxu1 %v6150_v32 }
 0x900   : > { %10131 = vmatpush3.msra.mxu0 %v6043_v35  ;;  %10144 = vmatprep.subr.mxu1 %v6149_v28 }
 0x901   : > { %10132 = vmatprep.subr.mxu0 %v6042_v37  ;;  %10145 = vmatpush3.msra.mxu1 %v6149_v28 }
 0x902   : > { %10112 = vmatmul.mubr.msk.f32.gmra.mxu0 %vm277_vm1, %v5661_v31  ;;  %10126 = vmatmul.mubr.msk.f32.gmra.mxu1 %vm277_vm1, %v11609_v41 }
 0x903   : > { %10133 = vmatpush3.msra.mxu0 %v6042_v37  ;;  %10146 = vmatprep.subr.mxu1 %v6148_v42 }
 0x904   : > { %10134 = vmatprep.subr.mxu0 %v6041_v34  ;;  %10136 = vmatprep.mubr.msk.f32.mxu0 %vm277_vm1, %v6036_v38 }
 0x905   : > { %10147 = vmatpush3.msra.mxu1 %v6148_v42  ;;  %10150 = vmatprep.mubr.msk.f32.mxu1 %vm277_vm1, %v6036_v38 }
 0x906   : > { %10135 = vmatpush3.msra.mxu0 %v6041_v34  ;;  %10148 = vmatprep.subr.mxu1 %v6147_v55 }
 0x907   : > { %10137 = vmatmul.mubr.msk.f32.vlgmr.msra.gmra.mxu0 %vm277_vm1, %v6037_v49  ;;  %10149 = vmatpush3.msra.mxu1 %v6147_v55 }
 0x908   : > { %10139 = vmatprep.mubr.msk.f32.mxu0 %vm277_vm1, %v6038_v43  ;;  %10151 = vmatmul.mubr.msk.f32.vlgmr.msra.gmra.mxu1 %vm277_vm1, %v6037_v49 }
 0x909   : > { %10153 = vmatprep.mubr.msk.f32.mxu1 %vm277_vm1, %v6038_v43  ;;  %10156 = vmatprep.subr.mxu0 %v6334_v40 }
 0x90a   : > { %10170 = vmatprep.subr.mxu1 %v6320_v44  ;;  %10157 = vmatpush3.msra.mxu0 %v6334_v40 }
 0x90b   : > { %10140 = vmatmul.mubr.msk.f32.gmra.mxu0 %vm277_vm1, %v6039_v10  ;;  %10171 = vmatpush3.msra.mxu1 %v6320_v44 }
 0x90c   : > { %10154 = vmatmul.mubr.msk.f32.gmra.mxu1 %vm277_vm1, %v6039_v10  ;;  %10158 = vmatprep.subr.mxu0 %v6333_v19 }
 0x90d   : > { %10172 = vmatprep.subr.mxu1 %v6319_v63  ;;  %10159 = vmatpush3.msra.mxu0 %v6333_v19 }
 0x90e   : > { %10173 = vmatpush3.msra.mxu1 %v6319_v63  ;;  %10160 = vmatprep.subr.mxu0 %v6332_v51 }
 0x90f   : > { %10174 = vmatprep.subr.mxu1 %v6318_v20  ;;  %10161 = vmatpush3.msra.mxu0 %v6332_v51 }
 0x910   : > { %10175 = vmatpush3.msra.mxu1 %v6318_v20  ;;  %10162 = vmatprep.subr.mxu0 %v6331_v45  ;;  %v8719_v20 = vld [vmem:[#allocation11 + $0x8] ss:$0 sm:$0xff] }
 0x911   : > { %10176 = vmatprep.subr.mxu1 %v6317_v52  ;;  %10163 = vmatpush3.msra.mxu0 %v6331_v45 }
 0x912   : > { %10177 = vmatpush3.msra.mxu1 %v6317_v52  ;;  %10184 = vmatprep.subr.mxu0 %v11633_v47 }
 0x913   : > { %10198 = vmatprep.subr.mxu1 %v11635_v54 }
 0x9b0   : > { %v10082_v21 = vpop.f32.mrf.mxu0 }
 0x9b1   : > { %v10096_v53 = vpop.f32.mrf.mxu1 }
 0x9b2   : > { %v5745_v48 = vpop.f32.mrf.mxu0  ;;  %v5848_v56 = vadd.f32 %v10096_v53, %v10082_v21 }
 0x9b3   : > { %v5842_v62 = vpop.f32.mrf.mxu1 }
 0x9b4   : > { %v5843_v5 = vadd.f32 %v5842_v62, %v5745_v48 }
 0x9b6   : > { %v10085_v61 = vpop.f32.mrf.mxu0  ;;  %v10099_v1 = vpop.f32.mrf.mxu1 }
 0x9b7   : > { %v5858_v12 = vadd.f32 %v10099_v1, %v10085_v61 }
 0x9b8   : > { %v5755_v29 = vpop.f32.mrf.mxu0  ;;  %v5852_v7 = vpop.f32.mrf.mxu1 }
 0x9b9   : > { %v5853_v8 = vadd.f32 %v5852_v7, %v5755_v29 }
 0x9bc   : > { %v10110_v4 = vpop.f32.mrf.mxu0  ;;  %v10124_v31 = vpop.f32.mrf.mxu1 }
 0x9bd   : > { %v6023_v44 = vadd.f32 %v10124_v31, %v10110_v4 }
 0x9be   : > { %v5932_v57 = vpop.f32.mrf.mxu0  ;;  %v6017_v0 = vpop.f32.mrf.mxu1 }
 0x9bf   : > { %v6018_v19 = vadd.f32 %v6017_v0, %v5932_v57  ;;  %v6531_v0 = vld [vmem:[#allocation8 + $0x728] sm:$0xff] }
 0x9c2   : > { %v10113_v2 = vpop.f32.mrf.mxu0  ;;  %v10127_v32 = vpop.f32.mrf.mxu1 }
 0x9c3   : > { %v6033_v21 = vadd.f32 %v10127_v32, %v10113_v2 }
 0x9c4   : > { %v5942_v59 = vpop.f32.mrf.mxu0  ;;  %v6027_v28 = vpop.f32.mrf.mxu1 }
 0x9c5   : > { %v6028_v62 = vadd.f32 %v6027_v28, %v5942_v59 }
 0x9c7   : > { %v10138_v30 = vpop.f32.mrf.mxu0 }
 0x9c8   : > { %v6143_v27 = vadd.f32 %v10138_v30, %v5848_v56  ;;  %v10152_v55 = vpop.f32.mrf.mxu1 }
 0x9c9   : > { %v6123_v11 = vpop.f32.mrf.mxu0  ;;  %v6237_v63 = vadd.f32 %v10152_v55, %v6023_v44  ;;  %v6711_v55 = vld [vmem:[#allocation8 + $0x710] sm:$0xff] }
 0x9ca   : > { %v6249_v13 = vadd.f32 %v8718_v58, %v6143_v27  ;;  %v6142_v15 = vadd.f32 %v6123_v11, %v5843_v5  ;;  %v6217_v40 = vpop.f32.mrf.mxu1 }
 0x9cb   : > { %v10141_v50 = vpop.f32.mrf.mxu0  ;;  %v6236_v45 = vadd.f32 %v6217_v40, %v6018_v19  ;;  %v6261_v48 = vadd.f32 %v8719_v20, %v6237_v63  ;;  %v6709_v40 = vld [vmem:[#allocation8 + $0x700] sm:$0xff] }
 0x9cc   : > { %v8721_v6 = vmul.f32 -1.442695, %v6249_v13  ;;  %v6248_v33 = vadd.f32 %v8718_v58, %v6142_v15  ;;  %v6145_v9 = vadd.f32 %v10141_v50, %v5858_v12  ;;  %v10155_v51 = vpop.f32.mrf.mxu1  ;;  %v6815_v19 = vld [vmem:[#allocation8 + $0x760] sm:$0xff] }
 0x9cd   : > { %v6133_v26 = vpop.f32.mrf.mxu0  ;;  %v6239_v56 = vadd.f32 %v10155_v51, %v6033_v21  ;;  %v7001_v21 = vld [vmem:[#allocation8 + $0x790] sm:$0xff] }
 0x9ce   : > { %10621 = vpow2.f32 %v8721_v6  ;;  %v8720_v39 = vmul.f32 -1.442695, %v6248_v33  ;;  %v6251_v17 = vadd.f32 %v8718_v58, %v6145_v9  ;;  %v6144_v16 = vadd.f32 %v6133_v26, %v5853_v8  ;;  %v6227_v29 = vpop.f32.mrf.mxu1 }
 0x9cf   : > { %v6238_v27 = vadd.f32 %v6227_v29, %v6028_v62  ;;  %v6263_v13 = vadd.f32 %v8719_v20, %v6239_v56  ;;  %v6986_v29 = vld [vmem:[#allocation8 + $0x7a8] sm:$0xff]  ;;  %v6985_v62 = vld [vmem:[#allocation8 + $0x7a0] sm:$0xff]  ;;  %v11693_v56 = vld [vmem:[#allocation8 + $0x7f8] sm:$0xff] }
 0x9d0   : > { %10623 = vpow2.f32 %v8720_v39  ;;  %v8723_v18 = vmul.f32 -1.442695, %v6251_v17  ;;  %v6250_v36 = vadd.f32 %v8718_v58, %v6144_v16  ;;  %v6260_v58 = vadd.f32 %v8719_v20, %v6236_v45  ;;  %v7002_v45 = vld [vmem:[#allocation8 + $0x798] sm:$0xff] }
 0x9d1   : > { %v6262_v33 = vadd.f32 %v8719_v20, %v6238_v27 }
 0x9d2   : > { %10625 = vpow2.f32 %v8723_v18  ;;  %v8722_v46 = vmul.f32 -1.442695, %v6250_v36  ;;  %v6532_v36 = vld [vmem:[#allocation8 + $0x730] sm:$0xff] }
 0x9d4   : > { %10627 = vpow2.f32 %v8722_v46  ;;  %v6324_v46 = vld [vmem:[#allocation8 + $0x750] sm:$0xff] }
 0x9db   : > { %v10622_v35 = vpop.eup %10621 }
 0x9dc   : > { %v6277_v37 = vadd.f32 1.0, %v10622_v35 }
 0x9dd   : > { %v10624_v42 = vpop.eup %10623 }
 0x9de   : > { %10629 = vrcp.f32 %v6277_v37  ;;  %v6276_v34 = vadd.f32 1.0, %v10624_v42  ;;  %v6323_v37 = vld [vmem:[#allocation8 + $0x748] sm:$0xff]  ;;  %v6530_v42 = vld [vmem:[#allocation8 + $0x720] sm:$0xff] }
 0x9df   : > { %v10626_v38 = vpop.eup %10625 }
 0x9e0   : > { %10631 = vrcp.f32 %v6276_v34  ;;  %v6279_v49 = vadd.f32 1.0, %v10626_v38  ;;  %v6712_v34 = vld [vmem:[#allocation8 + $0x718] sm:$0xff] }
 0x9e1   : > { %v10628_v43 = vpop.eup %10627  ;;  %v6818_v38 = vld [vmem:[#allocation8 + $0x778] sm:$0xff] }
 0x9e2   : > { %10633 = vrcp.f32 %v6279_v49  ;;  %v6278_v10 = vadd.f32 1.0, %v10628_v43  ;;  %v6817_v49 = vld [vmem:[#allocation8 + $0x770] sm:$0xff]  ;;  %v6710_v43 = vld [vmem:[#allocation8 + $0x708] sm:$0xff] }
 0x9e4   : > { %10635 = vrcp.f32 %v6278_v10  ;;  %v6816_v10 = vld [vmem:[#allocation8 + $0x768] sm:$0xff] }
 0x9eb   : > { %v10630_v52 = vpop.eup %10629 }
 0x9ec   : > { %v6293_v61 = vsub.f32 1.0, %v10630_v52  ;;  %v6289_v1 = vmul.f32 %v10630_v52, %v11596_v23  ;;  %v6988_v52 = vld [vmem:[#allocation8 + $0x7b8] sm:$0xff] }
 0x9ed   : > { %v10632_v53 = vpop.eup %10631 }
 0x9ee   : > { %v6297_v30 = vmul.f32 %v6293_v61, %v6261_v48  ;;  %v6292_v5 = vsub.f32 1.0, %v10632_v53  ;;  %v6288_v11 = vmul.f32 %v10632_v53, %v11591_v24  ;;  %v6987_v48 = vld [vmem:[#allocation8 + $0x7b0] sm:$0xff]  ;;  %v7000_v61 = vld [vmem:[#allocation8 + $0x788] sm:$0xff]  ;;  %v6999_v53 = vld [vmem:[#allocation8 + $0x780] sm:$0xff] }
 0x9ef   : > { %v10634_v4 = vpop.eup %10633 }
 0x9f0   : > { %v6301_v57 = vadd.f32 %v6297_v30, %v6289_v1  ;;  %v6296_v7 = vmul.f32 %v6292_v5, %v6260_v58  ;;  %v6295_v15 = vsub.f32 1.0, %v10634_v4  ;;  %v6291_v59 = vmul.f32 %v10634_v4, %v11609_v41  ;;  %v11695_v1 = vld [vmem:[#allocation8 + $0x818] sm:$0xff] }
 0x9f1   : > { %v10636_v2 = vpop.eup %10635 }
 0x9f2   : > { %v6305_v12 = vmul.f32 %v11149_v3, %v6301_v57  ;;  %v6300_v50 = vadd.f32 %v6296_v7, %v6288_v11  ;;  %v6299_v6 = vmul.f32 %v6295_v15, %v6263_v13  ;;  %v6294_v23 = vsub.f32 1.0, %v10636_v2 }
 0x9f3   : > { %v6290_v26 = vmul.f32 %v10636_v2, %v11603_v22 }
 0x9f4   : > { %6309 = vst.msk [vmem:[#allocation2 + $0xd] sm:$0xff] %vm277_vm1, %v6305_v12  ;;  %v6304_v8 = vmul.f32 %v11153_v60, %v6300_v50  ;;  %v6303_v9 = vadd.f32 %v6299_v6, %v6291_v59  ;;  %v6298_v24 = vmul.f32 %v6294_v23, %v6262_v33  ;;  %v8748_v59 = vld [vmem:[#allocation10 + $0x9] ss:$0 sm:$0xff] }
 0x9f6   : > { %6308 = vst.msk [vmem:[#allocation2 + $0x5] sm:$0xff] %vm277_vm1, %v6304_v8  ;;  %v6307_v39 = vmul.f32 %v11158_v14, %v6303_v9  ;;  %v6302_v17 = vadd.f32 %v6298_v24, %v6290_v26 }
 0x9f8   : > { %6311 = vst.msk [vmem:[#allocation2 + $0x2d] sm:$0xff] %vm277_vm1, %v6307_v39  ;;  %v6306_v41 = vmul.f32 %v11166_v25, %v6302_v17 }
 0x9fa   : > { %6310 = vst.msk [vmem:[#allocation2 + $0x25] sm:$0xff] %vm277_vm1, %v6306_v41 }
 0x9fb   : > { %v11656_v22 = vld [vmem:[#allocation2 + $0xd] sm:$0xff] }
 0x9fc   : > { %v6705_v63 = vld [vmem:[#allocation2 + $0xe] sm:$0xff] }
 0x9fd   : > { %v6326_v16 = vld [vmem:[#allocation2 + $0x4] sm:$0xff]  ;;  %v6327_v18 = vld [vmem:[#allocation2 + $0xc] sm:$0xff] }
 0x9fe   : > { %v11651_v31 = vld [vmem:[#allocation2 + $0x5] sm:$0xff]  ;;  %10164 = vmatprep.mubr.msk.f32.mxu0 %vm277_vm1, %v6326_v16 }
 0x9ff   : > { %10178 = vmatprep.mubr.msk.f32.mxu1 %vm277_vm1, %v11651_v31  ;;  %10165 = vmatmul.mubr.msk.f32.vlgmr.msra.gmra.mxu0 %vm277_vm1, %v6327_v18  ;;  %v6704_v44 = vld [vmem:[#allocation2 + $0x6] sm:$0xff]  ;;  %v6707_v20 = vld [vmem:[#allocation2 + $0x2e] sm:$0xff] }
 0xa00   : > { %10179 = vmatmul.mubr.msk.f32.vlgmr.msra.gmra.mxu1 %vm277_vm1, %v11656_v22  ;;  %10185 = vmatpush3.msra.mxu0 %v11633_v47  ;;  %v11669_v47 = vld [vmem:[#allocation2 + $0x2d] sm:$0xff] }
 0xa01   : > { %10199 = vmatpush3.msra.mxu1 %v11635_v54  ;;  %10186 = vmatprep.subr.mxu0 %v6532_v36  ;;  %v6328_v32 = vld [vmem:[#allocation2 + $0x24] sm:$0xff]  ;;  %v6329_v28 = vld [vmem:[#allocation2 + $0x2c] sm:$0xff] }
 0xa02   : > { %10200 = vmatprep.subr.mxu1 %v6324_v46  ;;  %10187 = vmatpush3.msra.mxu0 %v6532_v36  ;;  %v11663_v35 = vld [vmem:[#allocation2 + $0x25] sm:$0xff] }
 0xa03   : > { %10201 = vmatpush3.msra.mxu1 %v6324_v46  ;;  %10167 = vmatprep.mubr.msk.f32.mxu0 %vm277_vm1, %v6328_v32  ;;  %v6322_v54 = vld [vmem:[#allocation8 + $0x740] sm:$0xff] }
 0xa04   : > { %10181 = vmatprep.mubr.msk.f32.mxu1 %vm277_vm1, %v11663_v35  ;;  %10188 = vmatprep.subr.mxu0 %v6531_v0  ;;  %v6706_v51 = vld [vmem:[#allocation2 + $0x26] sm:$0xff] }
 0xa05   : > { %10168 = vmatmul.mubr.msk.f32.gmra.mxu0 %vm277_vm1, %v6329_v28  ;;  %10182 = vmatmul.mubr.msk.f32.gmra.mxu1 %vm277_vm1, %v11669_v47 }
 0xa06   : > { %10189 = vmatpush3.msra.mxu0 %v6531_v0  ;;  %10202 = vmatprep.subr.mxu1 %v6323_v37 }
 0xa07   : > { %10190 = vmatprep.subr.mxu0 %v6530_v42  ;;  %10192 = vmatprep.mubr.msk.f32.mxu0 %vm277_vm1, %v6326_v16 }
 0xa08   : > { %10203 = vmatpush3.msra.mxu1 %v6323_v37  ;;  %10206 = vmatprep.mubr.msk.f32.mxu1 %vm277_vm1, %v11651_v31 }
 0xa09   : > { %10191 = vmatpush3.msra.mxu0 %v6530_v42  ;;  %10204 = vmatprep.subr.mxu1 %v6322_v54 }
 0xa0a   : > { %10212 = vmatprep.subr.mxu0 %v6712_v34  ;;  %10205 = vmatpush3.msra.mxu1 %v6322_v54 }
 0xa0b   : > { %10193 = vmatmul.mubr.msk.f32.vlgmr.msra.gmra.mxu0 %vm277_vm1, %v6327_v18  ;;  %10207 = vmatmul.mubr.msk.f32.vlgmr.msra.gmra.mxu1 %vm277_vm1, %v11656_v22 }
 0xa0c   : > { %10213 = vmatpush3.msra.mxu0 %v6712_v34  ;;  %10226 = vmatprep.subr.mxu1 %v6818_v38 }
 0xa0d   : > { %10195 = vmatprep.mubr.msk.f32.mxu0 %vm277_vm1, %v6328_v32  ;;  %10209 = vmatprep.mubr.msk.f32.mxu1 %vm277_vm1, %v11663_v35 }
 0xa0e   : > { %10214 = vmatprep.subr.mxu0 %v6711_v55  ;;  %10227 = vmatpush3.msra.mxu1 %v6818_v38 }
 0xa0f   : > { %10215 = vmatpush3.msra.mxu0 %v6711_v55  ;;  %10228 = vmatprep.subr.mxu1 %v6817_v49 }
 0xa10   : > { %10216 = vmatprep.subr.mxu0 %v6710_v43  ;;  %10229 = vmatpush3.msra.mxu1 %v6817_v49 }
 0xa11   : > { %10196 = vmatmul.mubr.msk.f32.gmra.mxu0 %vm277_vm1, %v6329_v28  ;;  %10210 = vmatmul.mubr.msk.f32.gmra.mxu1 %vm277_vm1, %v11669_v47 }
 0xa12   : > { %10217 = vmatpush3.msra.mxu0 %v6710_v43  ;;  %10230 = vmatprep.subr.mxu1 %v6816_v10 }
 0xa13   : > { %10218 = vmatprep.subr.mxu0 %v6709_v40  ;;  %10220 = vmatprep.mubr.msk.f32.mxu0 %vm277_vm1, %v6704_v44 }
 0xa14   : > { %10231 = vmatpush3.msra.mxu1 %v6816_v10  ;;  %10234 = vmatprep.mubr.msk.f32.mxu1 %vm277_vm1, %v6704_v44 }
 0xa15   : > { %10219 = vmatpush3.msra.mxu0 %v6709_v40  ;;  %10232 = vmatprep.subr.mxu1 %v6815_v19 }
 0xa16   : > { %10221 = vmatmul.mubr.msk.f32.vlgmr.msra.gmra.mxu0 %vm277_vm1, %v6705_v63  ;;  %10233 = vmatpush3.msra.mxu1 %v6815_v19 }
 0xa17   : > { %10223 = vmatprep.mubr.msk.f32.mxu0 %vm277_vm1, %v6706_v51  ;;  %10235 = vmatmul.mubr.msk.f32.vlgmr.msra.gmra.mxu1 %vm277_vm1, %v6705_v63 }
 0xa18   : > { %10237 = vmatprep.mubr.msk.f32.mxu1 %vm277_vm1, %v6706_v51  ;;  %10240 = vmatprep.subr.mxu0 %v7002_v45 }
 0xa19   : > { %10254 = vmatprep.subr.mxu1 %v6988_v52  ;;  %10241 = vmatpush3.msra.mxu0 %v7002_v45 }
 0xa1a   : > { %10224 = vmatmul.mubr.msk.f32.gmra.mxu0 %vm277_vm1, %v6707_v20  ;;  %10255 = vmatpush3.msra.mxu1 %v6988_v52 }
 0xa1b   : > { %10238 = vmatmul.mubr.msk.f32.gmra.mxu1 %vm277_vm1, %v6707_v20  ;;  %10242 = vmatprep.subr.mxu0 %v7001_v21 }
 0xa1c   : > { %10256 = vmatprep.subr.mxu1 %v6987_v48  ;;  %10243 = vmatpush3.msra.mxu0 %v7001_v21 }
 0xa1d   : > { %10257 = vmatpush3.msra.mxu1 %v6987_v48  ;;  %10244 = vmatprep.subr.mxu0 %v7000_v61 }
 0xa1e   : > { %10258 = vmatprep.subr.mxu1 %v6986_v29  ;;  %10245 = vmatpush3.msra.mxu0 %v7000_v61 }
 0xa1f   : > { %10259 = vmatpush3.msra.mxu1 %v6986_v29  ;;  %10246 = vmatprep.subr.mxu0 %v6999_v53  ;;  %v8749_v29 = vld [vmem:[#allocation11 + $0x9] ss:$0 sm:$0xff] }
 0xa20   : > { %10260 = vmatprep.subr.mxu1 %v6985_v62  ;;  %10247 = vmatpush3.msra.mxu0 %v6999_v53 }
 0xa21   : > { %10261 = vmatpush3.msra.mxu1 %v6985_v62  ;;  %10268 = vmatprep.subr.mxu0 %v11693_v56 }
 0xa22   : > { %10282 = vmatprep.subr.mxu1 %v11695_v1 }
 0xabf   : > { %v10166_v30 = vpop.f32.mrf.mxu0 }
 0xac0   : > { %v10180_v57 = vpop.f32.mrf.mxu1 }
 0xac1   : > { %v6413_v58 = vpop.f32.mrf.mxu0  ;;  %v6516_v2 = vadd.f32 %v10180_v57, %v10166_v30 }
 0xac2   : > { %v6510_v7 = vpop.f32.mrf.mxu1 }
 0xac3   : > { %v6511_v6 = vadd.f32 %v6510_v7, %v6413_v58 }
 0xac5   : > { %v10169_v5 = vpop.f32.mrf.mxu0  ;;  %v10183_v12 = vpop.f32.mrf.mxu1 }
 0xac6   : > { %v6526_v24 = vadd.f32 %v10183_v12, %v10169_v5 }
 0xac7   : > { %v6423_v27 = vpop.f32.mrf.mxu0  ;;  %v6520_v8 = vpop.f32.mrf.mxu1 }
 0xac8   : > { %v6521_v16 = vadd.f32 %v6520_v8, %v6423_v27 }
 0xacb   : > { %v10194_v4 = vpop.f32.mrf.mxu0  ;;  %v10208_v28 = vpop.f32.mrf.mxu1 }
 0xacc   : > { %v6691_v52 = vadd.f32 %v10208_v28, %v10194_v4 }
 0xacd   : > { %v6600_v11 = vpop.f32.mrf.mxu0  ;;  %v6685_v34 = vpop.f32.mrf.mxu1 }
 0xace   : > { %v6686_v21 = vadd.f32 %v6685_v34, %v6600_v11  ;;  %v7199_v34 = vld [vmem:[#allocation8 + $0x7e8] sm:$0xff] }
 0xad1   : > { %v10197_v13 = vpop.f32.mrf.mxu0  ;;  %v10211_v38 = vpop.f32.mrf.mxu1 }
 0xad2   : > { %v6701_v30 = vadd.f32 %v10211_v38, %v10197_v13 }
 0xad3   : > { %v6610_v15 = vpop.f32.mrf.mxu0  ;;  %v6695_v49 = vpop.f32.mrf.mxu1 }
 0xad4   : > { %v6696_v7 = vadd.f32 %v6695_v49, %v6610_v15 }
 0xad6   : > { %v10222_v50 = vpop.f32.mrf.mxu0 }
 0xad7   : > { %v6811_v33 = vadd.f32 %v10222_v50, %v6516_v2  ;;  %v10236_v19 = vpop.f32.mrf.mxu1 }
 0xad8   : > { %v6791_v23 = vpop.f32.mrf.mxu0  ;;  %v6905_v48 = vadd.f32 %v10236_v19, %v6691_v52  ;;  %v7379_v19 = vld [vmem:[#allocation8 + $0x7d0] sm:$0xff] }
 0xad9   : > { %v6917_v9 = vadd.f32 %v8748_v59, %v6811_v33  ;;  %v6810_v26 = vadd.f32 %v6791_v23, %v6511_v6  ;;  %v6885_v45 = vpop.f32.mrf.mxu1 }
 0xada   : > { %v10225_v39 = vpop.f32.mrf.mxu0  ;;  %v6904_v53 = vadd.f32 %v6885_v45, %v6686_v21  ;;  %v6929_v58 = vadd.f32 %v8749_v29, %v6905_v48  ;;  %v7377_v45 = vld [vmem:[#allocation8 + $0x7c0] sm:$0xff] }
 0xadb   : > { %v8751_v17 = vmul.f32 -1.442695, %v6917_v9  ;;  %v6916_v41 = vadd.f32 %v8748_v59, %v6810_v26  ;;  %v6813_v18 = vadd.f32 %v10225_v39, %v6526_v24  ;;  %v10239_v61 = vpop.f32.mrf.mxu1  ;;  %v7483_v21 = vld [vmem:[#allocation8 + $0x820] sm:$0xff] }
 0xadc   : > { %v6801_v36 = vpop.f32.mrf.mxu0  ;;  %v6907_v2 = vadd.f32 %v10239_v61, %v6701_v30  ;;  %v7669_v30 = vld [vmem:[#allocation8 + $0x850] sm:$0xff] }
 0xadd   : > { %10637 = vpow2.f32 %v8751_v17  ;;  %v8750_v46 = vmul.f32 -1.442695, %v6916_v41  ;;  %v6919_v0 = vadd.f32 %v8748_v59, %v6813_v18  ;;  %v6812_v32 = vadd.f32 %v6801_v36, %v6521_v16  ;;  %v6895_v27 = vpop.f32.mrf.mxu1 }
 0xade   : > { %v6906_v33 = vadd.f32 %v6895_v27, %v6696_v7  ;;  %v6931_v9 = vadd.f32 %v8749_v29, %v6907_v2  ;;  %v7654_v27 = vld [vmem:[#allocation8 + $0x868] sm:$0xff]  ;;  %v7653_v7 = vld [vmem:[#allocation8 + $0x860] sm:$0xff]  ;;  %v11753_v2 = vld [vmem:[#allocation8 + $0x8b8] sm:$0xff] }
 0xadf   : > { %10639 = vpow2.f32 %v8750_v46  ;;  %v8753_v37 = vmul.f32 -1.442695, %v6919_v0  ;;  %v6918_v42 = vadd.f32 %v8748_v59, %v6812_v32  ;;  %v6928_v59 = vadd.f32 %v8749_v29, %v6904_v53  ;;  %v7670_v53 = vld [vmem:[#allocation8 + $0x858] sm:$0xff] }
 0xae0   : > { %v6930_v41 = vadd.f32 %v8749_v29, %v6906_v33 }
 0xae1   : > { %10641 = vpow2.f32 %v8753_v37  ;;  %v8752_v54 = vmul.f32 -1.442695, %v6918_v42  ;;  %v7200_v42 = vld [vmem:[#allocation8 + $0x7f0] sm:$0xff] }
 0xae3   : > { %10643 = vpow2.f32 %v8752_v54  ;;  %v6992_v54 = vld [vmem:[#allocation8 + $0x810] sm:$0xff] }
 0xaea   : > { %v10638_v55 = vpop.eup %10637 }
 0xaeb   : > { %v6945_v43 = vadd.f32 1.0, %v10638_v55 }
 0xaec   : > { %v10640_v10 = vpop.eup %10639 }
 0xaed   : > { %10645 = vrcp.f32 %v6945_v43  ;;  %v6944_v40 = vadd.f32 1.0, %v10640_v10  ;;  %v6991_v43 = vld [vmem:[#allocation8 + $0x808] sm:$0xff]  ;;  %v7198_v10 = vld [vmem:[#allocation8 + $0x7e0] sm:$0xff] }
 0xaee   : > { %v10642_v44 = vpop.eup %10641 }
 0xaef   : > { %10647 = vrcp.f32 %v6944_v40  ;;  %v6947_v63 = vadd.f32 1.0, %v10642_v44  ;;  %v7380_v40 = vld [vmem:[#allocation8 + $0x7d8] sm:$0xff] }
 0xaf0   : > { %v10644_v51 = vpop.eup %10643  ;;  %v7486_v44 = vld [vmem:[#allocation8 + $0x838] sm:$0xff] }
 0xaf1   : > { %10649 = vrcp.f32 %v6947_v63  ;;  %v6946_v20 = vadd.f32 1.0, %v10644_v51  ;;  %v7485_v63 = vld [vmem:[#allocation8 + $0x830] sm:$0xff]  ;;  %v7378_v51 = vld [vmem:[#allocation8 + $0x7c8] sm:$0xff] }
 0xaf3   : > { %10651 = vrcp.f32 %v6946_v20  ;;  %v7484_v20 = vld [vmem:[#allocation8 + $0x828] sm:$0xff] }
 0xafa   : > { %v10646_v62 = vpop.eup %10645 }
 0xafb   : > { %v6961_v5 = vsub.f32 1.0, %v10646_v62  ;;  %v6957_v12 = vmul.f32 %v10646_v62, %v11656_v22  ;;  %v7656_v62 = vld [vmem:[#allocation8 + $0x878] sm:$0xff] }
 0xafc   : > { %v10648_v57 = vpop.eup %10647 }
 0xafd   : > { %v6965_v50 = vmul.f32 %v6961_v5, %v6929_v58  ;;  %v6960_v6 = vsub.f32 1.0, %v10648_v57  ;;  %v6956_v23 = vmul.f32 %v10648_v57, %v11651_v31  ;;  %v7655_v58 = vld [vmem:[#allocation8 + $0x870] sm:$0xff]  ;;  %v7668_v5 = vld [vmem:[#allocation8 + $0x848] sm:$0xff]  ;;  %v7667_v57 = vld [vmem:[#allocation8 + $0x840] sm:$0xff] }
 0xafe   : > { %v10650_v4 = vpop.eup %10649 }
 0xaff   : > { %v6969_v11 = vadd.f32 %v6965_v50, %v6957_v12  ;;  %v6964_v8 = vmul.f32 %v6960_v6, %v6928_v59  ;;  %v6963_v26 = vsub.f32 1.0, %v10650_v4  ;;  %v6959_v15 = vmul.f32 %v10650_v4, %v11669_v47  ;;  %v11755_v12 = vld [vmem:[#allocation8 + $0x8d8] sm:$0xff] }
 0xb00   : > { %v10652_v13 = vpop.eup %10651 }
 0xb01   : > { %v6973_v24 = vmul.f32 %v11149_v3, %v6969_v11  ;;  %v6968_v39 = vadd.f32 %v6964_v8, %v6956_v23  ;;  %v6967_v17 = vmul.f32 %v6963_v26, %v6931_v9  ;;  %v6962_v22 = vsub.f32 1.0, %v10652_v13 }
 0xb02   : > { %v6958_v36 = vmul.f32 %v10652_v13, %v11663_v35 }
 0xb03   : > { %6977 = vst.msk [vmem:[#allocation2 + $0xd] sm:$0xff] %vm277_vm1, %v6973_v24  ;;  %v6972_v16 = vmul.f32 %v11153_v60, %v6968_v39  ;;  %v6971_v18 = vadd.f32 %v6967_v17, %v6959_v15  ;;  %v6966_v31 = vmul.f32 %v6962_v22, %v6930_v41  ;;  %v8778_v15 = vld [vmem:[#allocation10 + $0xa] ss:$0 sm:$0xff] }
 0xb05   : > { %6976 = vst.msk [vmem:[#allocation2 + $0x5] sm:$0xff] %vm277_vm1, %v6972_v16  ;;  %v6975_v46 = vmul.f32 %v11158_v14, %v6971_v18  ;;  %v6970_v0 = vadd.f32 %v6966_v31, %v6958_v36 }
 0xb07   : > { %6979 = vst.msk [vmem:[#allocation2 + $0x2d] sm:$0xff] %vm277_vm1, %v6975_v46  ;;  %v6974_v47 = vmul.f32 %v11166_v25, %v6970_v0 }
 0xb09   : > { %6978 = vst.msk [vmem:[#allocation2 + $0x25] sm:$0xff] %vm277_vm1, %v6974_v47 }
 0xb0a   : > { %v11716_v35 = vld [vmem:[#allocation2 + $0xd] sm:$0xff] }
 0xb0b   : > { %v7373_v48 = vld [vmem:[#allocation2 + $0xe] sm:$0xff] }
 0xb0c   : > { %v6994_v32 = vld [vmem:[#allocation2 + $0x4] sm:$0xff]  ;;  %v6995_v37 = vld [vmem:[#allocation2 + $0xc] sm:$0xff] }
 0xb0d   : > { %v11711_v28 = vld [vmem:[#allocation2 + $0x5] sm:$0xff]  ;;  %10248 = vmatprep.mubr.msk.f32.mxu0 %vm277_vm1, %v6994_v32 }
 0xb0e   : > { %10262 = vmatprep.mubr.msk.f32.mxu1 %vm277_vm1, %v11711_v28  ;;  %10249 = vmatmul.mubr.msk.f32.vlgmr.msra.gmra.mxu0 %vm277_vm1, %v6995_v37  ;;  %v7372_v52 = vld [vmem:[#allocation2 + $0x6] sm:$0xff]  ;;  %v7375_v29 = vld [vmem:[#allocation2 + $0x2e] sm:$0xff] }
 0xb0f   : > { %10263 = vmatmul.mubr.msk.f32.vlgmr.msra.gmra.mxu1 %vm277_vm1, %v11716_v35  ;;  %10269 = vmatpush3.msra.mxu0 %v11693_v56  ;;  %v11729_v56 = vld [vmem:[#allocation2 + $0x2d] sm:$0xff] }
 0xb10   : > { %10283 = vmatpush3.msra.mxu1 %v11695_v1  ;;  %10270 = vmatprep.subr.mxu0 %v7200_v42  ;;  %v6996_v38 = vld [vmem:[#allocation2 + $0x24] sm:$0xff]  ;;  %v6997_v49 = vld [vmem:[#allocation2 + $0x2c] sm:$0xff] }
 0xb11   : > { %10284 = vmatprep.subr.mxu1 %v6992_v54  ;;  %10271 = vmatpush3.msra.mxu0 %v7200_v42  ;;  %v11723_v55 = vld [vmem:[#allocation2 + $0x25] sm:$0xff] }
 0xb12   : > { %10285 = vmatpush3.msra.mxu1 %v6992_v54  ;;  %10251 = vmatprep.mubr.msk.f32.mxu0 %vm277_vm1, %v6996_v38  ;;  %v6990_v1 = vld [vmem:[#allocation8 + $0x800] sm:$0xff] }
 0xb13   : > { %10265 = vmatprep.mubr.msk.f32.mxu1 %vm277_vm1, %v11723_v55  ;;  %10272 = vmatprep.subr.mxu0 %v7199_v34  ;;  %v7374_v61 = vld [vmem:[#allocation2 + $0x26] sm:$0xff] }
 0xb14   : > { %10252 = vmatmul.mubr.msk.f32.gmra.mxu0 %vm277_vm1, %v6997_v49  ;;  %10266 = vmatmul.mubr.msk.f32.gmra.mxu1 %vm277_vm1, %v11729_v56 }
 0xb15   : > { %10273 = vmatpush3.msra.mxu0 %v7199_v34  ;;  %10286 = vmatprep.subr.mxu1 %v6991_v43 }
 0xb16   : > { %10274 = vmatprep.subr.mxu0 %v7198_v10  ;;  %10276 = vmatprep.mubr.msk.f32.mxu0 %vm277_vm1, %v6994_v32 }
 0xb17   : > { %10287 = vmatpush3.msra.mxu1 %v6991_v43  ;;  %10290 = vmatprep.mubr.msk.f32.mxu1 %vm277_vm1, %v11711_v28 }
 0xb18   : > { %10275 = vmatpush3.msra.mxu0 %v7198_v10  ;;  %10288 = vmatprep.subr.mxu1 %v6990_v1 }
 0xb19   : > { %10296 = vmatprep.subr.mxu0 %v7380_v40  ;;  %10289 = vmatpush3.msra.mxu1 %v6990_v1 }
 0xb1a   : > { %10277 = vmatmul.mubr.msk.f32.vlgmr.msra.gmra.mxu0 %vm277_vm1, %v6995_v37  ;;  %10291 = vmatmul.mubr.msk.f32.vlgmr.msra.gmra.mxu1 %vm277_vm1, %v11716_v35 }
 0xb1b   : > { %10297 = vmatpush3.msra.mxu0 %v7380_v40  ;;  %10310 = vmatprep.subr.mxu1 %v7486_v44 }
 0xb1c   : > { %10279 = vmatprep.mubr.msk.f32.mxu0 %vm277_vm1, %v6996_v38  ;;  %10293 = vmatprep.mubr.msk.f32.mxu1 %vm277_vm1, %v11723_v55 }
 0xb1d   : > { %10298 = vmatprep.subr.mxu0 %v7379_v19  ;;  %10311 = vmatpush3.msra.mxu1 %v7486_v44 }
 0xb1e   : > { %10299 = vmatpush3.msra.mxu0 %v7379_v19  ;;  %10312 = vmatprep.subr.mxu1 %v7485_v63 }
 0xb1f   : > { %10300 = vmatprep.subr.mxu0 %v7378_v51  ;;  %10313 = vmatpush3.msra.mxu1 %v7485_v63 }
 0xb20   : > { %10280 = vmatmul.mubr.msk.f32.gmra.mxu0 %vm277_vm1, %v6997_v49  ;;  %10294 = vmatmul.mubr.msk.f32.gmra.mxu1 %vm277_vm1, %v11729_v56 }
 0xb21   : > { %10301 = vmatpush3.msra.mxu0 %v7378_v51  ;;  %10314 = vmatprep.subr.mxu1 %v7484_v20 }
 0xb22   : > { %10302 = vmatprep.subr.mxu0 %v7377_v45  ;;  %10304 = vmatprep.mubr.msk.f32.mxu0 %vm277_vm1, %v7372_v52 }
 0xb23   : > { %10315 = vmatpush3.msra.mxu1 %v7484_v20  ;;  %10318 = vmatprep.mubr.msk.f32.mxu1 %vm277_vm1, %v7372_v52 }
 0xb24   : > { %10303 = vmatpush3.msra.mxu0 %v7377_v45  ;;  %10316 = vmatprep.subr.mxu1 %v7483_v21 }
 0xb25   : > { %10305 = vmatmul.mubr.msk.f32.vlgmr.msra.gmra.mxu0 %vm277_vm1, %v7373_v48  ;;  %10317 = vmatpush3.msra.mxu1 %v7483_v21 }
 0xb26   : > { %10307 = vmatprep.mubr.msk.f32.mxu0 %vm277_vm1, %v7374_v61  ;;  %10319 = vmatmul.mubr.msk.f32.vlgmr.msra.gmra.mxu1 %vm277_vm1, %v7373_v48 }
 0xb27   : > { %10321 = vmatprep.mubr.msk.f32.mxu1 %vm277_vm1, %v7374_v61  ;;  %10324 = vmatprep.subr.mxu0 %v7670_v53 }
 0xb28   : > { %10338 = vmatprep.subr.mxu1 %v7656_v62  ;;  %10325 = vmatpush3.msra.mxu0 %v7670_v53 }
 0xb29   : > { %10308 = vmatmul.mubr.msk.f32.gmra.mxu0 %vm277_vm1, %v7375_v29  ;;  %10339 = vmatpush3.msra.mxu1 %v7656_v62 }
 0xb2a   : > { %10322 = vmatmul.mubr.msk.f32.gmra.mxu1 %vm277_vm1, %v7375_v29  ;;  %10326 = vmatprep.subr.mxu0 %v7669_v30 }
 0xb2b   : > { %10340 = vmatprep.subr.mxu1 %v7655_v58  ;;  %10327 = vmatpush3.msra.mxu0 %v7669_v30 }
 0xb2c   : > { %10341 = vmatpush3.msra.mxu1 %v7655_v58  ;;  %10328 = vmatprep.subr.mxu0 %v7668_v5 }
 0xb2d   : > { %10342 = vmatprep.subr.mxu1 %v7654_v27  ;;  %10329 = vmatpush3.msra.mxu0 %v7668_v5 }
 0xb2e   : > { %10343 = vmatpush3.msra.mxu1 %v7654_v27  ;;  %10330 = vmatprep.subr.mxu0 %v7667_v57  ;;  %v8779_v27 = vld [vmem:[#allocation11 + $0xa] ss:$0 sm:$0xff] }
 0xb2f   : > { %10344 = vmatprep.subr.mxu1 %v7653_v7  ;;  %10331 = vmatpush3.msra.mxu0 %v7667_v57 }
 0xb30   : > { %10345 = vmatpush3.msra.mxu1 %v7653_v7  ;;  %10352 = vmatprep.subr.mxu0 %v11753_v2 }
 0xb31   : > { %10366 = vmatprep.subr.mxu1 %v11755_v12 }
 0xbce   : > { %v10250_v50 = vpop.f32.mrf.mxu0 }
 0xbcf   : > { %v10264_v11 = vpop.f32.mrf.mxu1 }
 0xbd0   : > { %v7081_v59 = vpop.f32.mrf.mxu0  ;;  %v7184_v13 = vadd.f32 %v10264_v11, %v10250_v50 }
 0xbd1   : > { %v7178_v8 = vpop.f32.mrf.mxu1 }
 0xbd2   : > { %v7179_v17 = vadd.f32 %v7178_v8, %v7081_v59 }
 0xbd4   : > { %v10253_v6 = vpop.f32.mrf.mxu0  ;;  %v10267_v24 = vpop.f32.mrf.mxu1 }
 0xbd5   : > { %v7194_v31 = vadd.f32 %v10267_v24, %v10253_v6 }
 0xbd6   : > { %v7091_v33 = vpop.f32.mrf.mxu0  ;;  %v7188_v16 = vpop.f32.mrf.mxu1 }
 0xbd7   : > { %v7189_v32 = vadd.f32 %v7188_v16, %v7091_v33 }
 0xbda   : > { %v10278_v4 = vpop.f32.mrf.mxu0  ;;  %v10292_v49 = vpop.f32.mrf.mxu1 }
 0xbdb   : > { %v7359_v62 = vadd.f32 %v10292_v49, %v10278_v4 }
 0xbdc   : > { %v7268_v23 = vpop.f32.mrf.mxu0  ;;  %v7353_v40 = vpop.f32.mrf.mxu1 }
 0xbdd   : > { %v7354_v30 = vadd.f32 %v7353_v40, %v7268_v23  ;;  %v7867_v40 = vld [vmem:[#allocation8 + $0x8a8] sm:$0xff] }
 0xbe0   : > { %v10281_v9 = vpop.f32.mrf.mxu0  ;;  %v10295_v44 = vpop.f32.mrf.mxu1 }
 0xbe1   : > { %v7369_v50 = vadd.f32 %v10295_v44, %v10281_v9 }
 0xbe2   : > { %v7278_v26 = vpop.f32.mrf.mxu0  ;;  %v7363_v63 = vpop.f32.mrf.mxu1 }
 0xbe3   : > { %v7364_v8 = vadd.f32 %v7363_v63, %v7278_v26 }
 0xbe5   : > { %v10306_v39 = vpop.f32.mrf.mxu0 }
 0xbe6   : > { %v7479_v41 = vadd.f32 %v10306_v39, %v7184_v13  ;;  %v10320_v21 = vpop.f32.mrf.mxu1 }
 0xbe7   : > { %v7459_v22 = vpop.f32.mrf.mxu0  ;;  %v7573_v58 = vadd.f32 %v10320_v21, %v7359_v62  ;;  %v8047_v21 = vld [vmem:[#allocation8 + $0x890] sm:$0xff] }
 0xbe8   : > { %v7585_v18 = vadd.f32 %v8778_v15, %v7479_v41  ;;  %v7478_v36 = vadd.f32 %v7459_v22, %v7179_v17  ;;  %v7553_v53 = vpop.f32.mrf.mxu1 }
 0xbe9   : > { %v10309_v46 = vpop.f32.mrf.mxu0  ;;  %v7572_v57 = vadd.f32 %v7553_v53, %v7354_v30  ;;  %v7597_v59 = vadd.f32 %v8779_v27, %v7573_v58  ;;  %v8045_v53 = vld [vmem:[#allocation8 + $0x880] sm:$0xff] }
 0xbea   : > { %v8781_v0 = vmul.f32 -1.442695, %v7585_v18  ;;  %v7584_v47 = vadd.f32 %v8778_v15, %v7478_v36  ;;  %v7481_v37 = vadd.f32 %v10309_v46, %v7194_v31  ;;  %v10323_v5 = vpop.f32.mrf.mxu1  ;;  %v8151_v30 = vld [vmem:[#allocation8 + $0x8e0] sm:$0xff] }
 0xbeb   : > { %v7469_v42 = vpop.f32.mrf.mxu0  ;;  %v7575_v13 = vadd.f32 %v10323_v5, %v7369_v50 }
 0xbec   : > { %10653 = vpow2.f32 %v8781_v0  ;;  %v8780_v54 = vmul.f32 -1.442695, %v7584_v47  ;;  %v7587_v34 = vadd.f32 %v8778_v15, %v7481_v37  ;;  %v7480_v38 = vadd.f32 %v7469_v42, %v7189_v32  ;;  %v7563_v33 = vpop.f32.mrf.mxu1 }
 0xbed   : > { %v7574_v41 = vadd.f32 %v7563_v33, %v7364_v8  ;;  %v7599_v18 = vadd.f32 %v8779_v27, %v7575_v13 }
 0xbee   : > { %10655 = vpow2.f32 %v8780_v54  ;;  %v8783_v43 = vmul.f32 -1.442695, %v7587_v34  ;;  %v7586_v10 = vadd.f32 %v8778_v15, %v7480_v38  ;;  %v7596_v15 = vadd.f32 %v8779_v27, %v7572_v57 }
 0xbef   : > { %v7598_v47 = vadd.f32 %v8779_v27, %v7574_v41  ;;  %v8808_v41 = vld [vmem:[#allocation10 + $0xb] ss:$0 sm:$0xff] }
 0xbf0   : > { %10657 = vpow2.f32 %v8783_v43  ;;  %v8782_v1 = vmul.f32 -1.442695, %v7586_v10  ;;  %v7868_v10 = vld [vmem:[#allocation8 + $0x8b0] sm:$0xff] }
 0xbf2   : > { %10659 = vpow2.f32 %v8782_v1  ;;  %v7660_v1 = vld [vmem:[#allocation8 + $0x8d0] sm:$0xff] }
 0xbf9   : > { %v10654_v19 = vpop.eup %10653 }
 0xbfa   : > { %v7613_v51 = vadd.f32 1.0, %v10654_v19 }
 0xbfb   : > { %v10656_v20 = vpop.eup %10655 }
 0xbfc   : > { %10661 = vrcp.f32 %v7613_v51  ;;  %v7612_v45 = vadd.f32 1.0, %v10656_v20  ;;  %v7659_v51 = vld [vmem:[#allocation8 + $0x8c8] sm:$0xff]  ;;  %v7866_v20 = vld [vmem:[#allocation8 + $0x8a0] sm:$0xff] }
 0xbfd   : > { %v10658_v52 = vpop.eup %10657 }
 0xbfe   : > { %10663 = vrcp.f32 %v7612_v45  ;;  %v7615_v48 = vadd.f32 1.0, %v10658_v52  ;;  %v8048_v45 = vld [vmem:[#allocation8 + $0x898] sm:$0xff] }
 0xbff   : > { %v10660_v61 = vpop.eup %10659  ;;  %v8154_v52 = vld [vmem:[#allocation8 + $0x8f8] sm:$0xff] }
 0xc00   : > { %10665 = vrcp.f32 %v7615_v48  ;;  %v7614_v29 = vadd.f32 1.0, %v10660_v61  ;;  %v8153_v48 = vld [vmem:[#allocation8 + $0x8f0] sm:$0xff]  ;;  %v8046_v61 = vld [vmem:[#allocation8 + $0x888] sm:$0xff] }
 0xc02   : > { %10667 = vrcp.f32 %v7614_v29  ;;  %v8152_v29 = vld [vmem:[#allocation8 + $0x8e8] sm:$0xff] }
 0xc09   : > { %v10662_v7 = vpop.eup %10661 }
 0xc0a   : > { %v7629_v6 = vsub.f32 1.0, %v10662_v7  ;;  %v7625_v24 = vmul.f32 %v10662_v7, %v11716_v35 }
 0xc0b   : > { %v10664_v11 = vpop.eup %10663 }
 0xc0c   : > { %v7633_v39 = vmul.f32 %v7629_v6, %v7597_v59  ;;  %v7628_v17 = vsub.f32 1.0, %v10664_v11  ;;  %v7624_v22 = vmul.f32 %v10664_v11, %v11711_v28 }
 0xc0d   : > { %v10666_v4 = vpop.eup %10665 }
 0xc0e   : > { %v7637_v23 = vadd.f32 %v7633_v39, %v7625_v24  ;;  %v7632_v16 = vmul.f32 %v7628_v17, %v7596_v15  ;;  %v7631_v36 = vsub.f32 1.0, %v10666_v4  ;;  %v7627_v26 = vmul.f32 %v10666_v4, %v11729_v56 }
 0xc0f   : > { %v10668_v9 = vpop.eup %10667 }
 0xc10   : > { %v7641_v31 = vmul.f32 %v11149_v3, %v7637_v23  ;;  %v7636_v46 = vadd.f32 %v7632_v16, %v7624_v22  ;;  %v7635_v0 = vmul.f32 %v7631_v36, %v7599_v18  ;;  %v7630_v35 = vsub.f32 1.0, %v10668_v9 }
 0xc11   : > { %v7626_v42 = vmul.f32 %v10668_v9, %v11723_v55 }
 0xc12   : > { %7645 = vst.msk [vmem:[#allocation2 + $0xd] sm:$0xff] %vm277_vm1, %v7641_v31  ;;  %v7640_v32 = vmul.f32 %v11153_v60, %v7636_v46  ;;  %v7639_v37 = vadd.f32 %v7635_v0, %v7627_v26  ;;  %v7634_v28 = vmul.f32 %v7630_v35, %v7598_v47 }
 0xc14   : > { %7644 = vst.msk [vmem:[#allocation2 + $0x5] sm:$0xff] %vm277_vm1, %v7640_v32  ;;  %v7643_v54 = vmul.f32 %v11158_v14, %v7639_v37  ;;  %v7638_v34 = vadd.f32 %v7634_v28, %v7626_v42 }
 0xc16   : > { %7647 = vst.msk [vmem:[#allocation2 + $0x2d] sm:$0xff] %vm277_vm1, %v7643_v54  ;;  %v7642_v56 = vmul.f32 %v11166_v25, %v7638_v34 }
 0xc18   : > { %7646 = vst.msk [vmem:[#allocation2 + $0x25] sm:$0xff] %vm277_vm1, %v7642_v56 }
 0xc19   : > { %v11776_v55 = vld [vmem:[#allocation2 + $0xd] sm:$0xff] }
 0xc1a   : > { %v8041_v58 = vld [vmem:[#allocation2 + $0xe] sm:$0xff] }
 0xc1b   : > { %v7662_v38 = vld [vmem:[#allocation2 + $0x4] sm:$0xff]  ;;  %v7663_v43 = vld [vmem:[#allocation2 + $0xc] sm:$0xff] }
 0xc1c   : > { %v11771_v49 = vld [vmem:[#allocation2 + $0x5] sm:$0xff]  ;;  %10332 = vmatprep.mubr.msk.f32.mxu0 %vm277_vm1, %v7662_v38 }
 0xc1d   : > { %10346 = vmatprep.mubr.msk.f32.mxu1 %vm277_vm1, %v11771_v49  ;;  %10333 = vmatmul.mubr.msk.f32.vlgmr.msra.gmra.mxu0 %vm277_vm1, %v7663_v43  ;;  %v8040_v62 = vld [vmem:[#allocation2 + $0x6] sm:$0xff]  ;;  %v8043_v27 = vld [vmem:[#allocation2 + $0x2e] sm:$0xff] }
 0xc1e   : > { %10347 = vmatmul.mubr.msk.f32.vlgmr.msra.gmra.mxu1 %vm277_vm1, %v11776_v55  ;;  %10353 = vmatpush3.msra.mxu0 %v11753_v2  ;;  %v11789_v2 = vld [vmem:[#allocation2 + $0x2d] sm:$0xff] }
 0xc1f   : > { %10367 = vmatpush3.msra.mxu1 %v11755_v12  ;;  %10354 = vmatprep.subr.mxu0 %v7868_v10  ;;  %v7664_v44 = vld [vmem:[#allocation2 + $0x24] sm:$0xff]  ;;  %v7665_v63 = vld [vmem:[#allocation2 + $0x2c] sm:$0xff] }
 0xc20   : > { %10368 = vmatprep.subr.mxu1 %v7660_v1  ;;  %10355 = vmatpush3.msra.mxu0 %v7868_v10  ;;  %v11783_v19 = vld [vmem:[#allocation2 + $0x25] sm:$0xff] }
 0xc21   : > { %10369 = vmatpush3.msra.mxu1 %v7660_v1  ;;  %10335 = vmatprep.mubr.msk.f32.mxu0 %vm277_vm1, %v7664_v44  ;;  %v7658_v12 = vld [vmem:[#allocation8 + $0x8c0] sm:$0xff] }
 0xc22   : > { %10349 = vmatprep.mubr.msk.f32.mxu1 %vm277_vm1, %v11783_v19  ;;  %10356 = vmatprep.subr.mxu0 %v7867_v40  ;;  %v8042_v5 = vld [vmem:[#allocation2 + $0x26] sm:$0xff] }
 0xc23   : > { %10336 = vmatmul.mubr.msk.f32.gmra.mxu0 %vm277_vm1, %v7665_v63  ;;  %10350 = vmatmul.mubr.msk.f32.gmra.mxu1 %vm277_vm1, %v11789_v2 }
 0xc24   : > { %10357 = vmatpush3.msra.mxu0 %v7867_v40  ;;  %10370 = vmatprep.subr.mxu1 %v7659_v51 }
 0xc25   : > { %10358 = vmatprep.subr.mxu0 %v7866_v20  ;;  %10360 = vmatprep.mubr.msk.f32.mxu0 %vm277_vm1, %v7662_v38 }
 0xc26   : > { %10371 = vmatpush3.msra.mxu1 %v7659_v51  ;;  %10374 = vmatprep.mubr.msk.f32.mxu1 %vm277_vm1, %v11771_v49 }
 0xc27   : > { %10359 = vmatpush3.msra.mxu0 %v7866_v20  ;;  %10372 = vmatprep.subr.mxu1 %v7658_v12 }
 0xc28   : > { %10380 = vmatprep.subr.mxu0 %v8048_v45  ;;  %10373 = vmatpush3.msra.mxu1 %v7658_v12 }
 0xc29   : > { %10361 = vmatmul.mubr.msk.f32.vlgmr.msra.gmra.mxu0 %vm277_vm1, %v7663_v43  ;;  %10375 = vmatmul.mubr.msk.f32.vlgmr.msra.gmra.mxu1 %vm277_vm1, %v11776_v55 }
 0xc2a   : > { %10381 = vmatpush3.msra.mxu0 %v8048_v45  ;;  %10394 = vmatprep.subr.mxu1 %v8154_v52 }
 0xc2b   : > { %10363 = vmatprep.mubr.msk.f32.mxu0 %vm277_vm1, %v7664_v44  ;;  %10377 = vmatprep.mubr.msk.f32.mxu1 %vm277_vm1, %v11783_v19 }
 0xc2c   : > { %10382 = vmatprep.subr.mxu0 %v8047_v21  ;;  %10395 = vmatpush3.msra.mxu1 %v8154_v52 }
 0xc2d   : > { %10383 = vmatpush3.msra.mxu0 %v8047_v21  ;;  %10396 = vmatprep.subr.mxu1 %v8153_v48 }
 0xc2e   : > { %10384 = vmatprep.subr.mxu0 %v8046_v61  ;;  %10397 = vmatpush3.msra.mxu1 %v8153_v48 }
 0xc2f   : > { %10364 = vmatmul.mubr.msk.f32.gmra.mxu0 %vm277_vm1, %v7665_v63  ;;  %10378 = vmatmul.mubr.msk.f32.gmra.mxu1 %vm277_vm1, %v11789_v2 }
 0xc30   : > { %10385 = vmatpush3.msra.mxu0 %v8046_v61  ;;  %10398 = vmatprep.subr.mxu1 %v8152_v29 }
 0xc31   : > { %10386 = vmatprep.subr.mxu0 %v8045_v53  ;;  %10388 = vmatprep.mubr.msk.f32.mxu0 %vm277_vm1, %v8040_v62 }
 0xc32   : > { %10399 = vmatpush3.msra.mxu1 %v8152_v29  ;;  %10402 = vmatprep.mubr.msk.f32.mxu1 %vm277_vm1, %v8040_v62  ;;  %v8809_v62 = vld [vmem:[#allocation11 + $0xb] ss:$0 sm:$0xff] }
 0xc33   : > { %10387 = vmatpush3.msra.mxu0 %v8045_v53  ;;  %10400 = vmatprep.subr.mxu1 %v8151_v30 }
 0xc34   : > { %10389 = vmatmul.mubr.msk.f32.vlgmr.msra.gmra.mxu0 %vm277_vm1, %v8041_v58  ;;  %10401 = vmatpush3.msra.mxu1 %v8151_v30 }
 0xc35   : > { %10391 = vmatprep.mubr.msk.f32.mxu0 %vm277_vm1, %v8042_v5  ;;  %10403 = vmatmul.mubr.msk.f32.vlgmr.msra.gmra.mxu1 %vm277_vm1, %v8041_v58 }
 0xc36   : > { %10405 = vmatprep.mubr.msk.f32.mxu1 %vm277_vm1, %v8042_v5 }
 0xc38   : > { %10392 = vmatmul.mubr.msk.f32.gmra.mxu0 %vm277_vm1, %v8043_v27 }
 0xc39   : > { %10406 = vmatmul.mubr.msk.f32.gmra.mxu1 %vm277_vm1, %v8043_v27 }
 0xcdd   : > { %v10334_v57 = vpop.f32.mrf.mxu0 }
 0xcde   : > { %v10348_v33 = vpop.f32.mrf.mxu1 }
 0xcdf   : > { %v7749_v7 = vpop.f32.mrf.mxu0  ;;  %v7852_v39 = vadd.f32 %v10348_v33, %v10334_v57 }
 0xce0   : > { %v7846_v8 = vpop.f32.mrf.mxu1 }
 0xce1   : > { %v7847_v4 = vadd.f32 %v7846_v8, %v7749_v7 }
 0xce3   : > { %v10337_v50 = vpop.f32.mrf.mxu0  ;;  %v10351_v15 = vpop.f32.mrf.mxu1 }
 0xce4   : > { %v7862_v9 = vadd.f32 %v10351_v15, %v10337_v50 }
 0xce5   : > { %v7759_v59 = vpop.f32.mrf.mxu0  ;;  %v7856_v16 = vpop.f32.mrf.mxu1 }
 0xce6   : > { %v7857_v0 = vadd.f32 %v7856_v16, %v7759_v59 }
 0xce9   : > { %v10362_v6 = vpop.f32.mrf.mxu0  ;;  %v10376_v28 = vpop.f32.mrf.mxu1 }
 0xcea   : > { %v8027_v48 = vadd.f32 %v10376_v28, %v10362_v6 }
 0xceb   : > { %v7936_v11 = vpop.f32.mrf.mxu0  ;;  %v8021_v38 = vpop.f32.mrf.mxu1 }
 0xcec   : > { %v8022_v61 = vadd.f32 %v8021_v38, %v7936_v11 }
 0xcef   : > { %v10365_v13 = vpop.f32.mrf.mxu0  ;;  %v10379_v43 = vpop.f32.mrf.mxu1 }
 0xcf0   : > { %v8037_v5 = vadd.f32 %v10379_v43, %v10365_v13 }
 0xcf1   : > { %v7946_v24 = vpop.f32.mrf.mxu0  ;;  %v8031_v1 = vpop.f32.mrf.mxu1 }
 0xcf2   : > { %v8032_v59 = vadd.f32 %v8031_v1, %v7946_v24 }
 0xcf4   : > { %v10390_v17 = vpop.f32.mrf.mxu0 }
 0xcf5   : > { %v8147_v23 = vadd.f32 %v10390_v17, %v7852_v39  ;;  %v10404_v20 = vpop.f32.mrf.mxu1 }
 0xcf6   : > { %v8127_v22 = vpop.f32.mrf.mxu0  ;;  %v8241_v29 = vadd.f32 %v10404_v20, %v8027_v48 }
 0xcf7   : > { %v8253_v18 = vadd.f32 %v8808_v41, %v8147_v23  ;;  %v8146_v36 = vadd.f32 %v8127_v22, %v7847_v4  ;;  %v8221_v21 = vpop.f32.mrf.mxu1 }
 0xcf8   : > { %v10393_v31 = vpop.f32.mrf.mxu0  ;;  %v8240_v30 = vadd.f32 %v8221_v21, %v8022_v61  ;;  %v8265_v27 = vadd.f32 %v8809_v62, %v8241_v29 }
 0xcf9   : > { %v8811_v46 = vmul.f32 -1.442695, %v8253_v18  ;;  %v8252_v26 = vadd.f32 %v8808_v41, %v8146_v36  ;;  %v8149_v47 = vadd.f32 %v10393_v31, %v7862_v9  ;;  %v10407_v53 = vpop.f32.mrf.mxu1 }
 0xcfa   : > { %v8137_v35 = vpop.f32.mrf.mxu0  ;;  %v8243_v33 = vadd.f32 %v10407_v53, %v8037_v5  ;;  %v8264_v15 = vadd.f32 %v8809_v62, %v8240_v30 }
 0xcfb   : > { %10669 = vpow2.f32 %v8811_v46  ;;  %v8810_v32 = vmul.f32 -1.442695, %v8252_v26  ;;  %v8255_v37 = vadd.f32 %v8808_v41, %v8149_v47  ;;  %v8148_v42 = vadd.f32 %v8137_v35, %v7857_v0  ;;  %v8231_v7 = vpop.f32.mrf.mxu1 }
 0xcfc   : > { %v8242_v6 = vadd.f32 %v8231_v7, %v8032_v59  ;;  %v8267_v13 = vadd.f32 %v8809_v62, %v8243_v33 }
 0xcfd   : > { %10671 = vpow2.f32 %v8810_v32  ;;  %v8813_v54 = vmul.f32 -1.442695, %v8255_v37  ;;  %v8254_v34 = vadd.f32 %v8808_v41, %v8148_v42 }
 0xcfe   : > { %v8266_v9 = vadd.f32 %v8809_v62, %v8242_v6 }
 0xcff   : > { %10673 = vpow2.f32 %v8813_v54  ;;  %v8812_v56 = vmul.f32 -1.442695, %v8254_v34 }
 0xd01   : > { %10675 = vpow2.f32 %v8812_v56 }
 0xd08   : > { %v10670_v10 = vpop.eup %10669 }
 0xd09   : > { %v8281_v40 = vadd.f32 1.0, %v10670_v10 }
 0xd0a   : > { %v10672_v44 = vpop.eup %10671 }
 0xd0b   : > { %10677 = vrcp.f32 %v8281_v40  ;;  %v8280_v63 = vadd.f32 1.0, %v10672_v44 }
 0xd0c   : > { %v10674_v51 = vpop.eup %10673 }
 0xd0d   : > { %10679 = vrcp.f32 %v8280_v63  ;;  %v8283_v12 = vadd.f32 1.0, %v10674_v51 }
 0xd0e   : > { %v10676_v45 = vpop.eup %10675 }
 0xd0f   : > { %10681 = vrcp.f32 %v8283_v12  ;;  %v8282_v52 = vadd.f32 1.0, %v10676_v45 }
 0xd11   : > { %10683 = vrcp.f32 %v8282_v52 }
 0xd18   : > { %v10678_v58 = vpop.eup %10677 }
 0xd19   : > { %v8297_v57 = vsub.f32 1.0, %v10678_v58  ;;  %v8293_v8 = vmul.f32 %v10678_v58, %v11776_v55 }
 0xd1a   : > { %v10680_v50 = vpop.eup %10679 }
 0xd1b   : > { %v8301_v39 = vmul.f32 %v8297_v57, %v8265_v27  ;;  %v8296_v17 = vsub.f32 1.0, %v10680_v50  ;;  %v8292_v4 = vmul.f32 %v10680_v50, %v11771_v49 }
 0xd1c   : > { %v10682_v11 = vpop.eup %10681 }
 0xd1d   : > { %v8305_v41 = vadd.f32 %v8301_v39, %v8293_v8  ;;  %v8300_v23 = vmul.f32 %v8296_v17, %v8264_v15  ;;  %v8299_v22 = vsub.f32 1.0, %v10682_v11  ;;  %v8295_v36 = vmul.f32 %v10682_v11, %v11789_v2 }
 0xd1e   : > { %v10684_v16 = vpop.eup %10683 }
 0xd1f   : > { %v8309_v18 = vmul.f32 %v11149_v3, %v8305_v41  ;;  %v8304_v24 = vadd.f32 %v8300_v23, %v8292_v4  ;;  %v8303_v55 = vmul.f32 %v8299_v22, %v8267_v13  ;;  %v8298_v31 = vsub.f32 1.0, %v10684_v16 }
 0xd20   : > { %v8294_v26 = vmul.f32 %v10684_v16, %v11783_v19 }
 0xd21   : > { %8313 = vst.msk [vmem:[%s265_s15 + $0x8] sm:$0xff] %vm277_vm1, %v8309_v18  ;;  %v8308_v49 = vmul.f32 %v11153_v60, %v8304_v24  ;;  %v8307_v46 = vadd.f32 %v8303_v55, %v8295_v36  ;;  %v8302_v0 = vmul.f32 %v8298_v31, %v8266_v9 }
 0xd23   : > { %8312 = vst.msk [vmem:[%s265_s15] sm:$0xff] %vm277_vm1, %v8308_v49  ;;  %v8311_v3 = vmul.f32 %v11158_v14, %v8307_v46  ;;  %v8306_v2 = vadd.f32 %v8302_v0, %v8294_v26 }
 0xd25   : > { %8315 = vst.msk [vmem:[%s265_s15 + $0x18] sm:$0xff] %vm277_vm1, %v8311_v3  ;;  %v8310_v60 = vmul.f32 %v11166_v25, %v8306_v2 }
 0xd27   : > { %8314 = vst.msk [vmem:[%s265_s15 + $0x10] sm:$0xff] %vm277_vm1, %v8310_v60 }
 0xd28   : > { %10812 = shalt.err (!%p10809_p9)
}
 0xd29   : > { %s10813_s14 = scalar_lea.hbm %s11828_s13, 512  ;;  %s10817_s28 = scalar_lea.hbm %s11881_s5, 1024 }
 0xd2a   : > { %p10814_p1 = scmp.ne.s32.totalorder %s11828_s13, %s10813_s14  ;;  %p10818_p8 = scmp.lt.s32.totalorder %s11828_s13, %s11881_s5 }
 0xd2b   : > { %p10819_p3 = scmp.lt.s32.totalorder %s10817_s28, %s10813_s14 }
 0xd2c   : > { %p10815_p4 = pnand %p10814_p1, %p11898_p12 }
 0xd2d   : > { %p10820_p11 = por %p10819_p3, %p10818_p8 }
 0xd2e   : > { %p10816_p6 = pneg %p10815_p4 }
 0xd30   : > { %p10821_p7 = pnand %p10820_p11, %p10816_p6 }
 0xd32   : > { %10824 = shalt.err (!%p10821_p7)
}
 0xd33   : > { %s10886_s15 = smov 128   ;;  %s10887_s20 = smov 8  }
 0xd34   : > { %10422 = dma.vmem_to_hbm [thread:$0]  (%p11898_p12), %s11830_s30, 512, %s11828_s13, %s8317_s0, %s10886_s15, %s10886_s15, %s10887_s20  }
 0xd35 PF: > { %s8346_s17 = sand.u32 1, %s10861_s21   ;;  %p11899_p13 = scmp.ne.s32.totalorder %s11887_s27, 0 }
 0xd36   : > { %p11900_p0 = scmp.ge.s32.totalorder %s10873_s24, 2  ;;  %s8347_s18 = scalar_lea.sflag [#allocation7], %s8346_s17 }
 0xd38   : > { %p10439_p5 = pnand %p11900_p0, %p11899_p13 }
 0xd3a   : > { %p10440_p10 = pneg %p10439_p5 }
 0xd3c   : > { %10856 = dma.done.wait (%p10440_p10), %s8347_s18, 512  }
 0xd3d   : > { %10858 = vsyncadd (%p10440_p10), %s8347_s18, 4294966784  ;;  %p24_p2 = scmp.ge.s32.totalorder %s10996_s25, 4   ;;  %s11901_s21 = smov %s10865_s22 }
 0xd3e   : > { %s11902_s22 = smov %s10869_s23  ;;  %s11903_s23 = smov %s11014_s6 }
 0xd3f   : > { %s11904_s24 = smov %s10996_s25  ;;  %26 = sbr.rel (!%p24_p2) target bundleno = 12 (0xc), region = 186 }
 0xd44   :  { %8352 = vsyncpa [#allocation6], 1 }
 0xd45   :  { %8354 = vsyncpa [#allocation6 + $0x1], 1 }
 0xd46   :  { %8355 = vsyncpa [#allocation9], 1 }
 0xd47   :  { %8356 = vsyncpa [#allocation12], 1 }
 0xd48   :  { %8357 = vsyncpa [#allocation7], 1 }
 0xd49   :  { %8359 = vsyncpa [#allocation7 + $0x1], 1 }

</bundles_post_ra>
